<compile_context>
chip_gen: v5e
topology: v5e:2x2
jax: 0.10.0
libtpu: 0.0.40
codegen_flags: <defaults>
</compile_context>

<pallas_src>
import functools

import jax
import jax.numpy as jnp
from jax.experimental import pallas as pl
from jax.experimental.pallas import tpu as pltpu

# ----------------------------------------------------------------- constants
C_IN = 4                         # network input channels
C_BASE = 8                       # features_base output channels
FC_INDIM = 32                    # TODO(synk): torch default fc_indim=512*4; shrunk to 32 for small test shapes
K1_PAD = 128                     # 9*C_IN = 36 taps*channels, padded to one lane tile
K2 = 9 * C_BASE                  # 72   branch-conv contraction dim (taps folded)
CO_FUSED = 4 * FC_INDIM          # 128  4 branch outputs fused along Cout (no padding)
NUM_CLASSES = [13, 37, 122, 200]
N_HEAD = sum(NUM_CLASSES)        # 372
N_HEAD_PAD = 384                 # padded to a multiple of 128 (lane-dense output)


# ------------------------------------------------------------------ kernel
def _fused_resnet_kernel(xp_ref, wb_ref, bb_ref, wbr_ref, bbr_ref, wh_ref, bh_ref,
                         o_ref, fb_ref, *, H, W, cb, padtop):
    """Whole forward for one batch element, entirely in VMEM.

    xp_ref : (1, H*W, K1_PAD)      bf16   pre-built base-conv patch matrix
    wb_ref : (K1_PAD, cb)          bf16   folded base conv weight
    bb_ref : (1, cb)               f32
    wbr_ref: (9*cb, CO_FUSED)      bf16   folded + branch-fused conv weight
    bbr_ref: (1, CO_FUSED)         f32
    wh_ref : (CO_FUSED, N_HEAD_PAD) bf16  block-diagonal fused head weight
    bh_ref : (1, N_HEAD_PAD)       f32
    o_ref  : (1, 1, N_HEAD_PAD)    f32    fused logits
    fb_ref : (3, padrows, cb)      f32    scratch: 3 pre-masked halo'd flat copies of feat
    """
    HW = H * W
    inv_hw = 1.0 / float(HW)

    # ---- features_base: 3x3 conv (taps pre-folded into K) + bias + ReLU: 1 matmul ----
    feat = jnp.dot(xp_ref[0], wb_ref[...], preferred_element_type=jnp.float32)
    feat = jnp.maximum(feat + bb_ref[...], 0.0)                      # (HW, cb) f32

    # ---- stage 3 flat, zero-halo'd copies of feat (pre-masked per horizontal shift) ----
    # A shift of the 3x3 window by (oy, ox) is a shift of oy*W + ox rows in the flat
    # (HW, cb) layout; the vertical border is handled by the zero halo rows, the
    # horizontal border by pre-zeroing the source column that would wrap a row.
    j = jax.lax.broadcasted_iota(jnp.int32, (HW, cb), 0) % W
    feat_l = jnp.where(j != (W - 1), feat, 0.0)   # source premask for ox = -1 taps
    feat_r = jnp.where(j != 0, feat, 0.0)         # source premask for ox = +1 taps
    fb_ref[...] = jnp.zeros_like(fb_ref)          # scratch is uninitialized: zero halo
    fb_ref[0, padtop:padtop + HW, :] = feat_l
    fb_ref[1, padtop:padtop + HW, :] = feat
    fb_ref[2, padtop:padtop + HW, :] = feat_r

    # ---- 4 fused feature branches: build (HW, 9*cb) patch, ONE matmul + bias + ReLU ----
    taps = []
    for dy in range(3):
        for dx in range(3):
            s = (dy - 1) * W + (dx - 1)
            taps.append(fb_ref[dx, padtop + s:padtop + s + HW, :])   # (HW, cb)
    patch = jnp.concatenate(taps, axis=-1).astype(jnp.bfloat16)      # (HW, 9*cb)

    y = jnp.dot(patch, wbr_ref[...], preferred_element_type=jnp.float32)
    y = jnp.maximum(y + bbr_ref[...], 0.0)                           # (HW, CO_FUSED) f32

    # ---- fused AdaptiveAvgPool2d(1): only the pooled row survives ----
    pooled = (jnp.sum(y, axis=0, keepdims=True) * inv_hw).astype(jnp.bfloat16)  # (1, CO)

    # ---- 4 fused Linear heads (block-diagonal weight) ----
    o_ref[0] = (jnp.dot(pooled, wh_ref[...], preferred_element_type=jnp.float32)
                + bh_ref[...])


def fused_forward_call(xpat, P, *, H, W):
    """Single pallas_call for the whole network; grid=(B,) sharded across cores."""
    B = xpat.shape[0]
    HW = H * W
    padtop = ((W + 1 + 7) // 8) * 8          # halo rows (>= W+1, sublane aligned)
    padrows = 2 * padtop + HW

    kernel = functools.partial(_fused_resnet_kernel, H=H, W=W, cb=C_BASE,
                               padtop=padtop)

    flops = B * 2 * (HW * K1_PAD * C_BASE
                     + HW * K2 * CO_FUSED
                     + CO_FUSED * N_HEAD_PAD)
    bytes_accessed = int(
        xpat.size * xpat.dtype.itemsize
        + sum(P[k].size * P[k].dtype.itemsize
              for k in ("wb", "bb", "wbr", "bbr", "wh", "bh"))
        + B * N_HEAD_PAD * 4)

    return pl.pallas_call(
        kernel,
        out_shape=jax.ShapeDtypeStruct((B, 1, N_HEAD_PAD), jnp.float32),
        grid_spec=pltpu.PrefetchScalarGridSpec(
            num_scalar_prefetch=0,
            grid=(B,),
            in_specs=[
                pl.BlockSpec((1, HW, K1_PAD), lambda b: (b, 0, 0)),
                pl.BlockSpec((K1_PAD, C_BASE), lambda b: (0, 0)),
                pl.BlockSpec((1, C_BASE), lambda b: (0, 0)),
                pl.BlockSpec((K2, CO_FUSED), lambda b: (0, 0)),
                pl.BlockSpec((1, CO_FUSED), lambda b: (0, 0)),
                pl.BlockSpec((CO_FUSED, N_HEAD_PAD), lambda b: (0, 0)),
                pl.BlockSpec((1, N_HEAD_PAD), lambda b: (0, 0)),
            ],
            out_specs=pl.BlockSpec((1, 1, N_HEAD_PAD), lambda b: (b, 0, 0)),
            scratch_shapes=[pltpu.VMEM((3, padrows, C_BASE), jnp.float32)],
        ),
        compiler_params=pltpu.CompilerParams(dimension_semantics=("parallel",)),
        cost_estimate=pl.CostEstimate(flops=flops, transcendentals=0,
                                      bytes_accessed=bytes_accessed),
    )(xpat, P["wb"], P["bb"], P["wbr"], P["bbr"], P["wh"], P["bh"])


# ------------------------------------------------------------------ params
def init_params(key):
    ks = jax.random.split(key, 18)

    def conv_w(k, cin, cout):          # (9, cin, cout); tap index t = dy*3 + dx
        return jax.random.normal(k, (9, cin, cout), jnp.float32) / (9.0 * cin) ** 0.5

    def dense_w(k, cin, cout):
        return jax.random.normal(k, (cin, cout), jnp.float32) / float(cin) ** 0.5

    w_base = conv_w(ks[0], C_IN, C_BASE)
    b_base = 0.01 * jax.random.normal(ks[1], (C_BASE,), jnp.float32)
    w_br = [conv_w(ks[2 + i], C_BASE, FC_INDIM) for i in range(4)]
    b_br = [0.01 * jax.random.normal(ks[6 + i], (FC_INDIM,), jnp.float32) for i in range(4)]
    w_hd = [dense_w(ks[10 + i], FC_INDIM, nc) for i, nc in enumerate(NUM_CLASSES)]
    b_hd = [0.01 * jax.random.normal(ks[14 + i], (nc,), jnp.float32)
            for i, nc in enumerate(NUM_CLASSES)]

    P = {}
    # base conv: taps folded into K, K padded to one lane tile (zero rows -> exact math)
    wb = jnp.zeros((K1_PAD, C_BASE), jnp.float32)
    wb = wb.at[:9 * C_IN, :].set(w_base.reshape(9 * C_IN, C_BASE))
    P["wb"] = wb.astype(jnp.bfloat16)
    P["bb"] = b_base.reshape(1, C_BASE)

    # 4 branch convs: taps folded into K (=72), branches fused along Cout (=128)
    wbr = jnp.concatenate([w_br[i].reshape(K2, FC_INDIM) for i in range(4)], axis=1)
    P["wbr"] = wbr.astype(jnp.bfloat16)
    P["bbr"] = jnp.concatenate(b_br, axis=0).reshape(1, CO_FUSED)

    # 4 heads fused into one block-diagonal (CO_FUSED, N_HEAD_PAD) matmul
    wh = jnp.zeros((CO_FUSED, N_HEAD_PAD), jnp.float32)
    bh = jnp.zeros((1, N_HEAD_PAD), jnp.float32)
    off = 0
    for i, nc in enumerate(NUM_CLASSES):
        wh = wh.at[i * FC_INDIM:(i + 1) * FC_INDIM, off:off + nc].set(w_hd[i])
        bh = bh.at[0, off:off + nc].set(b_hd[i])
        off += nc
    P["wh"] = wh.astype(jnp.bfloat16)
    P["bh"] = bh
    return P


# ------------------------------------------------------------------ forward
def build_input_patches(x_nchw):
    """NCHW input -> (B, H*W, K1_PAD) bf16 base-conv patch matrix (one-time layout)."""
    B, C, H, W = x_nchw.shape
    x = jnp.transpose(x_nchw, (0, 2, 3, 1))                         # NHWC
    xp = jnp.pad(x, ((0, 0), (1, 1), (1, 1), (0, 0)))               # 1px halo
    taps = [xp[:, dy:dy + H, dx:dx + W, :] for dy in range(3) for dx in range(3)]
    pat = jnp.concatenate(taps, axis=-1)                            # (B, H, W, 9*C)
    pat = jnp.pad(pat, ((0, 0), (0, 0), (0, 0), (0, K1_PAD - 9 * C)))
    return pat.reshape(B, H * W, K1_PAD).astype(jnp.bfloat16)


def resnet_forward(x_nchw, params):
    """Mirrors ResNet.forward: base -> 4 branches -> avgpool -> 4 fc heads."""
    B, _, H, W = x_nchw.shape
    xpat = build_input_patches(x_nchw)
    logits = fused_forward_call(xpat, params, H=H, W=W).reshape(B, N_HEAD_PAD)
    outs, off = [], 0
    for nc in NUM_CLASSES:
        outs.append(logits[:, off:off + nc])
        off += nc
    return outs


# ------------------------------------------------------------------ reference
def reference_forward(x_nchw, params):
    """Plain-jnp replica of the kernel math (same folded bf16 weights, f32 accum)."""
    B, _, H, W = x_nchw.shape
    HW = H * W
    xpat = build_input_patches(x_nchw)
    feat = jnp.einsum("bpk,kc->bpc", xpat, params["wb"],
                      preferred_element_type=jnp.float32)
    feat = jnp.maximum(feat + params["bb"], 0.0)                     # (B, HW, cb) f32
    fp = jnp.pad(feat.reshape(B, H, W, C_BASE), ((0, 0), (1, 1), (1, 1), (0, 0)))
    taps = [fp[:, dy:dy + H, dx:dx + W, :] for dy in range(3) for dx in range(3)]
    patch = jnp.concatenate(taps, axis=-1).reshape(B, HW, K2).astype(jnp.bfloat16)
    y = jnp.einsum("bpk,kn->bpn", patch, params["wbr"],
                   preferred_element_type=jnp.float32)
    y = jnp.maximum(y + params["bbr"], 0.0)
    pooled = (jnp.sum(y, axis=1) * (1.0 / HW)).astype(jnp.bfloat16)  # (B, CO_FUSED)
    logits = jnp.einsum("bk,kn->bn", pooled, params["wh"],
                        preferred_element_type=jnp.float32) + params["bh"]
    outs, off = [], 0
    for nc in NUM_CLASSES:
        outs.append(logits[:, off:off + nc])
        off += nc
    return outs


# ------------------------------------------------------------------ main
if __name__ == "__main__":
    B, H, W = 2, 16, 16
    key = jax.random.PRNGKey(0)
    kx, kp = jax.random.split(key)
    x = jax.random.normal(kx, (B, C_IN, H, W), jnp.float32)          # NCHW, like torch
    params = init_params(kp)

    fwd = jax.jit(resnet_forward)
    outs = [jax.block_until_ready(o) for o in fwd(x, params)]

    assert [o.shape for o in outs] == [(B, n) for n in NUM_CLASSES]
    assert all(bool(jnp.all(jnp.isfinite(o))) for o in outs)

    refs = reference_forward(x, params)
    for o, r in zip(outs, refs):
        assert bool(jnp.allclose(o, r, atol=5e-2, rtol=5e-2))

    print("KERNEL_OK")
</pallas_src>

<mosaic_0001>
module attributes {stable_mosaic.version = 11 : i64} {
  func.func @_fused_resnet_kernel(%arg0: i32, %arg1: memref<1x256x128xbf16, #tpu.memory_space<vmem>>, %arg2: memref<128x8xbf16, #tpu.memory_space<vmem>>, %arg3: memref<1x8xf32, #tpu.memory_space<vmem>>, %arg4: memref<72x128xbf16, #tpu.memory_space<vmem>>, %arg5: memref<1x128xf32, #tpu.memory_space<vmem>>, %arg6: memref<128x384xbf16, #tpu.memory_space<vmem>>, %arg7: memref<1x384xf32, #tpu.memory_space<vmem>>, %arg8: memref<1x1x384xf32, #tpu.memory_space<vmem>>, %arg9: memref<3x304x8xf32, #tpu.memory_space<vmem>>) attributes {dimension_semantics = [#tpu.dimension_semantics<parallel>], iteration_bounds = array<i64: 2>, scalar_prefetch = 0 : i64, scratch_operands = 1 : i64, tpu.core_type = #tpu.core_type<tc>, window_params = [{transform_indices = @transform_0, window_bounds = array<i64: 1, 256, 128>}, {pipeline_mode = #tpu.pipeline_mode<synchronous>, transform_indices = @transform_1, window_bounds = array<i64: 128, 8>}, {pipeline_mode = #tpu.pipeline_mode<synchronous>, transform_indices = @transform_2, window_bounds = array<i64: 1, 8>}, {pipeline_mode = #tpu.pipeline_mode<synchronous>, transform_indices = @transform_3, window_bounds = array<i64: 72, 128>}, {pipeline_mode = #tpu.pipeline_mode<synchronous>, transform_indices = @transform_4, window_bounds = array<i64: 1, 128>}, {pipeline_mode = #tpu.pipeline_mode<synchronous>, transform_indices = @transform_5, window_bounds = array<i64: 128, 384>}, {pipeline_mode = #tpu.pipeline_mode<synchronous>, transform_indices = @transform_6, window_bounds = array<i64: 1, 384>}, {transform_indices = @transform_7, window_bounds = array<i64: 1, 1, 384>}]} {
    %c0 = arith.constant 0 : index
    %c0_0 = arith.constant 0 : index
    %c0_1 = arith.constant 0 : index
    %0 = vector.load %arg1[%c0, %c0_0, %c0_1] : memref<1x256x128xbf16, #tpu.memory_space<vmem>>, vector<1x256x128xbf16>
    %1 = vector.shape_cast %0 : vector<1x256x128xbf16> to vector<256x128xbf16>
    %c0_2 = arith.constant 0 : index
    %c0_3 = arith.constant 0 : index
    %2 = vector.load %arg2[%c0_2, %c0_3] : memref<128x8xbf16, #tpu.memory_space<vmem>>, vector<128x8xbf16>
    %cst = arith.constant dense<0.000000e+00> : vector<256x8xf32>
    %3 = tpu.matmul %1, %2, %cst {dimension_numbers = #tpu.dot_dimension_numbers<[1], [0], [0], [1], [0, 0, 1, 1], [], []>} : vector<256x128xbf16>, vector<128x8xbf16>, vector<256x8xf32> -> vector<256x8xf32>
    %c0_4 = arith.constant 0 : index
    %c0_5 = arith.constant 0 : index
    %4 = vector.load %arg3[%c0_4, %c0_5] : memref<1x8xf32, #tpu.memory_space<vmem>>, vector<1x8xf32>
    %5 = vector.broadcast %4 : vector<1x8xf32> to vector<256x8xf32>
    %6 = arith.addf %3, %5 : vector<256x8xf32>
    %cst_6 = arith.constant 0.000000e+00 : f32
    %7 = vector.broadcast %cst_6 : f32 to vector<256x8xf32>
    %8 = arith.maximumf %6, %7 : vector<256x8xf32>
    %9 = tpu.iota {dimensions = array<i32: 0>} : vector<256x8xi32>
    %c16_i32 = arith.constant 16 : i32
    %c0_i32 = arith.constant 0 : i32
    %10 = arith.cmpi eq, %c16_i32, %c0_i32 : i32
    %c1_i32 = arith.constant 1 : i32
    %11 = arith.select %10, %c1_i32, %c16_i32 : i32
    %12 = vector.broadcast %11 : i32 to vector<256x8xi32>
    %13 = arith.remsi %9, %12 : vector<256x8xi32>
    %c0_i32_7 = arith.constant 0 : i32
    %14 = vector.broadcast %c0_i32_7 : i32 to vector<256x8xi32>
    %15 = arith.cmpi ne, %13, %14 : vector<256x8xi32>
    %c0_i32_8 = arith.constant 0 : i32
    %16 = vector.broadcast %c0_i32_8 : i32 to vector<256x8xi32>
    %17 = arith.cmpi slt, %13, %16 : vector<256x8xi32>
    %c0_i32_9 = arith.constant 0 : i32
    %18 = arith.cmpi slt, %11, %c0_i32_9 : i32
    %19 = vector.broadcast %18 : i1 to vector<256x8xi1>
    %20 = vector.broadcast %19 : vector<256x8xi1> to vector<256x8xi1>
    %21 = arith.xori %17, %20 : vector<256x8xi1>
    %22 = arith.andi %21, %15 : vector<256x8xi1>
    %23 = vector.broadcast %11 : i32 to vector<256x8xi32>
    %24 = arith.addi %13, %23 : vector<256x8xi32>
    %25 = arith.select %22, %24, %13 : vector<256x8xi1>, vector<256x8xi32>
    %c15_i32 = arith.constant 15 : i32
    %26 = vector.broadcast %c15_i32 : i32 to vector<256x8xi32>
    %27 = arith.cmpi ne, %25, %26 : vector<256x8xi32>
    %cst_10 = arith.constant 0.000000e+00 : f32
    %28 = vector.broadcast %cst_10 : f32 to vector<256x8xf32>
    %29 = arith.select %27, %8, %28 : vector<256x8xi1>, vector<256x8xf32>
    %c0_i32_11 = arith.constant 0 : i32
    %30 = vector.broadcast %c0_i32_11 : i32 to vector<256x8xi32>
    %31 = arith.cmpi ne, %25, %30 : vector<256x8xi32>
    %cst_12 = arith.constant 0.000000e+00 : f32
    %32 = vector.broadcast %cst_12 : f32 to vector<256x8xf32>
    %33 = arith.select %31, %8, %32 : vector<256x8xi1>, vector<256x8xf32>
    %cst_13 = arith.constant 0.000000e+00 : f32
    %34 = vector.broadcast %cst_13 : f32 to vector<3x304x8xf32>
    %c0_14 = arith.constant 0 : index
    %c0_15 = arith.constant 0 : index
    %c0_16 = arith.constant 0 : index
    %35 = vector.load %arg9[%c0_14, %c0_15, %c0_16] : memref<3x304x8xf32, #tpu.memory_space<vmem>>, vector<3x304x8xf32>
    tpu.vector_store %arg9[%c0_14, %c0_15, %c0_16], %34 {strides = array<i32>} : memref<3x304x8xf32, #tpu.memory_space<vmem>>, vector<3x304x8xf32>,
    %c0_17 = arith.constant 0 : index
    %c24 = arith.constant 24 : index
    %c0_18 = arith.constant 0 : index
    %36 = vector.load %arg9[%c0_17, %c24, %c0_18] : memref<3x304x8xf32, #tpu.memory_space<vmem>>, vector<1x256x8xf32>
    %37 = vector.shape_cast %36 : vector<1x256x8xf32> to vector<256x8xf32>
    %38 = vector.shape_cast %29 : vector<256x8xf32> to vector<1x256x8xf32>
    tpu.vector_store %arg9[%c0_17, %c24, %c0_18], %38 {strides = array<i32>} : memref<3x304x8xf32, #tpu.memory_space<vmem>>, vector<1x256x8xf32>,
    %c1 = arith.constant 1 : index
    %c24_19 = arith.constant 24 : index
    %c0_20 = arith.constant 0 : index
    %39 = vector.load %arg9[%c1, %c24_19, %c0_20] : memref<3x304x8xf32, #tpu.memory_space<vmem>>, vector<1x256x8xf32>
    %40 = vector.shape_cast %39 : vector<1x256x8xf32> to vector<256x8xf32>
    %41 = vector.shape_cast %8 : vector<256x8xf32> to vector<1x256x8xf32>
    tpu.vector_store %arg9[%c1, %c24_19, %c0_20], %41 {strides = array<i32>} : memref<3x304x8xf32, #tpu.memory_space<vmem>>, vector<1x256x8xf32>,
    %c2 = arith.constant 2 : index
    %c24_21 = arith.constant 24 : index
    %c0_22 = arith.constant 0 : index
    %42 = vector.load %arg9[%c2, %c24_21, %c0_22] : memref<3x304x8xf32, #tpu.memory_space<vmem>>, vector<1x256x8xf32>
    %43 = vector.shape_cast %42 : vector<1x256x8xf32> to vector<256x8xf32>
    %44 = vector.shape_cast %33 : vector<256x8xf32> to vector<1x256x8xf32>
    tpu.vector_store %arg9[%c2, %c24_21, %c0_22], %44 {strides = array<i32>} : memref<3x304x8xf32, #tpu.memory_space<vmem>>, vector<1x256x8xf32>,
    %c0_23 = arith.constant 0 : index
    %c7 = arith.constant 7 : index
    %c0_24 = arith.constant 0 : index
    %45 = vector.load %arg9[%c0_23, %c7, %c0_24] : memref<3x304x8xf32, #tpu.memory_space<vmem>>, vector<1x256x8xf32>
    %46 = vector.shape_cast %45 : vector<1x256x8xf32> to vector<256x8xf32>
    %c1_25 = arith.constant 1 : index
    %c8 = arith.constant 8 : index
    %c0_26 = arith.constant 0 : index
    %47 = vector.load %arg9[%c1_25, %c8, %c0_26] : memref<3x304x8xf32, #tpu.memory_space<vmem>>, vector<1x256x8xf32>
    %48 = vector.shape_cast %47 : vector<1x256x8xf32> to vector<256x8xf32>
    %c2_27 = arith.constant 2 : index
    %c9 = arith.constant 9 : index
    %c0_28 = arith.constant 0 : index
    %49 = vector.load %arg9[%c2_27, %c9, %c0_28] : memref<3x304x8xf32, #tpu.memory_space<vmem>>, vector<1x256x8xf32>
    %50 = vector.shape_cast %49 : vector<1x256x8xf32> to vector<256x8xf32>
    %c0_29 = arith.constant 0 : index
    %c23 = arith.constant 23 : index
    %c0_30 = arith.constant 0 : index
    %51 = vector.load %arg9[%c0_29, %c23, %c0_30] : memref<3x304x8xf32, #tpu.memory_space<vmem>>, vector<1x256x8xf32>
    %52 = vector.shape_cast %51 : vector<1x256x8xf32> to vector<256x8xf32>
    %c1_31 = arith.constant 1 : index
    %c24_32 = arith.constant 24 : index
    %c0_33 = arith.constant 0 : index
    %53 = vector.load %arg9[%c1_31, %c24_32, %c0_33] : memref<3x304x8xf32, #tpu.memory_space<vmem>>, vector<1x256x8xf32>
    %54 = vector.shape_cast %53 : vector<1x256x8xf32> to vector<256x8xf32>
    %c2_34 = arith.constant 2 : index
    %c25 = arith.constant 25 : index
    %c0_35 = arith.constant 0 : index
    %55 = vector.load %arg9[%c2_34, %c25, %c0_35] : memref<3x304x8xf32, #tpu.memory_space<vmem>>, vector<1x256x8xf32>
    %56 = vector.shape_cast %55 : vector<1x256x8xf32> to vector<256x8xf32>
    %c0_36 = arith.constant 0 : index
    %c39 = arith.constant 39 : index
    %c0_37 = arith.constant 0 : index
    %57 = vector.load %arg9[%c0_36, %c39, %c0_37] : memref<3x304x8xf32, #tpu.memory_space<vmem>>, vector<1x256x8xf32>
    %58 = vector.shape_cast %57 : vector<1x256x8xf32> to vector<256x8xf32>
    %c1_38 = arith.constant 1 : index
    %c40 = arith.constant 40 : index
    %c0_39 = arith.constant 0 : index
    %59 = vector.load %arg9[%c1_38, %c40, %c0_39] : memref<3x304x8xf32, #tpu.memory_space<vmem>>, vector<1x256x8xf32>
    %60 = vector.shape_cast %59 : vector<1x256x8xf32> to vector<256x8xf32>
    %c2_40 = arith.constant 2 : index
    %c41 = arith.constant 41 : index
    %c0_41 = arith.constant 0 : index
    %61 = vector.load %arg9[%c2_40, %c41, %c0_41] : memref<3x304x8xf32, #tpu.memory_space<vmem>>, vector<1x256x8xf32>
    %62 = vector.shape_cast %61 : vector<1x256x8xf32> to vector<256x8xf32>
    %63 = tpu.concatenate %46, %48, %50, %52, %54, %56, %58, %60, %62 in 1 : vector<256x8xf32>, vector<256x8xf32>, vector<256x8xf32>, vector<256x8xf32>, vector<256x8xf32>, vector<256x8xf32>, vector<256x8xf32>, vector<256x8xf32>, vector<256x8xf32> -> vector<256x72xf32>
    %64 = arith.truncf %63 : vector<256x72xf32> to vector<256x72xbf16>
    %c0_42 = arith.constant 0 : index
    %c0_43 = arith.constant 0 : index
    %65 = vector.load %arg4[%c0_42, %c0_43] : memref<72x128xbf16, #tpu.memory_space<vmem>>, vector<72x128xbf16>
    %cst_44 = arith.constant dense<0.000000e+00> : vector<256x128xf32>
    %66 = tpu.matmul %64, %65, %cst_44 {dimension_numbers = #tpu.dot_dimension_numbers<[1], [0], [0], [1], [0, 0, 1, 1], [], []>} : vector<256x72xbf16>, vector<72x128xbf16>, vector<256x128xf32> -> vector<256x128xf32>
    %c0_45 = arith.constant 0 : index
    %c0_46 = arith.constant 0 : index
    %67 = vector.load %arg5[%c0_45, %c0_46] : memref<1x128xf32, #tpu.memory_space<vmem>>, vector<1x128xf32>
    %68 = vector.broadcast %67 : vector<1x128xf32> to vector<256x128xf32>
    %69 = arith.addf %66, %68 : vector<256x128xf32>
    %cst_47 = arith.constant 0.000000e+00 : f32
    %70 = vector.broadcast %cst_47 : f32 to vector<256x128xf32>
    %71 = arith.maximumf %69, %70 : vector<256x128xf32>
    %cst_48 = arith.constant dense<0.000000e+00> : vector<128xf32>
    %72 = vector.multi_reduction <add>, %71, %cst_48 [0] : vector<256x128xf32> to vector<128xf32>
    %73 = vector.shape_cast %72 : vector<128xf32> to vector<1x128xf32>
    %cst_49 = arith.constant 3.906250e-03 : f32
    %74 = vector.broadcast %cst_49 : f32 to vector<1x128xf32>
    %75 = arith.mulf %73, %74 : vector<1x128xf32>
    %76 = arith.truncf %75 : vector<1x128xf32> to vector<1x128xbf16>
    %c0_50 = arith.constant 0 : index
    %c0_51 = arith.constant 0 : index
    %77 = vector.load %arg6[%c0_50, %c0_51] : memref<128x384xbf16, #tpu.memory_space<vmem>>, vector<128x384xbf16>
    %cst_52 = arith.constant dense<0.000000e+00> : vector<1x384xf32>
    %78 = tpu.matmul %76, %77, %cst_52 {dimension_numbers = #tpu.dot_dimension_numbers<[1], [0], [0], [1], [0, 0, 1, 1], [], []>} : vector<1x128xbf16>, vector<128x384xbf16>, vector<1x384xf32> -> vector<1x384xf32>
    %c0_53 = arith.constant 0 : index
    %c0_54 = arith.constant 0 : index
    %79 = vector.load %arg7[%c0_53, %c0_54] : memref<1x384xf32, #tpu.memory_space<vmem>>, vector<1x384xf32>
    %80 = arith.addf %78, %79 : vector<1x384xf32>
    %c0_55 = arith.constant 0 : index
    %c0_56 = arith.constant 0 : index
    %c0_57 = arith.constant 0 : index
    %81 = vector.load %arg8[%c0_55, %c0_56, %c0_57] : memref<1x1x384xf32, #tpu.memory_space<vmem>>, vector<1x1x384xf32>
    %82 = vector.shape_cast %81 : vector<1x1x384xf32> to vector<1x384xf32>
    %83 = vector.shape_cast %80 : vector<1x384xf32> to vector<1x1x384xf32>
    tpu.vector_store %arg8[%c0_55, %c0_56, %c0_57], %83 {strides = array<i32>} : memref<1x1x384xf32, #tpu.memory_space<vmem>>, vector<1x1x384xf32>,
    return
  }
  func.func @transform_0(%arg0: i32) -> (i32, i32, i32) {
    %c0_i32 = arith.constant 0 : i32
    %c0_i32_0 = arith.constant 0 : i32
    %c0_i32_1 = arith.constant 0 : i32
    return %arg0, %c0_i32, %c0_i32_0 : i32, i32, i32
  }
  func.func @transform_1(%arg0: i32) -> (i32, i32) {
    %c0_i32 = arith.constant 0 : i32
    %c0_i32_0 = arith.constant 0 : i32
    %c0_i32_1 = arith.constant 0 : i32
    return %c0_i32, %c0_i32_0 : i32, i32
  }
  func.func @transform_2(%arg0: i32) -> (i32, i32) {
    %c0_i32 = arith.constant 0 : i32
    %c0_i32_0 = arith.constant 0 : i32
    %c0_i32_1 = arith.constant 0 : i32
    return %c0_i32, %c0_i32_0 : i32, i32
  }
  func.func @transform_3(%arg0: i32) -> (i32, i32) {
    %c0_i32 = arith.constant 0 : i32
    %c0_i32_0 = arith.constant 0 : i32
    %c0_i32_1 = arith.constant 0 : i32
    return %c0_i32, %c0_i32_0 : i32, i32
  }
  func.func @transform_4(%arg0: i32) -> (i32, i32) {
    %c0_i32 = arith.constant 0 : i32
    %c0_i32_0 = arith.constant 0 : i32
    %c0_i32_1 = arith.constant 0 : i32
    return %c0_i32, %c0_i32_0 : i32, i32
  }
  func.func @transform_5(%arg0: i32) -> (i32, i32) {
    %c0_i32 = arith.constant 0 : i32
    %c0_i32_0 = arith.constant 0 : i32
    %c0_i32_1 = arith.constant 0 : i32
    return %c0_i32, %c0_i32_0 : i32, i32
  }
  func.func @transform_6(%arg0: i32) -> (i32, i32) {
    %c0_i32 = arith.constant 0 : i32
    %c0_i32_0 = arith.constant 0 : i32
    %c0_i32_1 = arith.constant 0 : i32
    return %c0_i32, %c0_i32_0 : i32, i32
  }
  func.func @transform_7(%arg0: i32) -> (i32, i32, i32) {
    %c0_i32 = arith.constant 0 : i32
    %c0_i32_0 = arith.constant 0 : i32
    %c0_i32_1 = arith.constant 0 : i32
    return %arg0, %c0_i32, %c0_i32_0 : i32, i32, i32
  }
}

</mosaic_0001>

<bundles_post_ra>
// kernel: resnet_forward.1
= control target key start
LH: loop header
LB: loop body
LE: loop exit
PB: predicated region body
PF: predicated region fallthrough
CT: control target
= control target key end

     0   :  { %s4168_s24 = smov 0   ;;  %s5906_s0 = inlined_call_operand.vmem [shape: bf16[2,256,128], index: 0, kind: input, shape index: {}]   ;;  %s5907_s1 = inlined_call_operand.vmem [shape: bf16[128,8], index: 1, kind: input, shape index: {}]   ;;  %s5908_s2 = inlined_call_operand.vmem [shape: f32[1,8], index: 2, kind: input, shape index: {}]   ;;  %s5909_s3 = inlined_call_operand.vmem [shape: bf16[72,128], index: 3, kind: input, shape index: {}]   ;;  %s5910_s4 = inlined_call_operand.vmem [shape: f32[1,128], index: 4, kind: input, shape index: {}]   ;;  %s5911_s5 = inlined_call_operand.vmem [shape: bf16[128,384], index: 5, kind: input, shape index: {}]   ;;  %s5912_s6 = inlined_call_operand.vmem [shape: f32[1,384], index: 6, kind: input, shape index: {}]   ;;  %s5913_s7 = inlined_call_operand.vmem [shape: f32[2,1,384], index: 7, kind: output, shape index: {}]  }
   0x1 LB: > { %s3142_s25 = sadd.s32 4294967295, %s4117_s24   ;;  %p3146_p0 = scmp.ge.s32.totalorder %s4117_s24, 1  ;;  %s4117_s24 = sphi %s4168_s24, %s17_s24  }
   0x2   : > { %p237_p1 = scmp.lt.s32.totalorder %s4117_s24, 3 }
   0x4   : > { %p238_p2 = pnand %p3146_p0, %p237_p1 }
   0x6   : > { %241 = sbr.rel (%p238_p2) target bundleno = 985 (0x3d9), region = 48 }
   0xb   : > { %v3399_v0 = vld [vmem:[%s5907_s1 + $0x38] sm:$0xff]  ;;  %v3398_v1 = vld [vmem:[%s5907_s1 + $0x30] sm:$0xff]  ;;  %v3397_v2 = vld [vmem:[%s5907_s1 + $0x28] sm:$0xff]  ;;  %p268_p3 = scmp.lt.s32.totalorder %s3142_s25, 1  ;;  %vm1140_vm0 = vcmask 64512   ;;  %v4119_v20 = vmov 0.0   ;;  %v5914_v22 = vlaneseq }
   0xc   : > { %474 = vmatpush.bf16.msra.mxu0 %v3399_v0  ;;  %3428 = vmatpush.bf16.msra.mxu3 %v3399_v0  ;;  %v3396_v3 = vld [vmem:[%s5907_s1 + $0x20] sm:$0xff]  ;;  %v3395_v4 = vld [vmem:[%s5907_s1 + $0x18] sm:$0xff]  ;;  %v3394_v5 = vld [vmem:[%s5907_s1 + $0x10] sm:$0xff]  ;;  %1144 = vst.msk [vmem:[#allocation2 + $0x18] sm:$0xff] %vm1140_vm0, %v4119_v20  ;;  %s4120_s27 = smov 8   ;;  %s4121_s28 = smov 16  }
   0xd   : > { %s5974_s25 = smov (!%p268_p3, %s3142_s25), 1  ;;  %v3393_v6 = vld [vmem:[%s5907_s1 + $0x8] sm:$0xff]  ;;  %v3392_v7 = vld [vmem:[%s5907_s1] sm:$0xff]  ;;  %1182 = vst.msk [vmem:[#allocation2 + $0x148] sm:$0xff] %vm1140_vm0, %v4119_v20  ;;  %v4266_v23 = vshrl.u32 %v5914_v22, 7  ;;  %s4122_s29 = smov 32  }
   0xe   : > { %s3375_s17 = sshll.u32 %s5974_s25, 7  ;;  %1220 = vst.msk [vmem:[#allocation2 + $0x278] sm:$0xff] %vm1140_vm0, %v4119_v20  ;;  %v4277_v24 = vld [vmem:[%s5908_s2] ss:$0 sm:$0xff]  ;;  %s4123_s30 = smov 56  }
   0xf   : > { %s4206_s22 = scalar_lea.vmem %s5906_s0, %s3375_s17  ;;  %1141 = vst.msk [vmem:[#allocation2] sm:$0xff] %vm1140_vm0, %v4119_v20  ;;  %v632_v25 = vand.u32 15, %v4266_v23  ;;  %v614_v44 = vadd.s32 144, %v4266_v23  ;;  %v597_v45 = vadd.s32 8, %v4266_v23  ;;  %v615_v51 = vadd.s32 152, %v4266_v23  ;;  %s4124_s8 = smov 24  }
  0x10   : > { %475 = vmatpush.bf16.msra.mxu0 %v3398_v1  ;;  %3429 = vmatpush.bf16.msra.mxu3 %v3398_v1  ;;  %v3376_v8 = vld [vmem:[%s4206_s22] sm:$0xff]  ;;  %v3385_v9 = vld [vmem:[%s4206_s22 + $0x48] sm:$0xff]  ;;  %v3386_v11 = vld [vmem:[%s4206_s22 + $0x50] sm:$0xff]  ;;  %1142 = vst.msk [vmem:[#allocation2 + $0x8] sm:$0xff] %vm1140_vm0, %v4119_v20  ;;  %v598_v59 = vadd.s32 16, %v4266_v23  ;;  %s4125_s9 = smov 40  }
  0x11   : > { %v3377_v10 = vld [vmem:[%s4206_s22 + $0x8] sm:$0xff]  ;;  %v3378_v12 = vld [vmem:[%s4206_s22 + $0x10] sm:$0xff]  ;;  %v3387_v13 = vld [vmem:[%s4206_s22 + $0x58] sm:$0xff]  ;;  %1143 = vst.msk [vmem:[#allocation2 + $0x10] sm:$0xff] %vm1140_vm0, %v4119_v20  ;;  %vm1076_vm1 = vcmp.ne.s32.totalorder %v632_v25, 0  ;;  %v758_v49 = vand.u32 15, %v614_v44 }
  0x12   : > { %v3379_v14 = vld [vmem:[%s4206_s22 + $0x18] sm:$0xff]  ;;  %v3388_v15 = vld [vmem:[%s4206_s22 + $0x60] sm:$0xff]  ;;  %v3389_v17 = vld [vmem:[%s4206_s22 + $0x68] sm:$0xff]  ;;  %1145 = vst.msk [vmem:[#allocation2 + $0x20] sm:$0xff] %vm1140_vm0, %v4119_v20  ;;  %v639_v50 = vand.u32 15, %v597_v45  ;;  %v765_v58 = vand.u32 15, %v615_v51 }
  0x13   : > { %v3380_v16 = vld [vmem:[%s4206_s22 + $0x20] sm:$0xff]  ;;  %v3381_v18 = vld [vmem:[%s4206_s22 + $0x28] sm:$0xff]  ;;  %v3382_v19 = vld [vmem:[%s4206_s22 + $0x30] sm:$0xff]  ;;  %1146 = vst.msk [vmem:[#allocation2 + $0x28] sm:$0xff] %vm1140_vm0, %v4119_v20  ;;  %vm4460_vm2 = vcmp.ne.s32.totalorder %v758_v49, 0  ;;  %v600_v25 = vadd.s32 32, %v4266_v23 }
  0x14   : > { %476 = vmatpush.bf16.msra.mxu0 %v3397_v2  ;;  %3430 = vmatpush.bf16.msra.mxu3 %v3397_v2  ;;  %1147 = vst.msk [vmem:[#allocation2 + $0x30] sm:$0xff] %vm1140_vm0, %v4119_v20  ;;  %v3383_v21 = vld [vmem:[%s4206_s22 + $0x38] sm:$0xff]  ;;  %v3384_v30 = vld [vmem:[%s4206_s22 + $0x40] sm:$0xff]  ;;  %v3390_v31 = vld [vmem:[%s4206_s22 + $0x70] sm:$0xff]  ;;  %vm4464_vm3 = vcmp.ne.s32.totalorder %v639_v50, 15  ;;  %vm4481_vm4 = vcmp.ne.s32.totalorder %v765_v58, 15 }
  0x15   : > { %1148 = vst.msk [vmem:[#allocation2 + $0x38] sm:$0xff] %vm1140_vm0, %v4119_v20  ;;  %v646_v2 = vand.u32 15, %v598_v59  ;;  %s4126_s10 = smov 48   ;;  %s4127_s11 = smov 64  }
  0x16   : > { %1149 = vst.msk [vmem:[#allocation2 + $0x40] sm:$0xff] %vm1140_vm0, %v4119_v20  ;;  %s3441_s21 = smul.u32 3, %s5974_s25 }
  0x17   : > { %1150 = vst.msk [vmem:[#allocation2 + $0x48] sm:$0xff] %vm1140_vm0, %v4119_v20  ;;  %vm4495_vm5 = vcmp.ne.s32.totalorder %v646_v2, 0  ;;  %v620_v2 = vadd.s32 192, %v4266_v23 }
  0x18   : > { %477 = vmatpush.bf16.msra.mxu0 %v3396_v3  ;;  %3431 = vmatpush.bf16.msra.mxu3 %v3396_v3  ;;  %1151 = vst.msk [vmem:[#allocation2 + $0x50] sm:$0xff] %vm1140_vm0, %v4119_v20  ;;  %v616_v3 = vadd.s32 160, %v4266_v23  ;;  %s276_s26 = scalar_lea.vmem %s5913_s7, %s3441_s21 }
  0x19   : > { %1152 = vst.msk [vmem:[#allocation2 + $0x58] sm:$0xff] %vm1140_vm0, %v4119_v20 }
  0x1a   : > { %1153 = vst.msk [vmem:[#allocation2 + $0x60] sm:$0xff] %vm1140_vm0, %v4119_v20 }
  0x1b   : > { %1154 = vst.msk [vmem:[#allocation2 + $0x68] sm:$0xff] %vm1140_vm0, %v4119_v20 }
  0x1c   : > { %478 = vmatpush.bf16.msra.mxu0 %v3395_v4  ;;  %3432 = vmatpush.bf16.msra.mxu3 %v3395_v4  ;;  %1155 = vst.msk [vmem:[#allocation2 + $0x70] sm:$0xff] %vm1140_vm0, %v4119_v20  ;;  %v599_v4 = vadd.s32 24, %v4266_v23 }
  0x1d   : > { %1156 = vst.msk [vmem:[#allocation2 + $0x78] sm:$0xff] %vm1140_vm0, %v4119_v20 }
  0x1e   : > { %1157 = vst.msk [vmem:[#allocation2 + $0x80] sm:$0xff] %vm1140_vm0, %v4119_v20 }
  0x1f   : > { %1158 = vst.msk [vmem:[#allocation2 + $0x88] sm:$0xff] %vm1140_vm0, %v4119_v20 }
  0x20   : > { %479 = vmatpush.bf16.msra.mxu0 %v3394_v5  ;;  %3433 = vmatpush.bf16.msra.mxu3 %v3394_v5  ;;  %1159 = vst.msk [vmem:[#allocation2 + $0x90] sm:$0xff] %vm1140_vm0, %v4119_v20 }
  0x21   : > { %1160 = vst.msk [vmem:[#allocation2 + $0x98] sm:$0xff] %vm1140_vm0, %v4119_v20 }
  0x22   : > { %1161 = vst.msk [vmem:[#allocation2 + $0xa0] sm:$0xff] %vm1140_vm0, %v4119_v20 }
  0x23   : > { %1162 = vst.msk [vmem:[#allocation2 + $0xa8] sm:$0xff] %vm1140_vm0, %v4119_v20 }
  0x24   : > { %480 = vmatpush.bf16.msra.mxu0 %v3393_v6  ;;  %3434 = vmatpush.bf16.msra.mxu3 %v3393_v6  ;;  %1163 = vst.msk [vmem:[#allocation2 + $0xb0] sm:$0xff] %vm1140_vm0, %v4119_v20 }
  0x25   : > { %1164 = vst.msk [vmem:[#allocation2 + $0xb8] sm:$0xff] %vm1140_vm0, %v4119_v20 }
  0x26   : > { %1165 = vst.msk [vmem:[#allocation2 + $0xc0] sm:$0xff] %vm1140_vm0, %v4119_v20 }
  0x27   : > { %1166 = vst.msk [vmem:[#allocation2 + $0xc8] sm:$0xff] %vm1140_vm0, %v4119_v20 }
  0x28   : > { %481 = vmatpush.bf16.msra.mxu0 %v3392_v7  ;;  %3435 = vmatpush.bf16.msra.mxu3 %v3392_v7  ;;  %1167 = vst.msk [vmem:[#allocation2 + $0xd0] sm:$0xff] %vm1140_vm0, %v4119_v20 }
  0x29   : > { %1168 = vst.msk [vmem:[#allocation2 + $0xd8] sm:$0xff] %vm1140_vm0, %v4119_v20 }
  0x2a   : > { %1169 = vst.msk [vmem:[#allocation2 + $0xe0] sm:$0xff] %vm1140_vm0, %v4119_v20 }
  0x2b   : > { %482 = vmatmul.bf16.vlgmr.msra.gmra.mxu0 %v3376_v8  ;;  %527 = vmatmul.bf16.vlgmr.msra.gmra.mxu3 %v3385_v9  ;;  %1170 = vst.msk [vmem:[#allocation2 + $0xe8] sm:$0xff] %vm1140_vm0, %v4119_v20 }
  0x2c   : > { %1171 = vst.msk [vmem:[#allocation2 + $0xf0] sm:$0xff] %vm1140_vm0, %v4119_v20 }
  0x2d   : > { %1172 = vst.msk [vmem:[#allocation2 + $0xf8] sm:$0xff] %vm1140_vm0, %v4119_v20 }
  0x2e   : > { %1173 = vst.msk [vmem:[#allocation2 + $0x100] sm:$0xff] %vm1140_vm0, %v4119_v20 }
  0x2f   : > { %1174 = vst.msk [vmem:[#allocation2 + $0x108] sm:$0xff] %vm1140_vm0, %v4119_v20 }
  0x30   : > { %1175 = vst.msk [vmem:[#allocation2 + $0x110] sm:$0xff] %vm1140_vm0, %v4119_v20 }
  0x31   : > { %1176 = vst.msk [vmem:[#allocation2 + $0x118] sm:$0xff] %vm1140_vm0, %v4119_v20 }
  0x32   : > { %1177 = vst.msk [vmem:[#allocation2 + $0x120] sm:$0xff] %vm1140_vm0, %v4119_v20 }
  0x33   : > { %1180 = vst.msk [vmem:[#allocation2 + $0x138] sm:$0xff] %vm1140_vm0, %v4119_v20 }
  0x34   : > { %1181 = vst.msk [vmem:[#allocation2 + $0x140] sm:$0xff] %vm1140_vm0, %v4119_v20 }
  0x35   : > { %1183 = vst.msk [vmem:[#allocation2 + $0x150] sm:$0xff] %vm1140_vm0, %v4119_v20 }
  0x36   : > { %1184 = vst.msk [vmem:[#allocation2 + $0x158] sm:$0xff] %vm1140_vm0, %v4119_v20 }
  0x37   : > { %1185 = vst.msk [vmem:[#allocation2 + $0x160] sm:$0xff] %vm1140_vm0, %v4119_v20 }
  0x38   : > { %1186 = vst.msk [vmem:[#allocation2 + $0x168] sm:$0xff] %vm1140_vm0, %v4119_v20 }
  0x39   : > { %1187 = vst.msk [vmem:[#allocation2 + $0x170] sm:$0xff] %vm1140_vm0, %v4119_v20 }
  0x3a   : > { %1188 = vst.msk [vmem:[#allocation2 + $0x178] sm:$0xff] %vm1140_vm0, %v4119_v20  ;;  %v1385_v34 = vld [vmem:[#allocation2 + $0x138] sm:$0xff] }
  0x3b   : > { %487 = vmatmul.bf16.gmra.mxu0 %v3377_v10  ;;  %532 = vmatmul.bf16.gmra.mxu3 %v3386_v11  ;;  %1189 = vst.msk [vmem:[#allocation2 + $0x180] sm:$0xff] %vm1140_vm0, %v4119_v20  ;;  %v1386_v35 = vld [vmem:[#allocation2 + $0x140] sm:$0xff]  ;;  %v772_v11 = vand.u32 15, %v616_v3  ;;  %v622_v10 = vadd.s32 208, %v4266_v23 }
  0x3c   : > { %1190 = vst.msk [vmem:[#allocation2 + $0x188] sm:$0xff] %vm1140_vm0, %v4119_v20  ;;  %v3459_v37 = vpack.i.bf16 %v1386_v35, %v1385_v34 }
  0x3d   : > { %1191 = vst.msk [vmem:[#allocation2 + $0x190] sm:$0xff] %vm1140_vm0, %v4119_v20  ;;  %vm4508_vm6 = vcmp.ne.s32.totalorder %v772_v11, 0 }
  0x3e   : > { %1192 = vst.msk [vmem:[#allocation2 + $0x198] sm:$0xff] %vm1140_vm0, %v4119_v20  ;;  %3460 = vrot.lane.b32.xlu0 %v3459_v37, %s4120_s27  ;;  %v660_v37 = vand.u32 15, %v600_v25  ;;  %v621_v25 = vadd.s32 200, %v4266_v23 }
  0x3f   : > { %1193 = vst.msk [vmem:[#allocation2 + $0x1a0] sm:$0xff] %vm1140_vm0, %v4119_v20 }
  0x40   : > { %1194 = vst.msk [vmem:[#allocation2 + $0x1a8] sm:$0xff] %vm1140_vm0, %v4119_v20  ;;  %vm4546_vm9 = vcmp.ne.s32.totalorder %v660_v37, 0 }
  0x41   : > { %1195 = vst.msk [vmem:[#allocation2 + $0x1b0] sm:$0xff] %vm1140_vm0, %v4119_v20 }
  0x42   : > { %1196 = vst.msk [vmem:[#allocation2 + $0x1b8] sm:$0xff] %vm1140_vm0, %v4119_v20 }
  0x43   : > { %1197 = vst.msk [vmem:[#allocation2 + $0x1c0] sm:$0xff] %vm1140_vm0, %v4119_v20 }
  0x44   : > { %1198 = vst.msk [vmem:[#allocation2 + $0x1c8] sm:$0xff] %vm1140_vm0, %v4119_v20 }
  0x45   : > { %1199 = vst.msk [vmem:[#allocation2 + $0x1d0] sm:$0xff] %vm1140_vm0, %v4119_v20 }
  0x46   : > { %1200 = vst.msk [vmem:[#allocation2 + $0x1d8] sm:$0xff] %vm1140_vm0, %v4119_v20 }
  0x47   : > { %1201 = vst.msk [vmem:[#allocation2 + $0x1e0] sm:$0xff] %vm1140_vm0, %v4119_v20 }
  0x48   : > { %1202 = vst.msk [vmem:[#allocation2 + $0x1e8] sm:$0xff] %vm1140_vm0, %v4119_v20 }
  0x49   : > { %1203 = vst.msk [vmem:[#allocation2 + $0x1f0] sm:$0xff] %vm1140_vm0, %v4119_v20 }
  0x4a   : > { %1204 = vst.msk [vmem:[#allocation2 + $0x1f8] sm:$0xff] %vm1140_vm0, %v4119_v20 }
  0x4b   : > { %492 = vmatmul.bf16.gmra.mxu0 %v3378_v12  ;;  %537 = vmatmul.bf16.gmra.mxu3 %v3387_v13  ;;  %1205 = vst.msk [vmem:[#allocation2 + $0x200] sm:$0xff] %vm1140_vm0, %v4119_v20  ;;  %v653_v12 = vand.u32 15, %v599_v4  ;;  %v617_v13 = vadd.s32 168, %v4266_v23 }
  0x4c   : > { %1206 = vst.msk [vmem:[#allocation2 + $0x208] sm:$0xff] %vm1140_vm0, %v4119_v20 }
  0x4d   : > { %1207 = vst.msk [vmem:[#allocation2 + $0x210] sm:$0xff] %vm1140_vm0, %v4119_v20  ;;  %vm4512_vm7 = vcmp.ne.s32.totalorder %v653_v12, 15 }
  0x4e   : > { %1208 = vst.msk [vmem:[#allocation2 + $0x218] sm:$0xff] %vm1140_vm0, %v4119_v20 }
  0x4f   : > { %1209 = vst.msk [vmem:[#allocation2 + $0x220] sm:$0xff] %vm1140_vm0, %v4119_v20 }
  0x50   : > { %1210 = vst.msk [vmem:[#allocation2 + $0x228] sm:$0xff] %vm1140_vm0, %v4119_v20 }
  0x51   : > { %1211 = vst.msk [vmem:[#allocation2 + $0x230] sm:$0xff] %vm1140_vm0, %v4119_v20 }
  0x52   : > { %1212 = vst.msk [vmem:[#allocation2 + $0x238] sm:$0xff] %vm1140_vm0, %v4119_v20 }
  0x53   : > { %1213 = vst.msk [vmem:[#allocation2 + $0x240] sm:$0xff] %vm1140_vm0, %v4119_v20 }
  0x54   : > { %1214 = vst.msk [vmem:[#allocation2 + $0x248] sm:$0xff] %vm1140_vm0, %v4119_v20 }
  0x55   : > { %1215 = vst.msk [vmem:[#allocation2 + $0x250] sm:$0xff] %vm1140_vm0, %v4119_v20 }
  0x56   : > { %1218 = vst.msk [vmem:[#allocation2 + $0x268] sm:$0xff] %vm1140_vm0, %v4119_v20 }
  0x57   : > { %1219 = vst.msk [vmem:[#allocation2 + $0x270] sm:$0xff] %vm1140_vm0, %v4119_v20 }
  0x58   : > { %1221 = vst.msk [vmem:[#allocation2 + $0x280] sm:$0xff] %vm1140_vm0, %v4119_v20 }
  0x59   : > { %1222 = vst.msk [vmem:[#allocation2 + $0x288] sm:$0xff] %vm1140_vm0, %v4119_v20 }
  0x5a   : > { %1223 = vst.msk [vmem:[#allocation2 + $0x290] sm:$0xff] %vm1140_vm0, %v4119_v20 }
  0x5b   : > { %497 = vmatmul.bf16.gmra.mxu0 %v3379_v14  ;;  %542 = vmatmul.bf16.gmra.mxu3 %v3388_v15  ;;  %1224 = vst.msk [vmem:[#allocation2 + $0x298] sm:$0xff] %vm1140_vm0, %v4119_v20  ;;  %v3391_v14 = vld [vmem:[%s4206_s22 + $0x78] sm:$0xff] }
  0x5c   : > { %1225 = vst.msk [vmem:[#allocation2 + $0x2a0] sm:$0xff] %vm1140_vm0, %v4119_v20 }
  0x5d   : > { %1226 = vst.msk [vmem:[#allocation2 + $0x2a8] sm:$0xff] %vm1140_vm0, %v4119_v20 }
  0x5e   : > { %1227 = vst.msk [vmem:[#allocation2 + $0x2b0] sm:$0xff] %vm1140_vm0, %v4119_v20  ;;  %v1417_v38 = vld [vmem:[#allocation2 + $0x269] sm:$0xff] }
  0x5f   : > { %1228 = vst.msk [vmem:[#allocation2 + $0x2b8] sm:$0xff] %vm1140_vm0, %v4119_v20 }
  0x60   : > { %1229 = vst.msk [vmem:[#allocation2 + $0x2c0] sm:$0xff] %vm1140_vm0, %v4119_v20 }
  0x61   : > { %1230 = vst.msk [vmem:[#allocation2 + $0x2c8] sm:$0xff] %vm1140_vm0, %v4119_v20 }
  0x62   : > { %1231 = vst.msk [vmem:[#allocation2 + $0x2d0] sm:$0xff] %vm1140_vm0, %v4119_v20 }
  0x63   : > { %1232 = vst.msk [vmem:[#allocation2 + $0x2d8] sm:$0xff] %vm1140_vm0, %v4119_v20 }
  0x64   : > { %1233 = vst.msk [vmem:[#allocation2 + $0x2e0] sm:$0xff] %vm1140_vm0, %v4119_v20 }
  0x65   : > { %1234 = vst.msk [vmem:[#allocation2 + $0x2e8] sm:$0xff] %vm1140_vm0, %v4119_v20 }
  0x66   : > { %1235 = vst.msk [vmem:[#allocation2 + $0x2f0] sm:$0xff] %vm1140_vm0, %v4119_v20 }
  0x67   : > { %1236 = vst.msk [vmem:[#allocation2 + $0x2f8] sm:$0xff] %vm1140_vm0, %v4119_v20 }
  0x68   : > { %1237 = vst.msk [vmem:[#allocation2 + $0x300] sm:$0xff] %vm1140_vm0, %v4119_v20 }
  0x69   : > { %1238 = vst.msk [vmem:[#allocation2 + $0x308] sm:$0xff] %vm1140_vm0, %v4119_v20 }
  0x6a   : > { %1239 = vst.msk [vmem:[#allocation2 + $0x310] sm:$0xff] %vm1140_vm0, %v4119_v20 }
  0x6b   : > { %502 = vmatmul.bf16.gmra.mxu0 %v3380_v16  ;;  %547 = vmatmul.bf16.gmra.mxu3 %v3389_v17  ;;  %1240 = vst.msk [vmem:[#allocation2 + $0x318] sm:$0xff] %vm1140_vm0, %v4119_v20 }
  0x6c   : > { %1241 = vst.msk [vmem:[#allocation2 + $0x320] sm:$0xff] %vm1140_vm0, %v4119_v20 }
  0x6d   : > { %1242 = vst.msk [vmem:[#allocation2 + $0x328] sm:$0xff] %vm1140_vm0, %v4119_v20 }
  0x6e   : > { %1243 = vst.msk [vmem:[#allocation2 + $0x330] sm:$0xff] %vm1140_vm0, %v4119_v20 }
  0x6f   : > { %1244 = vst.msk [vmem:[#allocation2 + $0x338] sm:$0xff] %vm1140_vm0, %v4119_v20 }
  0x70   : > { %1245 = vst.msk [vmem:[#allocation2 + $0x340] sm:$0xff] %vm1140_vm0, %v4119_v20 }
  0x71   : > { %1246 = vst.msk [vmem:[#allocation2 + $0x348] sm:$0xff] %vm1140_vm0, %v4119_v20 }
  0x72   : > { %1247 = vst.msk [vmem:[#allocation2 + $0x350] sm:$0xff] %vm1140_vm0, %v4119_v20 }
  0x73   : > { %1248 = vst.msk [vmem:[#allocation2 + $0x358] sm:$0xff] %vm1140_vm0, %v4119_v20 }
  0x74   : > { %1249 = vst.msk [vmem:[#allocation2 + $0x360] sm:$0xff] %vm1140_vm0, %v4119_v20 }
  0x75   : > { %1250 = vst.msk [vmem:[#allocation2 + $0x368] sm:$0xff] %vm1140_vm0, %v4119_v20 }
  0x76   : > { %1251 = vst.msk [vmem:[#allocation2 + $0x370] sm:$0xff] %vm1140_vm0, %v4119_v20 }
  0x77   : > { %1252 = vst.msk [vmem:[#allocation2 + $0x378] sm:$0xff] %vm1140_vm0, %v4119_v20 }
  0x78   : > { %1253 = vst.msk [vmem:[#allocation2 + $0x380] sm:$0xff] %vm1140_vm0, %v4119_v20 }
  0x79   : > { %1254 = vst.msk [vmem:[#allocation2 + $0x388] sm:$0xff] %vm1140_vm0, %v4119_v20 }
  0x7b   : > { %507 = vmatmul.bf16.gmra.mxu0 %v3381_v18  ;;  %552 = vmatmul.bf16.gmra.mxu3 %v3390_v31 }
  0x8b   : > { %512 = vmatmul.bf16.gmra.mxu0 %v3382_v19  ;;  %557 = vmatmul.bf16.gmra.mxu3 %v3391_v14 }
  0x9b   : > { %517 = vmatmul.bf16.gmra.mxu0 %v3383_v21  ;;  %v779_v21 = vand.u32 15, %v617_v13 }
  0x9d   : > { %vm4530_vm8 = vcmp.ne.s32.totalorder %v779_v21, 15 }
  0xa8   : > { %v483_v26 = vpop.f32.mrf.mxu0 }
  0xa9   : > { %v484_v27 = vadd.f32 %v4277_v24, %v483_v26 }
  0xab   : > { %v563_v28 = vmax.f32 %v484_v27, 0.0  ;;  %522 = vmatmul.bf16.gmra.mxu0 %v3384_v30 }
  0xad   : > { %v1108_v29 = vsel %vm1076_vm1, %v563_v28, 0.0  ;;  %1255 = vst.msk [vmem:[#allocation2 + $0x18] sm:$0xff] %vm1140_vm0, %v563_v28 }
  0xae   : > { %1288 = vst.msk [vmem:[#allocation2 + $0x148] sm:$0xff] %vm1140_vm0, %v563_v28  ;;  %v528_v32 = vpop.f32.mrf.mxu3  ;;  %v618_v28 = vadd.s32 176, %v4266_v23 }
  0xaf   : > { %1321 = vst.msk [vmem:[#allocation2 + $0x278] sm:$0xff] %vm1140_vm0, %v1108_v29  ;;  %v529_v47 = vadd.f32 %v4277_v24, %v528_v32 }
  0xb0   : > { %v485_v33 = vpop.f32.mrf.mxu0 }
  0xb1   : > { %v486_v48 = vadd.f32 %v4277_v24, %v485_v33  ;;  %v581_v53 = vmax.f32 %v529_v47, 0.0 }
  0xb3   : > { %v564_v54 = vmax.f32 %v486_v48, 0.0  ;;  %v1126_v61 = vsel %vm4460_vm2, %v581_v53, 0.0  ;;  %1273 = vst.msk [vmem:[#allocation2 + $0xa8] sm:$0xff] %vm1140_vm0, %v581_v53  ;;  %v619_v48 = vadd.s32 184, %v4266_v23 }
  0xb4   : > { %1306 = vst.msk [vmem:[#allocation2 + $0x1d8] sm:$0xff] %vm1140_vm0, %v581_v53 }
  0xb5   : > { %v1045_v62 = vsel %vm4464_vm3, %v564_v54, 0.0  ;;  %1339 = vst.msk [vmem:[#allocation2 + $0x308] sm:$0xff] %vm1140_vm0, %v1126_v61  ;;  %v1387_v30 = vld [vmem:[#allocation2 + $0x148] sm:$0xff] }
  0xb6   : > { %v530_v36 = vpop.f32.mrf.mxu3  ;;  %v1418_v39 = vld [vmem:[#allocation2 + $0x271] sm:$0xff]  ;;  %1256 = vst.msk [vmem:[#allocation2 + $0x20] sm:$0xff] %vm1140_vm0, %v1045_v62 }
  0xb7   : > { %v3464_v40 = vpack.i.bf16 %v1418_v39, %v1417_v38  ;;  %v531_v55 = vadd.f32 %v4277_v24, %v530_v36  ;;  %1289 = vst.msk [vmem:[#allocation2 + $0x150] sm:$0xff] %vm1140_vm0, %v564_v54  ;;  %v601_v38 = vadd.s32 40, %v4266_v23 }
  0xb8   : > { %v488_v41 = vpop.f32.mrf.mxu0  ;;  %1322 = vst.msk [vmem:[#allocation2 + $0x280] sm:$0xff] %vm1140_vm0, %v564_v54  ;;  %v1355_v54 = vld [vmem:[#allocation2 + $0x17] sm:$0xff] }
  0xb9   : > { %3465 = vrot.lane.b32.xlu1 %v3464_v40, %s4121_s28  ;;  %v582_v63 = vmax.f32 %v531_v55, 0.0  ;;  %v489_v0 = vadd.f32 %v4277_v24, %v488_v41  ;;  %v667_v51 = vand.u32 15, %v601_v38 }
  0xbb   : > { %v1063_v6 = vsel %vm4481_vm4, %v582_v63, 0.0  ;;  %v565_v7 = vmax.f32 %v489_v0, 0.0  ;;  %1307 = vst.msk [vmem:[#allocation2 + $0x1e0] sm:$0xff] %vm1140_vm0, %v582_v63  ;;  %v1405_v39 = vld [vmem:[#allocation2 + $0x1d8] sm:$0xff]  ;;  %vm4566_vm11 = vcmp.ne.s32.totalorder %v667_v51, 15 }
  0xbc   : > { %1274 = vst.msk [vmem:[#allocation2 + $0xb0] sm:$0xff] %vm1140_vm0, %v1063_v6 }
  0xbd   : > { %v1110_v15 = vsel %vm4495_vm5, %v565_v7, 0.0  ;;  %1340 = vst.msk [vmem:[#allocation2 + $0x310] sm:$0xff] %vm1140_vm0, %v582_v63  ;;  %v1356_v50 = vld [vmem:[#allocation2 + $0x1f] sm:$0xff]  ;;  %v602_v63 = vadd.s32 48, %v4266_v23 }
  0xbe   : > { %v533_v42 = vpop.f32.mrf.mxu3  ;;  %1257 = vst.msk [vmem:[#allocation2 + $0x28] sm:$0xff] %vm1140_vm0, %v565_v7  ;;  %v1388_v31 = vld [vmem:[#allocation2 + $0x150] sm:$0xff]  ;;  %v3479_v58 = vpack.i.bf16 %v1356_v50, %v1355_v54  ;;  %v609_v50 = vadd.s32 104, %v4266_v23 }
  0xbf   : > { %v534_v8 = vadd.f32 %v4277_v24, %v533_v42  ;;  %1290 = vst.msk [vmem:[#allocation2 + $0x158] sm:$0xff] %vm1140_vm0, %v565_v7  ;;  %v3474_v35 = vpack.i.bf16 %v1388_v31, %v1387_v30  ;;  %v786_v42 = vand.u32 15, %v618_v28  ;;  %v674_v13 = vand.u32 15, %v602_v63 }
  0xc0   : > { %v490_v43 = vpop.f32.mrf.mxu0  ;;  %1323 = vst.msk [vmem:[#allocation2 + $0x288] sm:$0xff] %vm1140_vm0, %v1110_v15  ;;  %v603_v15 = vadd.s32 56, %v4266_v23 }
  0xc1   : > { %v491_v9 = vadd.f32 %v4277_v24, %v490_v43  ;;  %v583_v16 = vmax.f32 %v534_v8, 0.0  ;;  %3475 = vrot.lane.b32.xlu2 %v3474_v35, %s4122_s29  ;;  %3470 = vrot.lane.b32.xlu0 %v3474_v35, %s4120_s27  ;;  %vm4559_vm10 = vcmp.ne.s32.totalorder %v786_v42, 0  ;;  %vm4607_vm13 = vcmp.ne.s32.totalorder %v674_v13, 0 }
  0xc2   : > { %v1406_v40 = vld [vmem:[#allocation2 + $0x1e0] sm:$0xff]  ;;  %v681_v31 = vand.u32 15, %v603_v15 }
  0xc3   : > { %v566_v17 = vmax.f32 %v491_v9, 0.0  ;;  %v1128_v29 = vsel %vm4508_vm6, %v583_v16, 0.0  ;;  %1275 = vst.msk [vmem:[#allocation2 + $0xb8] sm:$0xff] %vm1140_vm0, %v583_v16  ;;  %v4541_v43 = vpack.i.bf16 %v1406_v40, %v1405_v39 }
  0xc4   : > { %1308 = vst.msk [vmem:[#allocation2 + $0x1e8] sm:$0xff] %vm1140_vm0, %v583_v16  ;;  %v1437_v1 = vld [vmem:[#allocation2 + $0x309] sm:$0xff]  ;;  %v800_v16 = vand.u32 15, %v620_v2  ;;  %vm4626_vm15 = vcmp.ne.s32.totalorder %v681_v31, 15 }
  0xc5   : > { %v1047_v32 = vsel %vm4512_vm7, %v566_v17, 0.0  ;;  %1341 = vst.msk [vmem:[#allocation2 + $0x318] sm:$0xff] %vm1140_vm0, %v1128_v29  ;;  %3485 = vrot.lane.b32.xlu1 %v4541_v43, %s4120_s27 }
  0xc6   : > { %v535_v46 = vpop.f32.mrf.mxu3  ;;  %1258 = vst.msk [vmem:[#allocation2 + $0x30] sm:$0xff] %vm1140_vm0, %v1047_v32  ;;  %v1389_v3 = vld [vmem:[#allocation2 + $0x158] sm:$0xff]  ;;  %vm4619_vm14 = vcmp.ne.s32.totalorder %v800_v16, 0 }
  0xc7   : > { %v536_v18 = vadd.f32 %v4277_v24, %v535_v46  ;;  %1291 = vst.msk [vmem:[#allocation2 + $0x160] sm:$0xff] %vm1140_vm0, %v566_v17  ;;  %v1420_v12 = vld [vmem:[#allocation2 + $0x281] sm:$0xff] }
  0xc8   : > { %v4449_v52 = vpop.f32.mrf.mxu0  ;;  %1324 = vst.msk [vmem:[#allocation2 + $0x290] sm:$0xff] %vm1140_vm0, %v566_v17 }
  0xc9   : > { %v584_v33 = vmax.f32 %v536_v18, 0.0  ;;  %v494_v34 = vadd.f32 %v4277_v24, %v4449_v52  ;;  %3490 = vrot.lane.b32.xlu0 %v4541_v43, %s4123_s30  ;;  %3480 = vrot.lane.b32.xlu2 %v3479_v58, %s4124_s8  ;;  %v1419_v18 = vld [vmem:[#allocation2 + $0x279] sm:$0xff]  ;;  %v606_v58 = vadd.s32 80, %v4266_v23 }
  0xcb   : > { %v1065_v44 = vsel %vm4530_vm8, %v584_v33, 0.0  ;;  %v567_v45 = vmax.f32 %v494_v34, 0.0  ;;  %1309 = vst.msk [vmem:[#allocation2 + $0x1f0] sm:$0xff] %vm1140_vm0, %v584_v33  ;;  %v1407_v14 = vld [vmem:[#allocation2 + $0x1e8] sm:$0xff]  ;;  %v807_v34 = vand.u32 15, %v621_v25 }
  0xcc   : > { %1276 = vst.msk [vmem:[#allocation2 + $0xc0] sm:$0xff] %vm1140_vm0, %v1065_v44  ;;  %v1438_v62 = vld [vmem:[#allocation2 + $0x311] sm:$0xff] }
  0xcd   : > { %v1112_v55 = vsel %vm4546_vm9, %v567_v45, 0.0  ;;  %1342 = vst.msk [vmem:[#allocation2 + $0x320] sm:$0xff] %vm1140_vm0, %v584_v33  ;;  %v4581_v7 = vpack.i.bf16 %v1438_v62, %v1437_v1  ;;  %v4623_v39 = vld [vmem:[#allocation2 + $0x2f] sm:$0xff]  ;;  %vm4642_vm1 = vcmp.ne.s32.totalorder %v807_v34, 15  ;;  %v702_v1 = vand.u32 15, %v606_v58 }
  0xce   : > { %v538_v60 = vpop.f32.mrf.mxu3  ;;  %1259 = vst.msk [vmem:[#allocation2 + $0x38] sm:$0xff] %vm1140_vm0, %v567_v45  ;;  %v1390_v4 = vld [vmem:[#allocation2 + $0x160] sm:$0xff]  ;;  %v623_v34 = vadd.s32 216, %v4266_v23 }
  0xcf   : > { %v539_v41 = vadd.f32 %v4277_v24, %v538_v60  ;;  %v793_v60 = vand.u32 15, %v619_v48  ;;  %1292 = vst.msk [vmem:[#allocation2 + $0x168] sm:$0xff] %vm1140_vm0, %v567_v45  ;;  %v4584_v8 = vpack.i.bf16 %v1390_v4, %v1389_v3  ;;  %v605_v45 = vadd.s32 72, %v4266_v23 }
  0xd0   : > { %v495_v5 = vpop.f32.mrf.mxu0  ;;  %1325 = vst.msk [vmem:[#allocation2 + $0x298] sm:$0xff] %vm1140_vm0, %v1112_v55  ;;  %vm4694_vm4 = vcmp.ne.s32.totalorder %v702_v1, 0 }
  0xd1   : > { %v496_v47 = vadd.f32 %v4277_v24, %v495_v5  ;;  %v585_v52 = vmax.f32 %v539_v41, 0.0  ;;  %vm4588_vm12 = vcmp.ne.s32.totalorder %v793_v60, 15  ;;  %3510 = vrot.lane.b32.xlu1 %v4584_v8, %s4120_s27  ;;  %v604_v41 = vadd.s32 64, %v4266_v23 }
  0xd2   : > { %v1408_v17 = vld [vmem:[#allocation2 + $0x1f0] sm:$0xff]  ;;  %v695_v56 = vand.u32 15, %v605_v45 }
  0xd3   : > { %v568_v59 = vmax.f32 %v496_v47, 0.0  ;;  %v1130_v0 = vsel %vm4559_vm10, %v585_v52, 0.0  ;;  %1277 = vst.msk [vmem:[#allocation2 + $0xc8] sm:$0xff] %vm1140_vm0, %v585_v52  ;;  %v4604_v29 = vpack.i.bf16 %v1408_v17, %v1407_v14  ;;  %v4637_v47 = vld [vmem:[#allocation2 + $0x27] sm:$0xff]  ;;  %v688_v54 = vand.u32 15, %v604_v41 }
  0xd4   : > { %1310 = vst.msk [vmem:[#allocation2 + $0x1f8] sm:$0xff] %vm1140_vm0, %v585_v52  ;;  %v1439_v42 = vld [vmem:[#allocation2 + $0x319] sm:$0xff]  ;;  %v3524_v51 = vpack.i.bf16 %v4623_v39, %v4637_v47  ;;  %vm4670_vm3 = vcmp.ne.s32.totalorder %v695_v56, 15  ;;  %v821_v41 = vand.u32 15, %v623_v34 }
  0xd5   : > { %v1049_v9 = vsel %vm4566_vm11, %v568_v59, 0.0  ;;  %1343 = vst.msk [vmem:[#allocation2 + $0x328] sm:$0xff] %vm1140_vm0, %v1130_v0  ;;  %vm4664_vm2 = vcmp.ne.s32.totalorder %v688_v54, 0  ;;  %v4751_v58 = vld [vmem:[#allocation2 + $0x37] sm:$0xff] }
  0xd6   : > { %v540_v26 = vpop.f32.mrf.mxu3  ;;  %1260 = vst.msk [vmem:[#allocation2 + $0x40] sm:$0xff] %vm1140_vm0, %v1049_v9  ;;  %vm1039_vm8 = vcmp.ne.s32.totalorder %v821_v41, 15 }
  0xd7   : > { %v541_v57 = vadd.f32 %v4277_v24, %v540_v26  ;;  %v3499_v26 = vpack.i.bf16 %v1420_v12, %v1419_v18  ;;  %1293 = vst.msk [vmem:[#allocation2 + $0x170] sm:$0xff] %vm1140_vm0, %v568_v59  ;;  %v1422_v16 = vld [vmem:[#allocation2 + $0x291] sm:$0xff]  ;;  %v814_v18 = vand.u32 15, %v622_v10 }
  0xd8   : > { %v4517_v27 = vpop.f32.mrf.mxu0  ;;  %1326 = vst.msk [vmem:[#allocation2 + $0x2a0] sm:$0xff] %vm1140_vm0, %v568_v59 }
  0xd9   : > { %v586_v5 = vmax.f32 %v541_v57, 0.0  ;;  %v499_v6 = vadd.f32 %v4277_v24, %v4517_v27  ;;  %3500 = vrot.lane.b32.xlu0 %v3499_v26, %s4125_s9  ;;  %3495 = vrot.lane.b32.xlu2 %v3499_v26, %s4121_s28  ;;  %vm4711_vm6 = vcmp.ne.s32.totalorder %v814_v18, 0 }
  0xda   : > { %3520 = vrot.lane.b32.xlu1 %v4584_v8, %s4122_s29  ;;  %v4679_v3 = vld [vmem:[#allocation2 + $0xc7] sm:$0xff] }
  0xdb   : > { %v1067_v19 = vsel %vm4588_vm12, %v586_v5, 0.0  ;;  %v569_v20 = vmax.f32 %v499_v6, 0.0  ;;  %1311 = vst.msk [vmem:[#allocation2 + $0x200] sm:$0xff] %vm1140_vm0, %v586_v5  ;;  %v607_v6 = vadd.s32 88, %v4266_v23 }
  0xdc   : > { %1278 = vst.msk [vmem:[#allocation2 + $0xd0] sm:$0xff] %vm1140_vm0, %v1067_v19  ;;  %v1440_v44 = vld [vmem:[#allocation2 + $0x321] sm:$0xff] }
  0xdd   : > { %1344 = vst.msk [vmem:[#allocation2 + $0x330] sm:$0xff] %vm1140_vm0, %v586_v5  ;;  %v1114_v35 = vsel %vm4607_vm13, %v569_v20, 0.0  ;;  %v4635_v46 = vpack.i.bf16 %v1440_v44, %v1439_v42  ;;  %v709_v14 = vand.u32 15, %v607_v6  ;;  %v611_v6 = vadd.s32 120, %v4266_v23 }
  0xde   : > { %v543_v53 = vpop.f32.mrf.mxu3  ;;  %1261 = vst.msk [vmem:[#allocation2 + $0x48] sm:$0xff] %vm1140_vm0, %v569_v20 }
  0xdf   : > { %v544_v21 = vadd.f32 %v4277_v24, %v543_v53  ;;  %1294 = vst.msk [vmem:[#allocation2 + $0x178] sm:$0xff] %vm1140_vm0, %v569_v20  ;;  %vm1023_vm5 = vcmp.ne.s32.totalorder %v709_v14, 15  ;;  %v1421_v20 = vld [vmem:[#allocation2 + $0x289] sm:$0xff]  ;;  %v737_v12 = vand.u32 15, %v611_v6 }
  0xe0   : > { %v500_v49 = vpop.f32.mrf.mxu0  ;;  %1327 = vst.msk [vmem:[#allocation2 + $0x2a8] sm:$0xff] %vm1140_vm0, %v1114_v35  ;;  %v3544_v25 = vpack.i.bf16 %v1422_v16, %v1421_v20 }
  0xe1   : > { %v501_v27 = vadd.f32 %v4277_v24, %v500_v49  ;;  %v587_v32 = vmax.f32 %v544_v21, 0.0  ;;  %3525 = vrot.lane.b32.xlu0 %v3524_v51, %s4124_s8  ;;  %3505 = vrot.lane.b32.xlu2 %v4581_v7, %s4121_s28  ;;  %vm1027_vm11 = vcmp.ne.s32.totalorder %v737_v12, 15  ;;  %v2622_v12 = vld [vmem:[%s5909_s3 + $0x20] sm:$0xf] }
  0xe2   : > { %3530 = vrot.lane.b32.xlu1 %v3524_v51, %s4126_s10  ;;  %v1410_v63 = vld [vmem:[#allocation2 + $0x200] sm:$0xff] }
  0xe3   : > { %v570_v37 = vmax.f32 %v501_v27, 0.0  ;;  %v1132_v48 = vsel %vm4619_vm14, %v587_v32, 0.0  ;;  %1279 = vst.msk [vmem:[#allocation2 + $0xd8] sm:$0xff] %vm1140_vm0, %v587_v32  ;;  %v1391_v27 = vld [vmem:[#allocation2 + $0x168] sm:$0xff] }
  0xe4   : > { %1312 = vst.msk [vmem:[#allocation2 + $0x208] sm:$0xff] %vm1140_vm0, %v587_v32  ;;  %v608_v32 = vadd.s32 96, %v4266_v23 }
  0xe5   : > { %v1051_v52 = vsel %vm4626_vm15, %v570_v37, 0.0  ;;  %1345 = vst.msk [vmem:[#allocation2 + $0x338] sm:$0xff] %vm1140_vm0, %v1132_v48 }
  0xe6   : > { %v545_v28 = vpop.f32.mrf.mxu3  ;;  %1262 = vst.msk [vmem:[#allocation2 + $0x50] sm:$0xff] %vm1140_vm0, %v1051_v52  ;;  %v716_v40 = vand.u32 15, %v608_v32  ;;  %v723_v52 = vand.u32 15, %v609_v50  ;;  %v1393_v18 = vld [vmem:[#allocation2 + $0x178] sm:$0xff] }
  0xe7   : > { %v546_v33 = vadd.f32 %v4277_v24, %v545_v28  ;;  %1295 = vst.msk [vmem:[#allocation2 + $0x180] sm:$0xff] %vm1140_vm0, %v570_v37  ;;  %v1392_v28 = vld [vmem:[#allocation2 + $0x170] sm:$0xff] }
  0xe8   : > { %v503_v11 = vpop.f32.mrf.mxu0  ;;  %1328 = vst.msk [vmem:[#allocation2 + $0x2b0] sm:$0xff] %vm1140_vm0, %v570_v37  ;;  %v3574_v36 = vpack.i.bf16 %v1392_v28, %v1391_v27  ;;  %vm1088_vm7 = vcmp.ne.s32.totalorder %v716_v40, 0  ;;  %vm1025_vm9 = vcmp.ne.s32.totalorder %v723_v52, 15  ;;  %v624_v27 = vadd.s32 224, %v4266_v23  ;;  %v1441_v52 = vld [vmem:[#allocation2 + $0x329] sm:$0xff] }
  0xe9   : > { %v588_v49 = vmax.f32 %v546_v33, 0.0  ;;  %v504_v53 = vadd.f32 %v4277_v24, %v503_v11  ;;  %3540 = vrot.lane.b32.xlu0 %v4604_v29, %s4122_s29  ;;  %3515 = vrot.lane.b32.xlu2 %v4584_v8, %s4123_s30  ;;  %v4691_v11 = vld [vmem:[#allocation2 + $0xbf] sm:$0xff] }
  0xea   : > { %v3559_v13 = vpack.i.bf16 %v4679_v3, %v4691_v11  ;;  %v828_v32 = vand.u32 15, %v624_v27  ;;  %v1374_v27 = vld [vmem:[#allocation2 + $0xaf] sm:$0xff] }
  0xeb   : > { %v1069_v57 = vsel %vm4642_vm1, %v588_v49, 0.0  ;;  %v571_v59 = vmax.f32 %v504_v53, 0.0  ;;  %1313 = vst.msk [vmem:[#allocation2 + $0x210] sm:$0xff] %vm1140_vm0, %v588_v49  ;;  %vm2703_vm1 = vcmask 1043456  }
  0xec   : > { %1280 = vst.msk [vmem:[#allocation2 + $0xe0] sm:$0xff] %vm1140_vm0, %v1069_v57  ;;  %3560 = vrot.lane.b32.xlu1 %v3559_v13, %s4124_s8  ;;  %v610_v57 = vadd.s32 112, %v4266_v23  ;;  %v1423_v13 = vld [vmem:[#allocation2 + $0x299] sm:$0xff]  ;;  %vm1104_vm13 = vcmp.ne.s32.totalorder %v828_v32, 0 }
  0xed   : > { %1346 = vst.msk [vmem:[#allocation2 + $0x340] sm:$0xff] %vm1140_vm0, %v588_v49  ;;  %v1116_v2 = vsel %vm4664_vm2, %v571_v59, 0.0  ;;  %vm2367_vm2 = vcmask 130048   ;;  %v3403_v32 = vld [vmem:[%s5909_s3 + $0x18] sm:$0xff] }
  0xee   : > { %1263 = vst.msk [vmem:[#allocation2 + $0x58] sm:$0xff] %vm1140_vm0, %v571_v59  ;;  %v548_v9 = vpop.f32.mrf.mxu3  ;;  %v730_v61 = vand.u32 15, %v610_v57  ;;  %v4808_v57 = vld [vmem:[#allocation2 + $0x4f] sm:$0xff] }
  0xef   : > { %1296 = vst.msk [vmem:[#allocation2 + $0x188] sm:$0xff] %vm1140_vm0, %v571_v59  ;;  %v549_v15 = vadd.f32 %v4277_v24, %v548_v9 }
  0xf0   : > { %v505_v38 = vpop.f32.mrf.mxu0  ;;  %1329 = vst.msk [vmem:[#allocation2 + $0x2b8] sm:$0xff] %vm1140_vm0, %v1116_v2  ;;  %vm1090_vm10 = vcmp.ne.s32.totalorder %v730_v61, 0 }
  0xf1   : > { %v506_v55 = vadd.f32 %v4277_v24, %v505_v38  ;;  %v589_v26 = vmax.f32 %v549_v15, 0.0  ;;  %3545 = vrot.lane.b32.xlu0 %v3544_v25, %s4121_s28  ;;  %3535 = vrot.lane.b32.xlu2 %v4604_v29, %s4120_s27 }
  0xf3   : > { %v572_v62 = vmax.f32 %v506_v55, 0.0  ;;  %v1134_v37 = vsel %vm4711_vm6, %v589_v26, 0.0  ;;  %1281 = vst.msk [vmem:[#allocation2 + $0xe8] sm:$0xff] %vm1140_vm0, %v589_v26  ;;  %v4742_v55 = vld [vmem:[#allocation2 + $0x3f] sm:$0xff]  ;;  %vm2433_vm6 = vcmask 261120  }
  0xf4   : > { %3575 = vrot.lane.b32.xlu1 %v3574_v36, %s4120_s27  ;;  %1314 = vst.msk [vmem:[#allocation2 + $0x218] sm:$0xff] %vm1140_vm0, %v589_v26  ;;  %v3589_v59 = vpack.i.bf16 %v4742_v55, %v4751_v58 }
  0xf5   : > { %v1053_v4 = vsel %vm4670_vm3, %v572_v62, 0.0  ;;  %1297 = vst.msk [vmem:[#allocation2 + $0x190] sm:$0xff] %vm1140_vm0, %v572_v62 }
  0xf6   : > { %1264 = vst.msk [vmem:[#allocation2 + $0x60] sm:$0xff] %vm1140_vm0, %v1053_v4  ;;  %v550_v33 = vpop.f32.mrf.mxu3  ;;  %v4760_v4 = vld [vmem:[#allocation2 + $0xcf] sm:$0xff] }
  0xf7   : > { %1330 = vst.msk [vmem:[#allocation2 + $0x2c0] sm:$0xff] %vm1140_vm0, %v572_v62  ;;  %v551_v35 = vadd.f32 %v4277_v24, %v550_v33  ;;  %v1409_v62 = vld [vmem:[#allocation2 + $0x1f8] sm:$0xff]  ;;  %v3614_v9 = vpack.i.bf16 %v4760_v4, %v4679_v3  ;;  %v612_v3 = vadd.s32 128, %v4266_v23 }
  0xf8   : > { %v508_v60 = vpop.f32.mrf.mxu0  ;;  %1347 = vst.msk [vmem:[#allocation2 + $0x348] sm:$0xff] %vm1140_vm0, %v1134_v37  ;;  %v4758_v2 = vpack.i.bf16 %v1410_v63, %v1409_v62  ;;  %v4826_v63 = vpop.permute.xlu0 %3460 }
  0xf9   : > { %v509_v0 = vadd.f32 %v4277_v24, %v508_v60  ;;  %v590_v44 = vmax.f32 %v551_v35, 0.0  ;;  %3550 = vrot.lane.b32.xlu0 %v3544_v25, %s4127_s11  ;;  %3555 = vrot.lane.b32.xlu2 %v3544_v25, %s4125_s9  ;;  %v613_v35 = vadd.s32 136, %v4266_v23 }
  0xfb   : > { %v573_v5 = vmax.f32 %v509_v0, 0.0  ;;  %v1071_v48 = vsel %vm1039_vm8, %v590_v44, 0.0  ;;  %1315 = vst.msk [vmem:[#allocation2 + $0x220] sm:$0xff] %vm1140_vm0, %v590_v44  ;;  %vm2499_vm8 = vcmask 392192  }
  0xfc   : > { %1282 = vst.msk [vmem:[#allocation2 + $0xf0] sm:$0xff] %vm1140_vm0, %v1071_v48  ;;  %3580 = vrot.lane.b32.xlu1 %v3574_v36, %s4123_s30  ;;  %v1442_v48 = vld [vmem:[#allocation2 + $0x331] sm:$0xff] }
  0xfd   : > { %v1118_v19 = vsel %vm4694_vm4, %v573_v5, 0.0  ;;  %1265 = vst.msk [vmem:[#allocation2 + $0x68] sm:$0xff] %vm1140_vm0, %v573_v5 }
  0xfe   : > { %1298 = vst.msk [vmem:[#allocation2 + $0x198] sm:$0xff] %vm1140_vm0, %v573_v5  ;;  %v553_v26 = vpop.f32.mrf.mxu3 }
  0xff   : > { %1331 = vst.msk [vmem:[#allocation2 + $0x2c8] sm:$0xff] %vm1140_vm0, %v1118_v19  ;;  %v1394_v19 = vld [vmem:[#allocation2 + $0x180] sm:$0xff] }
 0x100   : > { %v510_v8 = vpop.f32.mrf.mxu0  ;;  %1348 = vst.msk [vmem:[#allocation2 + $0x350] sm:$0xff] %vm1140_vm0, %v590_v44  ;;  %v3654_v28 = vpack.i.bf16 %v1394_v19, %v1393_v18  ;;  %v625_v44 = vadd.s32 232, %v4266_v23 }
 0x101   : > { %v511_v17 = vadd.f32 %v4277_v24, %v510_v8  ;;  %3565 = vrot.lane.b32.xlu0 %v4635_v46, %s4121_s28  ;;  %3570 = vrot.lane.b32.xlu2 %v4635_v46, %s4125_s9  ;;  %v1424_v8 = vld [vmem:[#allocation2 + $0x2a1] sm:$0xff] }
 0x102   : > { %v3624_v16 = vpack.i.bf16 %v1424_v8, %v1423_v13  ;;  %v835_v50 = vand.u32 15, %v625_v44  ;;  %v2644_v13 = vunpack.c.l.b16 %v2622_v12 }
 0x103   : > { %v574_v21 = vmax.f32 %v511_v17, 0.0 }
 0x104   : > { %3590 = vrot.lane.b32.xlu1 %v3589_v59, %s4124_s8  ;;  %vm1041_vm15 = vcmp.ne.s32.totalorder %v835_v50, 15 }
 0x105   : > { %v1055_v30 = vsel %vm1023_vm5, %v574_v21, 0.0  ;;  %1299 = vst.msk [vmem:[#allocation2 + $0x1a0] sm:$0xff] %vm1140_vm0, %v574_v21  ;;  %vm2400_vm5 = vcmask 195584  }
 0x106   : > { %1266 = vst.msk [vmem:[#allocation2 + $0x70] sm:$0xff] %vm1140_vm0, %v1055_v30  ;;  %v554_v30 = vadd.f32 %v4277_v24, %v553_v26 }
 0x107   : > { %1332 = vst.msk [vmem:[#allocation2 + $0x2d0] sm:$0xff] %vm1140_vm0, %v574_v21  ;;  %v744_v21 = vand.u32 15, %v612_v3 }
 0x108   : > { %v513_v38 = vpop.f32.mrf.mxu0  ;;  %v591_v33 = vmax.f32 %v554_v30, 0.0 }
 0x109   : > { %v514_v42 = vadd.f32 %v4277_v24, %v513_v38  ;;  %3585 = vrot.lane.b32.xlu0 %v3574_v36, %s4122_s29  ;;  %3610 = vrot.lane.b32.xlu2 %v4758_v2, %s4122_s29  ;;  %vm1092_vm12 = vcmp.ne.s32.totalorder %v744_v21, 0  ;;  %v751_v38 = vand.u32 15, %v613_v35 }
 0x10a   : > { %v1136_v36 = vsel %vm1104_vm13, %v591_v33, 0.0  ;;  %1283 = vst.msk [vmem:[#allocation2 + $0xf8] sm:$0xff] %vm1140_vm0, %v591_v33 }
 0x10b   : > { %v575_v45 = vmax.f32 %v514_v42, 0.0  ;;  %1316 = vst.msk [vmem:[#allocation2 + $0x228] sm:$0xff] %vm1140_vm0, %v591_v33  ;;  %vm1029_vm14 = vcmp.ne.s32.totalorder %v751_v38, 15  ;;  %v555_v42 = vpop.f32.mrf.mxu3  ;;  %v1444_v38 = vld [vmem:[#allocation2 + $0x341] sm:$0xff] }
 0x10c   : > { %3615 = vrot.lane.b32.xlu1 %v3614_v9, %s4126_s10  ;;  %1349 = vst.msk [vmem:[#allocation2 + $0x358] sm:$0xff] %vm1140_vm0, %v1136_v36 }
 0x10d   : > { %v1120_v49 = vsel %vm1088_vm7, %v575_v45, 0.0  ;;  %1267 = vst.msk [vmem:[#allocation2 + $0x78] sm:$0xff] %vm1140_vm0, %v575_v45  ;;  %vm2466_vm7 = vcmask 326656  }
 0x10e   : > { %1300 = vst.msk [vmem:[#allocation2 + $0x1a8] sm:$0xff] %vm1140_vm0, %v575_v45  ;;  %v556_v45 = vadd.f32 %v4277_v24, %v555_v42  ;;  %v626_v42 = vadd.s32 240, %v4266_v23 }
 0x10f   : > { %1333 = vst.msk [vmem:[#allocation2 + $0x2d8] sm:$0xff] %vm1140_vm0, %v1120_v49 }
 0x110   : > { %v515_v51 = vpop.f32.mrf.mxu0  ;;  %v842_v50 = vand.u32 15, %v626_v42 }
 0x111   : > { %v516_v53 = vadd.f32 %v4277_v24, %v515_v51  ;;  %3595 = vrot.lane.b32.xlu0 %v3589_v59, %s4126_s10  ;;  %3625 = vrot.lane.b32.xlu2 %v3624_v16, %s4127_s11  ;;  %v592_v51 = vmax.f32 %v556_v45, 0.0  ;;  %v4813_v59 = vld [vmem:[#allocation2 + $0x47] sm:$0xff] }
 0x112   : > { %v3669_v61 = vpack.i.bf16 %v4808_v57, %v4813_v59  ;;  %vm1106_vm3 = vcmp.ne.s32.totalorder %v842_v50, 0 }
 0x113   : > { %v576_v54 = vmax.f32 %v516_v53, 0.0  ;;  %1317 = vst.msk [vmem:[#allocation2 + $0x230] sm:$0xff] %vm1140_vm0, %v592_v51 }
 0x114   : > { %3620 = vrot.lane.b32.xlu1 %v3624_v16, %s4121_s28  ;;  %1350 = vst.msk [vmem:[#allocation2 + $0x360] sm:$0xff] %vm1140_vm0, %v592_v51 }
 0x115   : > { %v1057_v56 = vsel %vm1025_vm9, %v576_v54, 0.0  ;;  %1301 = vst.msk [vmem:[#allocation2 + $0x1b0] sm:$0xff] %vm1140_vm0, %v576_v54  ;;  %vm2532_vm9 = vcmask 457728  }
 0x116   : > { %1268 = vst.msk [vmem:[#allocation2 + $0x80] sm:$0xff] %vm1140_vm0, %v1057_v56  ;;  %v4806_v56 = vld [vmem:[#allocation2 + $0xd7] sm:$0xff] }
 0x117   : > { %1334 = vst.msk [vmem:[#allocation2 + $0x2e0] sm:$0xff] %vm1140_vm0, %v576_v54  ;;  %v1073_v54 = vsel %vm1041_vm15, %v592_v51, 0.0 }
 0x118   : > { %v518_v60 = vpop.f32.mrf.mxu0  ;;  %1284 = vst.msk [vmem:[#allocation2 + $0x100] sm:$0xff] %vm1140_vm0, %v1073_v54 }
 0x119   : > { %v519_v0 = vadd.f32 %v4277_v24, %v518_v60  ;;  %3600 = vrot.lane.b32.xlu0 %v4758_v2, %s4120_s27  ;;  %3655 = vrot.lane.b32.xlu2 %v3654_v28, %s4120_s27  ;;  %v3634_v60 = vpack.i.bf16 %v4806_v56, %v4760_v4 }
 0x11b   : > { %v577_v1 = vmax.f32 %v519_v0, 0.0  ;;  %v4803_v53 = vpop.permute.xlu2 %3475 }
 0x11c   : > { %3630 = vrot.lane.b32.xlu1 %v3624_v16, %s4125_s9  ;;  %v1426_v16 = vld [vmem:[#allocation2 + $0x2b1] sm:$0xff] }
 0x11d   : > { %v1122_v5 = vsel %vm1090_vm10, %v577_v1, 0.0  ;;  %1269 = vst.msk [vmem:[#allocation2 + $0x88] sm:$0xff] %vm1140_vm0, %v577_v1  ;;  %vm2565_vm10 = vcmask 523264  }
 0x11e   : > { %1302 = vst.msk [vmem:[#allocation2 + $0x1b8] sm:$0xff] %vm1140_vm0, %v577_v1  ;;  %v4830_v1 = vld [vmem:[#allocation2 + $0xdf] sm:$0xff] }
 0x11f   : > { %1335 = vst.msk [vmem:[#allocation2 + $0x2e8] sm:$0xff] %vm1140_vm0, %v1122_v5  ;;  %v1412_v5 = vld [vmem:[#allocation2 + $0x210] sm:$0xff]  ;;  %v3694_v9 = vpack.i.bf16 %v4830_v1, %v4806_v56 }
 0x120   : > { %v520_v10 = vpop.f32.mrf.mxu0 }
 0x121   : > { %v521_v14 = vadd.f32 %v4277_v24, %v520_v10  ;;  %3605 = vrot.lane.b32.xlu0 %v4758_v2, %s4123_s30  ;;  %3665 = vrot.lane.b32.xlu2 %v3654_v28, %s4122_s29  ;;  %v1411_v2 = vld [vmem:[#allocation2 + $0x208] sm:$0xff] }
 0x122   : > { %v3684_v10 = vpack.i.bf16 %v1412_v5, %v1411_v2  ;;  %v1396_v2 = vld [vmem:[#allocation2 + $0x190] sm:$0xff]  ;;  %v627_v5 = vadd.s32 248, %v4266_v23 }
 0x123   : > { %v578_v15 = vmax.f32 %v521_v14, 0.0  ;;  %v4821_v62 = vpop.permute.xlu2 %3480 }
 0x125   : > { %v1059_v17 = vsel %vm1027_vm11, %v578_v15, 0.0  ;;  %1303 = vst.msk [vmem:[#allocation2 + $0x1c0] sm:$0xff] %vm1140_vm0, %v578_v15  ;;  %vm2654_vm11 = vcmask 588800  }
 0x126   : > { %1270 = vst.msk [vmem:[#allocation2 + $0x90] sm:$0xff] %vm1140_vm0, %v1059_v17  ;;  %v2649_v17 = vpack.c.b16 %v2644_v13, %v2644_v13 }
 0x127   : > { %1336 = vst.msk [vmem:[#allocation2 + $0x2f0] sm:$0xff] %vm1140_vm0, %v578_v15  ;;  %v1425_v15 = vld [vmem:[#allocation2 + $0x2a9] sm:$0xff] }
 0x128   : > { %v523_v20 = vpop.f32.mrf.mxu0  ;;  %v3709_v19 = vpack.i.bf16 %v1426_v16, %v1425_v15  ;;  %v849_v15 = vand.u32 15, %v627_v5 }
 0x129   : > { %v524_v25 = vadd.f32 %v4277_v24, %v523_v20  ;;  %3635 = vrot.lane.b32.xlu0 %v3634_v60, %s4124_s8  ;;  %3670 = vrot.lane.b32.xlu2 %v3669_v61, %s4124_s8 }
 0x12a   : > { %vm1043_vm4 = vcmp.ne.s32.totalorder %v849_v15, 15  ;;  %v3477_v15 = vunpack.i.l.bf16 %v4803_v53 }
 0x12b   : > { %v579_v31 = vmax.f32 %v524_v25, 0.0  ;;  %v4833_v6 = vpop.permute.xlu1 %3465 }
 0x12d   : > { %v1124_v34 = vsel %vm1092_vm12, %v579_v31, 0.0  ;;  %1271 = vst.msk [vmem:[#allocation2 + $0x98] sm:$0xff] %vm1140_vm0, %v579_v31  ;;  %vm3081_vm12 = vcmask 1041408  }
 0x12e   : > { %1304 = vst.msk [vmem:[#allocation2 + $0x1c8] sm:$0xff] %vm1140_vm0, %v579_v31 }
 0x12f   : > { %1337 = vst.msk [vmem:[#allocation2 + $0x2f8] sm:$0xff] %vm1140_vm0, %v1124_v34 }
 0x130   : > { %v525_v37 = vpop.f32.mrf.mxu0 }
 0x131   : > { %v526_v40 = vadd.f32 %v4277_v24, %v525_v37  ;;  %v3639_v24 = vpack.i.bf16 %v1442_v48, %v1441_v52  ;;  %3660 = vrot.lane.b32.xlu0 %v3654_v28, %s4123_s30  ;;  %3675 = vrot.lane.b32.xlu2 %v3669_v61, %s4126_s10  ;;  %v2705_v28 = vsel %vm2703_vm1, %v2649_v17, 0  ;;  %v1443_v37 = vld [vmem:[#allocation2 + $0x339] sm:$0xff]  ;;  %v3401_v52 = vld [vmem:[%s5909_s3 + $0x8] sm:$0xff] }
 0x132   : > { %2710 = vmatpush.bf16.msra.mxu1 %v2705_v28  ;;  %3436 = vmatpush.bf16.msra.mxu2 %v2705_v28  ;;  %v3719_v44 = vpack.i.bf16 %v1444_v38, %v1443_v37  ;;  %v4101_v48 = vld [vmem:[%s5908_s2] ss:$0 sm:$0xff]  ;;  %v1395_v61 = vld [vmem:[#allocation2 + $0x188] sm:$0xff]  ;;  %v3467_v38 = vunpack.i.l.bf16 %v4833_v6 }
 0x133   : > { %v580_v41 = vmax.f32 %v526_v40, 0.0  ;;  %3640 = vrot.lane.b32.xlu1 %v3639_v24, %s4121_s28  ;;  %v4828_v0 = vpop.permute.xlu2 %3495  ;;  %v4842_v8 = vpop.permute.xlu0 %3470  ;;  %v3402_v40 = vld [vmem:[%s5909_s3 + $0x10] sm:$0xff]  ;;  %v3729_v12 = vpack.i.bf16 %v1396_v2, %v1395_v61  ;;  %v1353_v28 = vld [vmem:[#allocation2 + $0x7] sm:$0xff] }
 0x135   : > { %v1061_v49 = vsel %vm1029_vm14, %v580_v41, 0.0  ;;  %1305 = vst.msk [vmem:[#allocation2 + $0x1d0] sm:$0xff] %vm1140_vm0, %v580_v41 }
 0x136   : > { %1272 = vst.msk [vmem:[#allocation2 + $0xa0] sm:$0xff] %vm1140_vm0, %v1061_v49  ;;  %2711 = vmatpush.bf16.msra.mxu1 %v3403_v32  ;;  %3437 = vmatpush.bf16.msra.mxu2 %v3403_v32 }
 0x137   : > { %1338 = vst.msk [vmem:[#allocation2 + $0x300] sm:$0xff] %vm1140_vm0, %v580_v41  ;;  %v3486_v18 = vpop.permute.xlu1 %3485  ;;  %v558_v41 = vpop.f32.mrf.mxu3 }
 0x138   : > { %v3488_v20 = vunpack.i.h.bf16 %v3486_v18  ;;  %v3487_v21 = vunpack.i.l.bf16 %v3486_v18  ;;  %v559_v49 = vadd.f32 %v4101_v48, %v558_v41  ;;  %v1363_v18 = vld [vmem:[#allocation2 + $0x57] sm:$0xff]  ;;  %v1414_v41 = vld [vmem:[#allocation2 + $0x220] sm:$0xff] }
 0x139   : > { %3695 = vrot.lane.b32.xlu0 %v3694_v9, %s4126_s10  ;;  %3685 = vrot.lane.b32.xlu2 %v3684_v10, %s4123_s30  ;;  %v3400_v9 = vld [vmem:[%s5909_s3] sm:$0xff] }
 0x13a   : > { %v2356_v30 = vsel %vm1140_vm0, %v1374_v27, %v3488_v20  ;;  %v593_v51 = vmax.f32 %v559_v49, 0.0  ;;  %2712 = vmatpush.bf16.msra.mxu1 %v3402_v40  ;;  %3438 = vmatpush.bf16.msra.mxu2 %v3402_v40  ;;  %v3463_v20 = vunpack.i.h.bf16 %v4826_v63  ;;  %v3462_v27 = vunpack.i.l.bf16 %v4826_v63  ;;  %v1413_v40 = vld [vmem:[#allocation2 + $0x218] sm:$0xff]  ;;  %v1415_v63 = vld [vmem:[#allocation2 + $0x228] sm:$0xff] }
 0x13b   : > { %3645 = vrot.lane.b32.xlu1 %v3639_v24, %s4127_s11  ;;  %v3506_v14 = vpop.permute.xlu2 %3505  ;;  %v4858_v35 = vpop.permute.xlu0 %3490 }
 0x13c   : > { %v3508_v25 = vunpack.i.h.bf16 %v3506_v14  ;;  %v3507_v26 = vunpack.i.l.bf16 %v3506_v14  ;;  %5959 = vst [vmem:[#allocation3_spill] sm:$0xff] %v4858_v35  ;;  %v1138_v60 = vsel %vm1106_vm3, %v593_v51, 0.0  ;;  %v2335_v42 = vsel %vm1140_vm0, %v1353_v28, %v3462_v27 }
 0x13d   : > { %v1373_v3 = vld [vmem:[#allocation2 + $0xa7] sm:$0xff]  ;;  %1285 = vst.msk [vmem:[#allocation2 + $0x108] sm:$0xff] %vm1140_vm0, %v593_v51 }
 0x13e   : > { %v2355_v31 = vsel %vm1140_vm0, %v1373_v3, %v3487_v21  ;;  %v4853_v33 = vsel %vm2367_vm2, %v2356_v30, %v3508_v25  ;;  %1318 = vst.msk [vmem:[#allocation2 + $0x238] sm:$0xff] %vm1140_vm0, %v593_v51  ;;  %2713 = vmatpush.bf16.msra.mxu1 %v3401_v52  ;;  %3439 = vmatpush.bf16.msra.mxu2 %v3401_v52  ;;  %v3468_v30 = vunpack.i.h.bf16 %v4833_v6 }
 0x13f   : > { %v4856_v34 = vsel %vm2367_vm2, %v2355_v31, %v3507_v26  ;;  %1351 = vst.msk [vmem:[#allocation2 + $0x368] sm:$0xff] %vm1140_vm0, %v1138_v60  ;;  %v1354_v26 = vld [vmem:[#allocation2 + $0xf] sm:$0xff]  ;;  %v3764_v52 = vpack.i.bf16 %v1414_v41, %v1413_v40  ;;  %v2368_v6 = vsel %vm2367_vm2, %v2335_v42, %v3467_v38 }
 0x140   : > { %v2336_v31 = vsel %vm1140_vm0, %v1354_v26, %v3463_v20  ;;  %v4941_v26 = vld [vmem:[#allocation2 + $0xe7] sm:$0xff] }
 0x141   : > { %3710 = vrot.lane.b32.xlu0 %v3709_v19, %s4125_s9  ;;  %3700 = vrot.lane.b32.xlu2 %v3709_v19, %s4121_s28  ;;  %v2369_v49 = vsel %vm2367_vm2, %v2336_v31, %v3468_v30  ;;  %v1427_v30 = vld [vmem:[#allocation2 + $0x2b9] sm:$0xff]  ;;  %v4946_v31 = vld [vmem:[#allocation2 + $0xef] sm:$0xff] }
 0x142   : > { %2714 = vmatpush.bf16.msra.mxu1 %v3400_v9  ;;  %3440 = vmatpush.bf16.msra.mxu2 %v3400_v9  ;;  %v3478_v9 = vunpack.i.h.bf16 %v4803_v53 }
 0x143   : > { %3650 = vrot.lane.b32.xlu1 %v3639_v24, %s4125_s9  ;;  %v4860_v36 = vpop.permute.xlu2 %3515  ;;  %v4867_v45 = vpop.permute.xlu1 %3510 }
 0x144   : > { %v3513_v2 = vunpack.i.h.bf16 %v4867_v45 }
 0x146   : > { %v1448_v50 = vld [vmem:[#allocation2 + $0x361] sm:$0xff]  ;;  %v2340_v53 = vsel %vm1140_vm0, %v4623_v39, %v3513_v2 }
 0x149   : > { %3720 = vrot.lane.b32.xlu0 %v3719_v44, %s4127_s11  ;;  %3715 = vrot.lane.b32.xlu2 %v3719_v44, %s4121_s28 }
 0x14b   : > { %3680 = vrot.lane.b32.xlu1 %v3684_v10, %s4120_s27  ;;  %v4877_v24 = vpop.permute.xlu0 %3500  ;;  %v4879_v54 = vpop.permute.xlu2 %3535 }
 0x14c   : > { %v4889_v13 = vpop.permute.xlu1 %3520  ;;  %v3503_v38 = vunpack.i.h.bf16 %v4877_v24  ;;  %v3502_v40 = vunpack.i.l.bf16 %v4877_v24 }
 0x151   : > { %3725 = vrot.lane.b32.xlu0 %v3719_v44, %s4125_s9  ;;  %3730 = vrot.lane.b32.xlu2 %v3729_v12, %s4120_s27  ;;  %v1416_v44 = vld [vmem:[#allocation2 + $0x230] sm:$0xff] }
 0x152   : > { %v4917_v51 = vpack.i.bf16 %v1416_v44, %v1415_v63 }
 0x153   : > { %3690 = vrot.lane.b32.xlu1 %v3684_v10, %s4122_s29  ;;  %v560_v10 = vpop.f32.mrf.mxu3  ;;  %v4893_v23 = vpop.permute.xlu0 %3525 }
 0x154   : > { %v561_v14 = vadd.f32 %v4101_v48, %v560_v10  ;;  %v4895_v17 = vpop.permute.xlu2 %3555  ;;  %v4902_v25 = vpop.permute.xlu1 %3530  ;;  %v1447_v48 = vld [vmem:[#allocation2 + $0x359] sm:$0xff]  ;;  %v3483_v10 = vunpack.i.h.bf16 %v4821_v62 }
 0x155   : > { %v4921_v61 = vpack.i.bf16 %v1448_v50, %v1447_v48  ;;  %v3533_v39 = vunpack.i.h.bf16 %v4902_v25  ;;  %v3532_v63 = vunpack.i.l.bf16 %v4902_v25 }
 0x156   : > { %v594_v16 = vmax.f32 %v561_v14, 0.0 }
 0x158   : > { %v1075_v3 = vsel %vm1043_vm4, %v594_v16, 0.0  ;;  %1319 = vst.msk [vmem:[#allocation2 + $0x240] sm:$0xff] %vm1140_vm0, %v594_v16 }
 0x159   : > { %1286 = vst.msk [vmem:[#allocation2 + $0x110] sm:$0xff] %vm1140_vm0, %v1075_v3  ;;  %3735 = vrot.lane.b32.xlu2 %v3729_v12, %s4123_s30 }
 0x15a   : > { %1352 = vst.msk [vmem:[#allocation2 + $0x370] sm:$0xff] %vm1140_vm0, %v594_v16  ;;  %v3482_v16 = vunpack.i.l.bf16 %v4821_v62 }
 0x15b   : > { %3705 = vrot.lane.b32.xlu1 %v3709_v19, %s4127_s11  ;;  %v1364_v19 = vld [vmem:[#allocation2 + $0x5f] sm:$0xff]  ;;  %v4909_v32 = vpop.permute.xlu0 %3540 }
 0x15c   : > { %v3744_v21 = vpack.i.bf16 %v1364_v19, %v1363_v18  ;;  %v4911_v37 = vpop.permute.xlu2 %3570  ;;  %v3543_v14 = vunpack.i.h.bf16 %v4909_v32  ;;  %v2402_v18 = vsel %vm2400_vm5, %v2369_v49, %v3483_v10  ;;  %v2401_v27 = vsel %vm2400_vm5, %v2368_v6, %v3482_v16 }
 0x15d   : > { %v3573_v19 = vunpack.i.h.bf16 %v4911_v37  ;;  %v2434_v50 = vsel %vm2433_vm6, %v2401_v27, %v3477_v15  ;;  %v3518_v10 = vunpack.i.h.bf16 %v4860_v36 }
 0x15e   : > { %3745 = vrot.lane.b32.xlu0 %v3744_v21, %s4124_s8  ;;  %v4919_v60 = vpop.permute.xlu1 %3560  ;;  %v2467_v6 = vsel %vm2466_vm7, %v2434_v50, %v3502_v40  ;;  %v4996_v40 = vld [vmem:[#allocation2 + $0xb7] sm:$0xff]  ;;  %v3472_v50 = vunpack.i.l.bf16 %v4842_v8 }
 0x15f   : > { %v3562_v5 = vunpack.i.l.bf16 %v4919_v60  ;;  %v2500_v2 = vsel %vm2499_vm8, %v2467_v6, %v3532_v63  ;;  %v1445_v63 = vld [vmem:[#allocation2 + $0x349] sm:$0xff]  ;;  %v3473_v6 = vunpack.i.h.bf16 %v4842_v8  ;;  %v4102_v8 = vld [vmem:[#allocation2 + $0x17] sm:$0xff] }
 0x161   : > { %3755 = vrot.lane.b32.xlu2 %v3764_v52, %s4120_s27  ;;  %v2422_v3 = vsel %vm2400_vm5, %v4853_v33, %v3562_v5  ;;  %v1428_v33 = vld [vmem:[#allocation2 + $0x2c1] sm:$0xff] }
 0x162   : > { %v3779_v24 = vpack.i.bf16 %v1428_v33, %v1427_v30 }
 0x163   : > { %3740 = vrot.lane.b32.xlu1 %v3729_v12, %s4122_s29  ;;  %v3512_v12 = vunpack.i.l.bf16 %v4867_v45  ;;  %v3546_v20 = vpop.permute.xlu0 %3545 }
 0x164   : > { %v4938_v45 = vpop.permute.xlu2 %3610  ;;  %v3548_v62 = vunpack.i.h.bf16 %v3546_v20  ;;  %v3547_v28 = vunpack.i.l.bf16 %v3546_v20 }
 0x165   : > { %v2339_v41 = vsel %vm1140_vm0, %v4637_v47, %v3512_v12  ;;  %v3769_v47 = vpack.i.bf16 %v4946_v31, %v4941_v26  ;;  %v3517_v12 = vunpack.i.l.bf16 %v4860_v36  ;;  %v1397_v36 = vld [vmem:[#allocation2 + $0x198] sm:$0xff] }
 0x166   : > { %3765 = vrot.lane.b32.xlu0 %v3764_v52, %s4122_s29  ;;  %v4959_v44 = vsel %vm2367_vm2, %v2339_v41, %v3547_v28  ;;  %v4962_v48 = vsel %vm2367_vm2, %v2340_v53, %v3548_v62  ;;  %v4966_v49 = vpop.permute.xlu1 %3575  ;;  %v1398_v53 = vld [vmem:[#allocation2 + $0x1a0] sm:$0xff]  ;;  %v3538_v62 = vunpack.i.h.bf16 %v4879_v54  ;;  %v3537_v28 = vunpack.i.l.bf16 %v4879_v54 }
 0x168   : > { %v2358_v54 = vsel %vm1140_vm0, %v4691_v11, %v3538_v62  ;;  %v3498_v62 = vunpack.i.h.bf16 %v4828_v0 }
 0x169   : > { %3770 = vrot.lane.b32.xlu2 %v3769_v47, %s4126_s10 }
 0x16b   : > { %3750 = vrot.lane.b32.xlu1 %v3744_v21, %s4126_s10  ;;  %v2455_v21 = vsel %vm2433_vm6, %v2422_v3, %v3543_v14  ;;  %v3551_v14 = vpop.permute.xlu0 %3550  ;;  %v2533_v3 = vsel %vm2532_vm9, %v2500_v2, %v3517_v12 }
 0x16c   : > { %v4954_v42 = vsel %vm2466_vm7, %v2455_v21, %v3573_v19  ;;  %v4978_v15 = vpop.permute.xlu2 %3625  ;;  %v3552_v16 = vunpack.i.l.bf16 %v3551_v14 }
 0x16e   : > { %3780 = vrot.lane.b32.xlu0 %v3779_v24, %s4121_s28  ;;  %v2566_v19 = vsel %vm2565_vm10, %v2533_v3, %v3552_v16  ;;  %v4985_v27 = vpop.permute.xlu1 %3580  ;;  %v5013_v16 = vld [vmem:[#allocation2 + $0x67] sm:$0xff] }
 0x171   : > { %3790 = vrot.lane.b32.xlu2 %v3779_v24, %s4125_s9 }
 0x173   : > { %3760 = vrot.lane.b32.xlu1 %v3764_v52, %s4123_s30  ;;  %v2435_v52 = vsel %vm2433_vm6, %v2402_v18, %v3478_v9  ;;  %v3553_v9 = vunpack.i.h.bf16 %v3551_v14  ;;  %v3566_v30 = vpop.permute.xlu0 %3565 }
 0x174   : > { %v2468_v25 = vsel %vm2466_vm7, %v2435_v52, %v3503_v38  ;;  %v4992_v33 = vpop.permute.xlu2 %3655  ;;  %v4994_v38 = vpack.i.bf16 %v1398_v53, %v1397_v36  ;;  %v3568_v41 = vunpack.i.h.bf16 %v3566_v30  ;;  %v3563_v52 = vunpack.i.h.bf16 %v4919_v60  ;;  %v5015_v60 = vld [vmem:[#allocation2 + $0x6f] sm:$0xff] }
 0x175   : > { %v2501_v5 = vsel %vm2499_vm8, %v2468_v25, %v3533_v39  ;;  %v3567_v39 = vunpack.i.l.bf16 %v3566_v30  ;;  %v3612_v25 = vunpack.i.l.bf16 %v4938_v45  ;;  %v3528_v30 = vunpack.i.h.bf16 %v4893_v23 }
 0x176   : > { %v2534_v18 = vsel %vm2532_vm9, %v2501_v5, %v3518_v10  ;;  %3785 = vrot.lane.b32.xlu0 %v3779_v24, %s4127_s11  ;;  %v2357_v24 = vsel %vm1140_vm0, %v4996_v40, %v3537_v28  ;;  %v5010_v5 = vsel %vm2367_vm2, %v2358_v54, %v3568_v41  ;;  %v3591_v12 = vpop.permute.xlu1 %3590  ;;  %v3497_v28 = vunpack.i.l.bf16 %v4828_v0 }
 0x177   : > { %v2567_v20 = vsel %vm2565_vm10, %v2534_v18, %v3553_v9  ;;  %v2390_v2 = vsel %vm2367_vm2, %v2357_v24, %v3567_v39  ;;  %v3593_v14 = vunpack.i.h.bf16 %v3591_v12  ;;  %v3592_v9 = vunpack.i.l.bf16 %v3591_v12  ;;  %v5057_v12 = vld [vmem:[#allocation2 + $0xff] sm:$0xff] }
 0x178   : > { %v2598_v21 = vpack.c.bf16 %v2567_v20, %v2566_v19  ;;  %v2423_v10 = vsel %vm2400_vm5, %v2390_v2, %v3563_v52  ;;  %v2337_v18 = vsel %vm1140_vm0, %v4102_v8, %v3472_v50  ;;  %v4103_v19 = vld [vmem:[#allocation2 + $0x1f] sm:$0xff] }
 0x179   : > { %v5018_v3 = vsel %vm2433_vm6, %v2423_v10, %v3612_v25  ;;  %v2338_v20 = vsel %vm1140_vm0, %v4103_v19, %v3473_v6  ;;  %v2405_v36 = vsel %vm2400_vm5, %v4959_v44, %v3592_v9  ;;  %v2406_v53 = vsel %vm2400_vm5, %v4962_v48, %v3593_v14  ;;  %v5055_v10 = vld [vmem:[#allocation2 + $0xf7] sm:$0xff] }
 0x17a   : > { %3261 = vmatmul.msk.bf16.vlgmr.msra.gmra.mxu1 %vm2654_vm11, %v2598_v21  ;;  %v3527_v21 = vunpack.i.l.bf16 %v4893_v23  ;;  %v2370_v44 = vsel %vm2367_vm2, %v2337_v18, %v3497_v28  ;;  %v2371_v54 = vsel %vm2367_vm2, %v2338_v20, %v3498_v62  ;;  %v3522_v48 = vunpack.i.l.bf16 %v4889_v13  ;;  %v1429_v28 = vld [vmem:[#allocation2 + $0x2c9] sm:$0xff] }
 0x17b   : > { %3775 = vrot.lane.b32.xlu1 %v3769_v47, %s4124_s8  ;;  %v1446_v47 = vld [vmem:[#allocation2 + $0x351] sm:$0xff]  ;;  %v3586_v41 = vpop.permute.xlu0 %3585  ;;  %v3523_v23 = vunpack.i.h.bf16 %v4889_v13  ;;  %v2404_v6 = vsel %vm2400_vm5, %v2371_v54, %v3528_v30  ;;  %v3557_v13 = vunpack.i.l.bf16 %v4895_v17  ;;  %v3558_v18 = vunpack.i.h.bf16 %v4895_v17 }
 0x17c   : > { %v3794_v11 = vpack.i.bf16 %v1446_v47, %v1445_v63  ;;  %v5032_v39 = vpop.permute.xlu2 %3665  ;;  %v5036_v63 = vpack.i.bf16 %v5015_v60, %v5013_v16  ;;  %v3588_v47 = vunpack.i.h.bf16 %v3586_v41  ;;  %v3587_v50 = vunpack.i.l.bf16 %v3586_v41  ;;  %v1430_v30 = vld [vmem:[#allocation2 + $0x2d1] sm:$0xff] }
 0x17d   : > { %v2403_v0 = vsel %vm2400_vm5, %v2370_v44, %v3527_v21  ;;  %v2437_v9 = vsel %vm2433_vm6, %v2404_v6, %v3523_v23  ;;  %v3578_v19 = vunpack.i.h.bf16 %v4966_v49  ;;  %v3577_v41 = vunpack.i.l.bf16 %v4966_v49 }
 0x17e   : > { %3795 = vrot.lane.b32.xlu0 %v3794_v11, %s4121_s28  ;;  %3800 = vrot.lane.b32.xlu2 %v3794_v11, %s4127_s11  ;;  %v5046_v24 = vsel %vm2433_vm6, %v2405_v36, %v3587_v50  ;;  %v5049_v52 = vsel %vm2433_vm6, %v2406_v53, %v3588_v47  ;;  %v5052_v25 = vpop.permute.xlu1 %3615  ;;  %v2436_v14 = vsel %vm2433_vm6, %v2403_v0, %v3522_v48  ;;  %v3582_v17 = vunpack.i.l.bf16 %v4985_v27 }
 0x17f   : > { %v3618_v2 = vunpack.i.h.bf16 %v5052_v25  ;;  %v5071_v36 = vpack.i.bf16 %v5057_v12, %v5055_v10  ;;  %v2470_v47 = vsel %vm2466_vm7, %v2437_v9, %v3558_v18  ;;  %v3628_v50 = vunpack.i.h.bf16 %v4978_v15 }
 0x180   : > { %v3627_v44 = vunpack.i.l.bf16 %v4978_v15  ;;  %v2342_v49 = vsel %vm1140_vm0, %v4742_v55, %v3578_v19  ;;  %v3849_v0 = vpack.i.bf16 %v1430_v30, %v1429_v28  ;;  %v2341_v15 = vsel %vm1140_vm0, %v4751_v58, %v3577_v41 }
 0x181   : > { %v2521_v8 = vsel %vm2499_vm8, %v4954_v42, %v3618_v2  ;;  %v3583_v42 = vunpack.i.h.bf16 %v4985_v27 }
 0x183   : > { %3815 = vrot.lane.b32.xlu1 %v4994_v38, %s4123_s30  ;;  %v3596_v20 = vpop.permute.xlu0 %3595 }
 0x184   : > { %v3671_v21 = vpop.permute.xlu2 %3670  ;;  %v3598_v53 = vunpack.i.h.bf16 %v3596_v20  ;;  %v3597_v62 = vunpack.i.l.bf16 %v3596_v20 }
 0x185   : > { %v3673_v18 = vunpack.i.h.bf16 %v3671_v21  ;;  %v3672_v20 = vunpack.i.l.bf16 %v3671_v21 }
 0x186   : > { %3810 = vrot.lane.b32.xlu0 %v4994_v38, %s4120_s27  ;;  %3805 = vrot.lane.b32.xlu2 %v3794_v11, %s4125_s9  ;;  %v2469_v11 = vsel %vm2466_vm7, %v2436_v14, %v3557_v13  ;;  %v2503_v48 = vsel %vm2499_vm8, %v2470_v47, %v3598_v53  ;;  %v3621_v23 = vpop.permute.xlu1 %3620 }
 0x187   : > { %v2502_v54 = vsel %vm2499_vm8, %v2469_v11, %v3597_v62  ;;  %v2536_v6 = vsel %vm2532_vm9, %v2503_v48, %v3583_v42  ;;  %v3623_v2 = vunpack.i.h.bf16 %v3621_v23  ;;  %v3622_v14 = vunpack.i.l.bf16 %v3621_v23 }
 0x188   : > { %v2535_v27 = vsel %vm2532_vm9, %v2502_v54, %v3582_v17  ;;  %v2569_v9 = vsel %vm2565_vm10, %v2536_v6, %v3628_v50  ;;  %v3668_v62 = vunpack.i.h.bf16 %v5032_v39  ;;  %v3667_v11 = vunpack.i.l.bf16 %v5032_v39  ;;  %v1399_v50 = vld [vmem:[#allocation2 + $0x1a8] sm:$0xff] }
 0x189   : > { %v2568_v13 = vsel %vm2565_vm10, %v2535_v27, %v3627_v44  ;;  %v2374_v19 = vsel %vm2367_vm2, %v2341_v15, %v3622_v14  ;;  %v2375_v53 = vsel %vm2367_vm2, %v2342_v49, %v3623_v2  ;;  %v1400_v44 = vld [vmem:[#allocation2 + $0x1b0] sm:$0xff]  ;;  %v3657_v2 = vunpack.i.l.bf16 %v4992_v33 }
 0x18a   : > { %v2599_v55 = vpack.c.bf16 %v2569_v9, %v2568_v13  ;;  %v2407_v58 = vsel %vm2400_vm5, %v2374_v19, %v3672_v20  ;;  %v2408_v21 = vsel %vm2400_vm5, %v2375_v53, %v3673_v18  ;;  %v3874_v23 = vpack.i.bf16 %v1400_v44, %v1399_v50  ;;  %v4104_v13 = vld [vmem:[#allocation2 + $0xc7] sm:$0xff] }
 0x18b   : > { %3825 = vrot.lane.b32.xlu1 %v5036_v63, %s4124_s8  ;;  %v3601_v28 = vpop.permute.xlu0 %3600  ;;  %v5109_v41 = vsel %vm2433_vm6, %v2408_v21, %v3668_v62  ;;  %v5138_v62 = vld [vmem:[#allocation2 + $0x7f] sm:$0xff] }
 0x18c   : > { %v5099_v30 = vpop.permute.xlu2 %3675  ;;  %3262 = vmatmul.msk.bf16.gmra.mxu1 %vm2654_vm11, %v2599_v55  ;;  %v3603_v54 = vunpack.i.h.bf16 %v3601_v28  ;;  %v3602_v48 = vunpack.i.l.bf16 %v3601_v28 }
 0x18e   : > { %3820 = vrot.lane.b32.xlu0 %v4994_v38, %s4122_s29  ;;  %3850 = vrot.lane.b32.xlu2 %v3849_v0, %s4127_s11  ;;  %v5106_v38 = vsel %vm2433_vm6, %v2407_v58, %v3667_v11  ;;  %v5111_v42 = vpop.permute.xlu1 %3630  ;;  %v2360_v14 = vsel %vm1140_vm0, %v4760_v4, %v3603_v54  ;;  %v2359_v9 = vsel %vm1140_vm0, %v4104_v13, %v3602_v48  ;;  %v5136_v4 = vld [vmem:[#allocation2 + $0x77] sm:$0xff]  ;;  %v3613_v11 = vunpack.i.h.bf16 %v4938_v45 }
 0x18f   : > { %v2343_v58 = vsel %vm1140_vm0, %v4813_v59, %v3657_v2  ;;  %v1432_v2 = vld [vmem:[#allocation2 + $0x2e1] sm:$0xff] }
 0x193   : > { %3840 = vrot.lane.b32.xlu1 %v5071_v36, %s4126_s10  ;;  %v5116_v39 = vpop.permute.xlu0 %3605 }
 0x194   : > { %v5118_v17 = vpop.permute.xlu2 %3685  ;;  %v3608_v47 = vunpack.i.h.bf16 %v5116_v39 }
 0x196   : > { %3830 = vrot.lane.b32.xlu0 %v5036_v63, %s4126_s10  ;;  %3855 = vrot.lane.b32.xlu2 %v3849_v0, %s4125_s9  ;;  %v2554_v49 = vsel %vm2532_vm9, %v2521_v8, %v3608_v47 }
 0x19b   : > { %3845 = vrot.lane.b32.xlu1 %v3849_v0, %s4121_s28  ;;  %v3658_v0 = vunpack.i.h.bf16 %v4992_v33  ;;  %v3636_v18 = vpop.permute.xlu0 %3635 }
 0x19c   : > { %v3701_v20 = vpop.permute.xlu2 %3700  ;;  %v3638_v55 = vunpack.i.h.bf16 %v3636_v18  ;;  %v3637_v33 = vunpack.i.l.bf16 %v3636_v18 }
 0x19d   : > { %v3703_v19 = vunpack.i.h.bf16 %v3701_v20  ;;  %v3702_v53 = vunpack.i.l.bf16 %v3701_v20  ;;  %v2344_v28 = vsel %vm1140_vm0, %v4808_v57, %v3658_v0  ;;  %v3879_v57 = vpack.i.bf16 %v5138_v62, %v5136_v4  ;;  %v5172_v0 = vld [vmem:[#allocation2 + $0x8f] sm:$0xff] }
 0x19e   : > { %3835 = vrot.lane.b32.xlu0 %v4917_v51, %s4120_s27  ;;  %3875 = vrot.lane.b32.xlu2 %v3874_v23, %s4122_s29  ;;  %v2424_v21 = vsel %vm2400_vm5, %v5010_v5, %v3637_v33  ;;  %5961 = vst [vmem:[#allocation5_spill] sm:$0xff] %v5172_v0 }
 0x19f   : > { %v5149_v47 = vsel %vm2367_vm2, %v2343_v58, %v3702_v53  ;;  %v5152_v50 = vsel %vm2367_vm2, %v2344_v28, %v3703_v19  ;;  %v2457_v59 = vsel %vm2433_vm6, %v2424_v21, %v3613_v11  ;;  %v3688_v53 = vunpack.i.h.bf16 %v5118_v17 }
 0x1a0   : > { %v3687_v11 = vunpack.i.l.bf16 %v5118_v17 }
 0x1a3   : > { %3860 = vrot.lane.b32.xlu1 %v4921_v61, %s4121_s28  ;;  %v5168_v48 = vpop.permute.xlu0 %3660 }
 0x1a5   : > { %v3641_v27 = vpop.permute.xlu1 %3640 }
 0x1a6   : > { %v3643_v63 = vunpack.i.h.bf16 %v3641_v27  ;;  %v3642_v6 = vunpack.i.l.bf16 %v3641_v27  ;;  %3870 = vrot.lane.b32.xlu0 %v3874_v23, %s4123_s30  ;;  %3880 = vrot.lane.b32.xlu2 %v3879_v57, %s4124_s8  ;;  %v3716_v27 = vpop.permute.xlu2 %3715 }
 0x1a8   : > { %v5133_v8 = vsel %vm2367_vm2, %v2360_v14, %v3643_v63  ;;  %v2392_v15 = vsel %vm2367_vm2, %v2359_v9, %v3642_v6  ;;  %v1431_v63 = vld [vmem:[#allocation2 + $0x2d9] sm:$0xff]  ;;  %v5170_v6 = vld [vmem:[#allocation2 + $0x87] sm:$0xff] }
 0x1a9   : > { %v5155_v44 = vsel %vm2400_vm5, %v2392_v15, %v3638_v55  ;;  %5960 = vst [vmem:[#allocation4_spill] sm:$0xff] %v5170_v6  ;;  %v3919_v14 = vpack.i.bf16 %v5172_v0, %v5170_v6 }
 0x1ab   : > { %3865 = vrot.lane.b32.xlu1 %v3874_v23, %s4120_s27  ;;  %v3889_v23 = vpack.i.bf16 %v1432_v2, %v1431_v63  ;;  %v3696_v20 = vpop.permute.xlu0 %3695  ;;  %v1401_v63 = vld [vmem:[#allocation2 + $0x1b8] sm:$0xff]  ;;  %v1402_v2 = vld [vmem:[#allocation2 + $0x1c0] sm:$0xff] }
 0x1ac   : > { %v3698_v33 = vunpack.i.h.bf16 %v3696_v20  ;;  %v3697_v19 = vunpack.i.l.bf16 %v3696_v20  ;;  %v3914_v20 = vpack.i.bf16 %v1402_v2, %v1401_v63 }
 0x1ad   : > { %v5159_v45 = vpop.permute.xlu1 %3645 }
 0x1ae   : > { %v3648_v54 = vunpack.i.h.bf16 %v5159_v45  ;;  %3920 = vrot.lane.b32.xlu0 %v3919_v14, %s4124_s8  ;;  %3890 = vrot.lane.b32.xlu2 %v3889_v23, %s4121_s28  ;;  %v5182_v55 = vpop.permute.xlu2 %3730 }
 0x1b0   : > { %v5166_v5 = vsel %vm2565_vm10, %v2554_v49, %v3648_v54 }
 0x1b3   : > { %3885 = vrot.lane.b32.xlu1 %v3879_v57, %s4126_s10 }
 0x1b5   : > { %v3651_v13 = vpop.permute.xlu1 %3650 }
 0x1b6   : > { %v3653_v9 = vunpack.i.h.bf16 %v3651_v13  ;;  %v3652_v15 = vunpack.i.l.bf16 %v3651_v13  ;;  %v3718_v13 = vunpack.i.h.bf16 %v3716_v27  ;;  %3925 = vrot.lane.b32.xlu0 %v3919_v14, %s4126_s10  ;;  %3895 = vrot.lane.b32.xlu2 %v3889_v23, %s4127_s11  ;;  %v1433_v14 = vld [vmem:[#allocation2 + $0x2e9] sm:$0xff] }
 0x1b8   : > { %v2490_v49 = vsel %vm2466_vm7, %v2457_v59, %v3653_v9  ;;  %v2489_v18 = vsel %vm2466_vm7, %v5018_v3, %v3652_v15  ;;  %v3717_v9 = vunpack.i.l.bf16 %v3716_v27 }
 0x1b9   : > { %v2523_v28 = vsel %vm2499_vm8, %v2490_v49, %v3698_v33  ;;  %v2522_v58 = vsel %vm2499_vm8, %v2489_v18, %v3697_v19  ;;  %v5197_v49 = vpop.permute.xlu0 %3710  ;;  %v5199_v18 = vpop.permute.xlu2 %3735  ;;  %v1434_v19 = vld [vmem:[#allocation2 + $0x2f1] sm:$0xff] }
 0x1ba   : > { %v2555_v57 = vsel %vm2532_vm9, %v2522_v58, %v3687_v11  ;;  %v2556_v3 = vsel %vm2532_vm9, %v2523_v28, %v3688_v53  ;;  %v5211_v11 = vld [vmem:[#allocation2 + $0x97] sm:$0xff]  ;;  %v3633_v28 = vunpack.i.h.bf16 %v5111_v42  ;;  %v3632_v58 = vunpack.i.l.bf16 %v5111_v42 }
 0x1bb   : > { %3900 = vrot.lane.b32.xlu1 %v3889_v23, %s4125_s9  ;;  %v3934_v23 = vpack.i.bf16 %v1434_v19, %v1433_v14  ;;  %5962 = vst [vmem:[#allocation6_spill] sm:$0xff] %v5211_v11  ;;  %v3929_v63 = vpack.i.bf16 %v4996_v40, %v5211_v11  ;;  %v3677_v14 = vunpack.i.l.bf16 %v5099_v30 }
 0x1bc   : > { %v2472_v42 = vsel %vm2466_vm7, %v5049_v52, %v3633_v28 }
 0x1bd   : > { %v3681_v21 = vpop.permute.xlu1 %3680 }
 0x1be   : > { %v3683_v59 = vunpack.i.h.bf16 %v3681_v21  ;;  %v3682_v54 = vunpack.i.l.bf16 %v3681_v21  ;;  %3935 = vrot.lane.b32.xlu0 %v3934_v23, %s4121_s28  ;;  %3905 = vrot.lane.b32.xlu2 %v3914_v20, %s4120_s27 }
 0x1c0   : > { %v2362_v17 = vsel %vm1140_vm0, %v4830_v1, %v3683_v59  ;;  %v2361_v15 = vsel %vm1140_vm0, %v4806_v56, %v3682_v54 }
 0x1c1   : > { %v5202_v33 = vsel %vm2367_vm2, %v2361_v15, %v3717_v9  ;;  %v5205_v27 = vsel %vm2367_vm2, %v2362_v17, %v3718_v13  ;;  %v3721_v59 = vpop.permute.xlu0 %3720  ;;  %v5219_v54 = vpop.permute.xlu2 %3755  ;;  %v2471_v9 = vsel %vm2466_vm7, %v5046_v24, %v3632_v58  ;;  %v3663_v17 = vunpack.i.h.bf16 %v5168_v48 }
 0x1c2   : > { %v3723_v2 = vunpack.i.h.bf16 %v3721_v59  ;;  %v3722_v13 = vunpack.i.l.bf16 %v3721_v59  ;;  %v3662_v15 = vunpack.i.l.bf16 %v5168_v48  ;;  %v2504_v28 = vsel %vm2499_vm8, %v2471_v9, %v3677_v14  ;;  %v1435_v9 = vld [vmem:[#allocation2 + $0x2f9] sm:$0xff]  ;;  %v1403_v14 = vld [vmem:[#allocation2 + $0x1c8] sm:$0xff] }
 0x1c3   : > { %3915 = vrot.lane.b32.xlu1 %v3914_v20, %s4122_s29 }
 0x1c4   : > { %v5233_v19 = vsel %vm2565_vm10, %v2555_v57, %v3722_v13 }
 0x1c5   : > { %v5208_v53 = vpop.permute.xlu1 %3690  ;;  %5963 = vst [vmem:[#allocation7_spill] sm:$0xff] %v5233_v19 }
 0x1c6   : > { %v3692_v56 = vunpack.i.l.bf16 %v5208_v53  ;;  %3945 = vrot.lane.b32.xlu0 %v3934_v23, %s4125_s9  ;;  %3910 = vrot.lane.b32.xlu2 %v3914_v20, %s4123_s30 }
 0x1c8   : > { %v2458_v21 = vsel %vm2433_vm6, %v5155_v44, %v3692_v56  ;;  %v3678_v44 = vunpack.i.h.bf16 %v5099_v30  ;;  %v5236_v56 = vsel %vm2565_vm10, %v2556_v3, %v3723_v2 }
 0x1c9   : > { %v5248_v2 = vpop.permute.xlu0 %3725  ;;  %v5250_v13 = vpop.permute.xlu2 %3770 }
 0x1ca   : > { %v2505_v48 = vsel %vm2499_vm8, %v2472_v42, %v3678_v44  ;;  %v3727_v44 = vunpack.i.l.bf16 %v5248_v2 }
 0x1cb   : > { %3930 = vrot.lane.b32.xlu1 %v3929_v63, %s4124_s8  ;;  %v2537_v63 = vsel %vm2532_vm9, %v2504_v28, %v3662_v15  ;;  %v2538_v30 = vsel %vm2532_vm9, %v2505_v48, %v3663_v17  ;;  %v3772_v15 = vunpack.i.l.bf16 %v5250_v13  ;;  %v1404_v17 = vld [vmem:[#allocation2 + $0x1d0] sm:$0xff] }
 0x1cc   : > { %v2491_v20 = vsel %vm2466_vm7, %v2458_v21, %v3727_v44  ;;  %v3949_v48 = vpack.i.bf16 %v1404_v17, %v1403_v14 }
 0x1cd   : > { %v3706_v24 = vpop.permute.xlu1 %3705  ;;  %v2524_v28 = vsel %vm2499_vm8, %v2491_v20, %v3772_v15 }
 0x1ce   : > { %v3708_v58 = vunpack.i.h.bf16 %v3706_v24  ;;  %v3707_v59 = vunpack.i.l.bf16 %v3706_v24  ;;  %v1436_v24 = vld [vmem:[#allocation2 + $0x301] sm:$0xff]  ;;  %3950 = vrot.lane.b32.xlu0 %v3949_v48, %s4120_s27 }
 0x1d0   : > { %v2570_v57 = vsel %vm2565_vm10, %v2537_v63, %v3707_v59  ;;  %v2571_v3 = vsel %vm2565_vm10, %v2538_v30, %v3708_v58  ;;  %v3974_v58 = vpack.i.bf16 %v1436_v24, %v1435_v9 }
 0x1d1   : > { %v2600_v42 = vpack.c.bf16 %v2571_v3, %v2570_v57  ;;  %v5262_v63 = vpop.permute.xlu0 %3745  ;;  %v5264_v30 = vpop.permute.xlu2 %3790  ;;  %v5266_v57 = vld [vmem:[#allocation2 + $0x9f] sm:$0xff] }
 0x1d2   : > { %3975 = vrot.lane.b32.xlu2 %v3974_v58, %s4125_s9  ;;  %5964 = vst [vmem:[#allocation8_spill] sm:$0xff] %v5266_v57 }
 0x1d3   : > { %3940 = vrot.lane.b32.xlu1 %v3934_v23, %s4127_s11  ;;  %3263 = vmatmul.msk.bf16.gmra.mxu1 %vm2654_vm11, %v2600_v42  ;;  %v3979_v23 = vpack.i.bf16 %v5266_v57, %v4830_v1  ;;  %v3984_v42 = vpack.i.bf16 %v5266_v57, %v5211_v11 }
 0x1d5   : > { %v5258_v59 = vpop.permute.xlu1 %3740 }
 0x1d6   : > { %3965 = vrot.lane.b32.xlu0 %v3974_v58, %s4127_s11 }
 0x1d9   : > { %v3766_v3 = vpop.permute.xlu0 %3765  ;;  %v5273_v9 = vpop.permute.xlu2 %3800 }
 0x1da   : > { %3980 = vrot.lane.b32.xlu2 %v3979_v23, %s4124_s8  ;;  %v3802_v14 = vunpack.i.l.bf16 %v5273_v9  ;;  %v3712_v23 = vunpack.i.l.bf16 %v5197_v49  ;;  %v3768_v11 = vunpack.i.h.bf16 %v3766_v3 }
 0x1db   : > { %3955 = vrot.lane.b32.xlu1 %v3974_v58, %s4121_s28  ;;  %v3713_v58 = vunpack.i.h.bf16 %v5197_v49  ;;  %v3767_v49 = vunpack.i.l.bf16 %v3766_v3 }
 0x1dd   : > { %v3751_v21 = vpop.permute.xlu1 %3750 }
 0x1de   : > { %3970 = vrot.lane.b32.xlu0 %v3949_v48, %s4122_s29  ;;  %v3753_v22 = vunpack.i.h.bf16 %v3751_v21  ;;  %v3752_v52 = vunpack.i.l.bf16 %v3751_v21 }
 0x1e1   : > { %v5285_v17 = vpop.permute.xlu0 %3780  ;;  %v3806_v24 = vpop.permute.xlu2 %3805 }
 0x1e2   : > { %3985 = vrot.lane.b32.xlu2 %v3984_v42, %s4126_s10  ;;  %v3738_v42 = vunpack.i.h.bf16 %v5199_v18 }
 0x1e3   : > { %3960 = vrot.lane.b32.xlu1 %v3949_v48, %s4123_s30 }
 0x1e5   : > { %v5278_v44 = vpop.permute.xlu1 %3760 }
 0x1e6   : > { %v3762_v15 = vunpack.i.l.bf16 %v5278_v44  ;;  %3995 = vrot.lane.b32.xlu0 %v4917_v51, %s4123_s30 }
 0x1e8   : > { %v2557_v1 = vsel %vm2532_vm9, %v2524_v28, %v3762_v15  ;;  %v3737_v28 = vunpack.i.l.bf16 %v5199_v18 }
 0x1e9   : > { %v5288_v20 = vsel %vm2565_vm10, %v2557_v1, %v3802_v14  ;;  %v2473_v14 = vsel %vm2466_vm7, %v5106_v38, %v3712_v23  ;;  %v2474_v1 = vsel %vm2466_vm7, %v5109_v41, %v3713_v58  ;;  %v3808_v23 = vunpack.i.h.bf16 %v3806_v24  ;;  %v3786_v58 = vpop.permute.xlu0 %3785  ;;  %v5310_v3 = vpop.permute.xlu2 %3850 }
 0x1ea   : > { %3990 = vrot.lane.b32.xlu2 %v4581_v7, %s4127_s11  ;;  %v2506_v21 = vsel %vm2499_vm8, %v2473_v14, %v3752_v52  ;;  %v2507_v18 = vsel %vm2499_vm8, %v2474_v1, %v3753_v22  ;;  %v3807_v41 = vunpack.i.l.bf16 %v3806_v24  ;;  %v3788_v0 = vunpack.i.h.bf16 %v3786_v58 }
 0x1eb   : > { %4000 = vrot.lane.b32.xlu1 %v4921_v61, %s4127_s11  ;;  %v3787_v19 = vunpack.i.l.bf16 %v3786_v58  ;;  %v2539_v22 = vsel %vm2532_vm9, %v2506_v21, %v3737_v28  ;;  %v3757_v1 = vunpack.i.l.bf16 %v5219_v54 }
 0x1ed   : > { %v3776_v48 = vpop.permute.xlu1 %3775 }
 0x1ee   : > { %v3778_v15 = vunpack.i.h.bf16 %v3776_v48  ;;  %v3777_v57 = vunpack.i.l.bf16 %v3776_v48  ;;  %4005 = vrot.lane.b32.xlu0 %v4541_v43, %s4122_s29 }
 0x1f0   : > { %v2427_v48 = vsel %vm2400_vm5, %v5202_v33, %v3777_v57  ;;  %v2428_v38 = vsel %vm2400_vm5, %v5205_v27, %v3778_v15  ;;  %v2540_v33 = vsel %vm2532_vm9, %v2507_v18, %v3738_v42  ;;  %v2572_v57 = vsel %vm2565_vm10, %v2539_v22, %v3787_v19 }
 0x1f1   : > { %v2460_v35 = vsel %vm2433_vm6, %v2427_v48, %v3767_v49  ;;  %v2461_v6 = vsel %vm2433_vm6, %v2428_v38, %v3768_v11  ;;  %v2573_v24 = vsel %vm2565_vm10, %v2540_v33, %v3788_v0  ;;  %v3758_v11 = vunpack.i.h.bf16 %v5219_v54  ;;  %v4106_v0 = vld [vmem:[#allocation2 + $0xaf] sm:$0xff]  ;;  %v4107_v38 = vld [vmem:[#allocation2 + $0xbf] sm:$0xff] }
 0x1f2   : > { %v2493_v27 = vsel %vm2466_vm7, %v2460_v35, %v3807_v41  ;;  %v2494_v52 = vsel %vm2466_vm7, %v2461_v6, %v3808_v23  ;;  %v2601_v15 = vpack.c.bf16 %v2573_v24, %v2572_v57  ;;  %4015 = vrot.lane.b32.xlu2 %v4581_v7, %s4125_s9  ;;  %v3796_v35 = vpop.permute.xlu0 %3795  ;;  %v4105_v6 = vld [vmem:[#allocation2 + $0xa7] sm:$0xff]  ;;  %v2363_v54 = vsel %vm1140_vm0, %v4941_v26, %v3757_v1  ;;  %v5353_v26 = vld [vmem:[%s5910_s4] ss:$0 sm:$0xff]  ;;  %v1450_v24 = vld [vmem:[#allocation2 + $0x10f] sm:$0xff] }
 0x1f3   : > { %4010 = vrot.lane.b32.xlu1 %v5071_v36, %s4124_s8  ;;  %v5331_v36 = vpop.permute.xlu2 %3855  ;;  %v4024_v19 = vpack.i.bf16 %v4106_v0, %v4105_v6  ;;  %v3798_v42 = vunpack.i.h.bf16 %v3796_v35  ;;  %v3797_v28 = vunpack.i.l.bf16 %v3796_v35  ;;  %v2364_v49 = vsel %vm1140_vm0, %v4946_v31, %v3758_v11  ;;  %v1449_v57 = vld [vmem:[#allocation2 + $0x107] sm:$0xff] }
 0x1f4   : > { %3264 = vmatmul.msk.bf16.gmra.mxu1 %vm2654_vm11, %v2601_v15  ;;  %v4029_v23 = vpack.i.bf16 %v4107_v38, %v4996_v40  ;;  %v3748_v35 = vunpack.i.h.bf16 %v5262_v63  ;;  %v3747_v6 = vunpack.i.l.bf16 %v5262_v63 }
 0x1f5   : > { %v5322_v14 = vpop.permute.xlu1 %3815  ;;  %v5339_v43 = vsel %vm2367_vm2, %v2363_v54, %v3797_v28  ;;  %v5342_v7 = vsel %vm2367_vm2, %v2364_v49, %v3798_v42  ;;  %v4044_v28 = vpack.i.bf16 %v1450_v24, %v1449_v57  ;;  %v1451_v49 = vld [vmem:[#allocation2 + $0x238] sm:$0xff]  ;;  %v3742_v54 = vunpack.i.l.bf16 %v5258_v59 }
 0x1f6   : > { %4020 = vrot.lane.b32.xlu0 %v4917_v51, %s4122_s29  ;;  %v2410_v63 = vsel %vm2400_vm5, %v5152_v50, %v3748_v35  ;;  %v3818_v24 = vunpack.i.h.bf16 %v5322_v14  ;;  %v3853_v35 = vunpack.i.h.bf16 %v5310_v3 }
 0x1f7   : > { %v2716_v21 = vpop.f32.mrf.mxu1 }
 0x1f8   : > { %v2717_v41 = vadd.f32 %v5353_v26, %v2716_v21 }
 0x1fa   : > { %4035 = vrot.lane.b32.xlu2 %v4921_v61, %s4125_s9  ;;  %v5355_v31 = vpop.permute.xlu0 %3810  ;;  %v2796_v15 = vmax.f32 %v2717_v41, 0.0  ;;  %v1454_v41 = vld [vmem:[#allocation2 + $0x371] sm:$0xff] }
 0x1fb   : > { %4025 = vrot.lane.b32.xlu1 %v4024_v19, %s4126_s10  ;;  %v5357_v48 = vpop.permute.xlu2 %3875 }
 0x1fd   : > { %v5344_v18 = vpop.permute.xlu1 %3825 }
 0x1fe   : > { %4040 = vrot.lane.b32.xlu0 %v4604_v29, %s4123_s30 }
 0x1ff   : > { %v2718_v51 = vpop.f32.mrf.mxu1 }
 0x200   : > { %v2719_v61 = vadd.f32 %v5353_v26, %v2718_v51 }
 0x202   : > { %4050 = vrot.lane.b32.xlu2 %v4024_v19, %s4124_s8  ;;  %v2797_v11 = vmax.f32 %v2719_v61, 0.0  ;;  %v5374_v0 = vpop.permute.xlu0 %3820  ;;  %v1452_v19 = vld [vmem:[#allocation2 + $0x240] sm:$0xff] }
 0x203   : > { %4030 = vrot.lane.b32.xlu1 %v4029_v23, %s4126_s10  ;;  %v5376_v42 = vpop.permute.xlu2 %3880  ;;  %v4059_v21 = vpack.i.bf16 %v1452_v19, %v1451_v49  ;;  %v1453_v23 = vld [vmem:[#allocation2 + $0x369] sm:$0xff] }
 0x204   : > { %v2828_v29 = vadd.f32 %v2797_v11, %v2796_v15  ;;  %v3817_v15 = vunpack.i.l.bf16 %v5322_v14 }
 0x205   : > { %v3841_v58 = vpop.permute.xlu1 %3840 }
 0x206   : > { %v3843_v22 = vunpack.i.h.bf16 %v3841_v58  ;;  %v3842_v33 = vunpack.i.l.bf16 %v3841_v58  ;;  %4060 = vrot.lane.b32.xlu0 %v4059_v21, %s4123_s30  ;;  %v3793_v58 = vunpack.i.h.bf16 %v5264_v30 }
 0x208   : > { %v5367_v40 = vsel %vm2499_vm8, %v2493_v27, %v3842_v33  ;;  %v5370_v1 = vsel %vm2499_vm8, %v2494_v52, %v3843_v22  ;;  %v3743_v27 = vunpack.i.h.bf16 %v5258_v59  ;;  %v2409_v52 = vsel %vm2400_vm5, %v5149_v47, %v3747_v6 }
 0x209   : > { %v2442_v59 = vsel %vm2433_vm6, %v2409_v52, %v3742_v54  ;;  %v3792_v47 = vunpack.i.l.bf16 %v5264_v30  ;;  %v4064_v22 = vpack.i.bf16 %v1454_v41, %v1453_v23  ;;  %v3852_v30 = vunpack.i.l.bf16 %v5310_v3  ;;  %v2721_v14 = vpop.f32.mrf.mxu1  ;;  %v1457_v41 = vld [vmem:[#allocation2 + $0x248] sm:$0xff] }
 0x20a   : > { %4055 = vrot.lane.b32.xlu2 %v4635_v46, %s4127_s11  ;;  %v2443_v51 = vsel %vm2433_vm6, %v2410_v63, %v3743_v27  ;;  %v3831_v61 = vpop.permute.xlu0 %3830  ;;  %v2722_v23 = vadd.f32 %v5353_v26, %v2721_v14  ;;  %v3782_v14 = vunpack.i.l.bf16 %v5285_v17 }
 0x20b   : > { %4045 = vrot.lane.b32.xlu1 %v4044_v28, %s4126_s10  ;;  %v5394_v50 = vpop.permute.xlu2 %3890  ;;  %v3833_v33 = vunpack.i.h.bf16 %v3831_v61  ;;  %v3832_v57 = vunpack.i.l.bf16 %v3831_v61  ;;  %v2475_v46 = vsel %vm2466_vm7, %v2442_v59, %v3792_v47  ;;  %v2476_v11 = vsel %vm2466_vm7, %v2443_v51, %v3793_v58  ;;  %v1458_v51 = vld [vmem:[#allocation2 + $0x250] sm:$0xff] }
 0x20c   : > { %v2798_v59 = vmax.f32 %v2722_v23, 0.0 }
 0x20d   : > { %v5385_v38 = vpop.permute.xlu1 %3845  ;;  %v2508_v6 = vsel %vm2499_vm8, %v2475_v46, %v3832_v57  ;;  %v2509_v49 = vsel %vm2499_vm8, %v2476_v11, %v3833_v33  ;;  %v1455_v57 = vld [vmem:[#allocation2 + $0x117] sm:$0xff] }
 0x20e   : > { %v2541_v27 = vsel %vm2532_vm9, %v2508_v6, %v3817_v15  ;;  %v2542_v54 = vsel %vm2532_vm9, %v2509_v49, %v3818_v24  ;;  %4075 = vrot.lane.b32.xlu0 %v4059_v21, %s4122_s29  ;;  %v1456_v24 = vld [vmem:[#allocation2 + $0x11f] sm:$0xff]  ;;  %v2829_v11 = vadd.f32 %v2828_v29, %v2798_v59  ;;  %v4089_v21 = vpack.i.bf16 %v1458_v51, %v1457_v41 }
 0x20f   : > { %v2574_v52 = vsel %vm2565_vm10, %v2541_v27, %v3852_v30  ;;  %v2575_v63 = vsel %vm2565_vm10, %v2542_v54, %v3853_v35  ;;  %v4084_v30 = vpack.i.bf16 %v1456_v24, %v1455_v57  ;;  %v1459_v6 = vld [vmem:[#allocation2 + $0x379] sm:$0xff]  ;;  %v1460_v49 = vld [vmem:[#allocation2 + $0x381] sm:$0xff]  ;;  %v3732_v27 = vunpack.i.l.bf16 %v5182_v55 }
 0x210   : > { %v2602_v3 = vpack.c.bf16 %v2575_v63, %v2574_v52  ;;  %v3828_v52 = vunpack.i.h.bf16 %v5344_v18  ;;  %v3827_v63 = vunpack.i.l.bf16 %v5344_v18  ;;  %v3822_v41 = vunpack.i.l.bf16 %v5374_v0  ;;  %v4108_v51 = vld [vmem:[#allocation2 + $0x5f] sm:$0xff] }
 0x212   : > { %4070 = vrot.lane.b32.xlu2 %v4044_v28, %s4124_s8  ;;  %v3836_v58 = vpop.permute.xlu0 %3835  ;;  %3265 = vmatmul.msk.bf16.gmra.mxu1 %vm2654_vm11, %v2602_v3  ;;  %v3823_v3 = vunpack.i.h.bf16 %v5374_v0 }
 0x213   : > { %4065 = vrot.lane.b32.xlu1 %v4064_v22, %s4127_s11  ;;  %v5412_v47 = vpop.permute.xlu2 %3895  ;;  %v3838_v15 = vunpack.i.h.bf16 %v3836_v58  ;;  %v3837_v46 = vunpack.i.l.bf16 %v3836_v58 }
 0x215   : > { %v3861_v19 = vpop.permute.xlu1 %3860  ;;  %v2366_v28 = vsel %vm1140_vm0, %v5057_v12, %v3838_v15  ;;  %v2365_v35 = vsel %vm1140_vm0, %v5055_v10, %v3837_v46  ;;  %v3783_v12 = vunpack.i.h.bf16 %v5285_v17  ;;  %v2723_v10 = vpop.f32.mrf.mxu1  ;;  %v4109_v17 = vld [vmem:[#allocation2 + $0x57] sm:$0xff] }
 0x216   : > { %v3863_v61 = vunpack.i.h.bf16 %v3861_v19  ;;  %v3862_v33 = vunpack.i.l.bf16 %v3861_v19  ;;  %v3733_v19 = vunpack.i.h.bf16 %v5182_v55  ;;  %v2724_v23 = vadd.f32 %v5353_v26, %v2723_v10  ;;  %4090 = vrot.lane.b32.xlu0 %v4089_v21, %s4123_s30 }
 0x217   : > { %v4094_v55 = vpack.i.bf16 %v1460_v49, %v1459_v6  ;;  %v2345_v58 = vsel %vm1140_vm0, %v4109_v17, %v3732_v27 }
 0x218   : > { %v5423_v54 = vsel %vm2367_vm2, %v2366_v28, %v3863_v61  ;;  %v5426_v29 = vsel %vm2367_vm2, %v2365_v35, %v3862_v33  ;;  %v2346_v59 = vsel %vm1140_vm0, %v4108_v51, %v3733_v19  ;;  %v2799_v61 = vmax.f32 %v2724_v23, 0.0 }
 0x219   : > { %v2378_v57 = vsel %vm2367_vm2, %v2345_v58, %v3782_v14  ;;  %v2379_v24 = vsel %vm2367_vm2, %v2346_v59, %v3783_v12  ;;  %v3858_v35 = vunpack.i.h.bf16 %v5331_v36  ;;  %v3897_v23 = vunpack.i.l.bf16 %v5412_v47 }
 0x21a   : > { %4085 = vrot.lane.b32.xlu2 %v4084_v30, %s4126_s10  ;;  %v3871_v33 = vpop.permute.xlu0 %3870  ;;  %v2412_v15 = vsel %vm2400_vm5, %v2379_v24, %v3828_v52  ;;  %v2411_v46 = vsel %vm2400_vm5, %v2378_v57, %v3827_v63  ;;  %v5447_v21 = vadd.f32 %v2829_v11, %v2799_v61  ;;  %v3857_v30 = vunpack.i.l.bf16 %v5331_v36 }
 0x21b   : > { %4080 = vrot.lane.b32.xlu1 %v4064_v22, %s4125_s9  ;;  %v5441_v18 = vpop.permute.xlu2 %3905  ;;  %v2444_v0 = vsel %vm2433_vm6, %v2411_v46, %v3822_v41  ;;  %v2445_v28 = vsel %vm2433_vm6, %v2412_v15, %v3823_v3  ;;  %v3873_v27 = vunpack.i.h.bf16 %v3871_v33  ;;  %v3872_v12 = vunpack.i.l.bf16 %v3871_v33 }
 0x21c   : > { %v2477_v14 = vsel %vm2466_vm7, %v2444_v0, %v3857_v30  ;;  %v2478_v11 = vsel %vm2466_vm7, %v2445_v28, %v3858_v35  ;;  %v3898_v63 = vunpack.i.h.bf16 %v5412_v47  ;;  %v3813_v47 = vunpack.i.h.bf16 %v5355_v31 }
 0x21d   : > { %v5428_v22 = vpop.permute.xlu1 %3865  ;;  %v3812_v57 = vunpack.i.l.bf16 %v5355_v31  ;;  %v3848_v24 = vunpack.i.h.bf16 %v5385_v38  ;;  %v3847_v15 = vunpack.i.l.bf16 %v5385_v38  ;;  %v3883_v31 = vunpack.i.h.bf16 %v5376_v42 }
 0x21e   : > { %v2348_v0 = vsel %vm1140_vm0, %v5015_v60, %v3813_v47  ;;  %v3882_v38 = vunpack.i.l.bf16 %v5376_v42  ;;  %v3693_v60 = vunpack.i.h.bf16 %v5208_v53  ;;  %v3877_v42 = vunpack.i.l.bf16 %v5357_v48 }
 0x21f   : > { %v2347_v28 = vsel %vm1140_vm0, %v5013_v16, %v3812_v57  ;;  %v2381_v35 = vsel %vm2367_vm2, %v2348_v0, %v3848_v24  ;;  %v3728_v16 = vunpack.i.h.bf16 %v5248_v2  ;;  %v3572_v2 = vunpack.i.l.bf16 %v4911_v37 }
 0x220   : > { %v2380_v30 = vsel %vm2367_vm2, %v2347_v28, %v3847_v15  ;;  %v3617_v0 = vunpack.i.l.bf16 %v5052_v25  ;;  %v3607_v28 = vunpack.i.l.bf16 %v5116_v39 }
 0x223   : > { %4095 = vrot.lane.b32.xlu1 %v4094_v55, %s4127_s11  ;;  %v5460_v55 = vpop.permute.xlu0 %3920  ;;  %v5462_v36 = vpop.permute.xlu2 %3910 }
 0x225   : > { %v3886_v6 = vpop.permute.xlu1 %3885 }
 0x226   : > { %v3888_v49 = vunpack.i.h.bf16 %v3886_v6  ;;  %v3887_v19 = vunpack.i.l.bf16 %v3886_v6 }
 0x228   : > { %v2510_v10 = vsel %vm2499_vm8, %v2477_v14, %v3887_v19  ;;  %v2511_v52 = vsel %vm2499_vm8, %v2478_v11, %v3888_v49  ;;  %v3878_v14 = vunpack.i.h.bf16 %v5357_v48  ;;  %v2414_v11 = vsel %vm2400_vm5, %v2381_v35, %v3883_v31 }
 0x229   : > { %v2543_v3 = vsel %vm2532_vm9, %v2510_v10, %v3872_v12  ;;  %v2544_v41 = vsel %vm2532_vm9, %v2511_v52, %v3873_v27  ;;  %v3542_v27 = vunpack.i.l.bf16 %v4909_v32  ;;  %v3773_v12 = vunpack.i.h.bf16 %v5250_v13 }
 0x22a   : > { %v2576_v51 = vsel %vm2565_vm10, %v2543_v3, %v3897_v23  ;;  %v2577_v59 = vsel %vm2565_vm10, %v2544_v41, %v3898_v63  ;;  %v2413_v10 = vsel %vm2400_vm5, %v2380_v30, %v3882_v38  ;;  %v3763_v13 = vunpack.i.h.bf16 %v5278_v44 }
 0x22b   : > { %v2603_v17 = vpack.c.bf16 %v2577_v59, %v2576_v51  ;;  %v3926_v61 = vpop.permute.xlu0 %3925  ;;  %v3803_v51 = vunpack.i.h.bf16 %v5273_v9  ;;  %v2447_v48 = vsel %vm2433_vm6, %v2414_v11, %v3878_v14  ;;  %v3647_v35 = vunpack.i.l.bf16 %v5159_v45 }
 0x22c   : > { %v5469_v33 = vpop.permute.xlu2 %3975 }
 0x22d   : > { %v3901_v58 = vpop.permute.xlu1 %3900  ;;  %3266 = vmatmul.msk.bf16.gmra.mxu1 %vm2654_vm11, %v2603_v17  ;;  %v3928_v17 = vunpack.i.h.bf16 %v3926_v61 }
 0x22e   : > { %v3903_v63 = vunpack.i.h.bf16 %v3901_v58  ;;  %v3902_v23 = vunpack.i.l.bf16 %v3901_v58  ;;  %v3927_v58 = vunpack.i.l.bf16 %v3926_v61 }
 0x230   : > { %v2480_v57 = vsel %vm2466_vm7, %v2447_v48, %v3903_v63 }
 0x231   : > { %v2513_v31 = vsel %vm2499_vm8, %v2480_v57, %v3928_v17 }
 0x233   : > { %v5483_v6 = vpop.permute.xlu0 %3935 }
 0x234   : > { %v5485_v49 = vpop.permute.xlu2 %3980 }
 0x235   : > { %v5475_v46 = vpop.permute.xlu1 %3915  ;;  %v3982_v19 = vunpack.i.l.bf16 %v5485_v49 }
 0x236   : > { %v3918_v48 = vunpack.i.h.bf16 %v5475_v46 }
 0x237   : > { %v2426_v52 = vsel %vm2400_vm5, %v5133_v8, %v3982_v19  ;;  %v2446_v8 = vsel %vm2433_vm6, %v2413_v10, %v3877_v42  ;;  %v3913_v19 = vunpack.i.h.bf16 %v5462_v36 }
 0x238   : > { %v2459_v32 = vsel %vm2433_vm6, %v2426_v52, %v3693_v60  ;;  %v2479_v44 = vsel %vm2466_vm7, %v2446_v8, %v3902_v23  ;;  %v3917_v8 = vunpack.i.l.bf16 %v5475_v46 }
 0x239   : > { %v2492_v3 = vsel %vm2466_vm7, %v2459_v32, %v3728_v16  ;;  %v2512_v30 = vsel %vm2499_vm8, %v2479_v44, %v3927_v58  ;;  %v2546_v10 = vsel %vm2532_vm9, %v2513_v31, %v3913_v19  ;;  %v3868_v32 = vunpack.i.h.bf16 %v5428_v22 }
 0x23a   : > { %v2525_v59 = vsel %vm2499_vm8, %v2492_v3, %v3773_v12  ;;  %v3892_v3 = vunpack.i.l.bf16 %v5394_v50 }
 0x23b   : > { %v2558_v37 = vsel %vm2532_vm9, %v2525_v59, %v3763_v13  ;;  %v3946_v24 = vpop.permute.xlu0 %3945 }
 0x23c   : > { %v5518_v15 = vsel %vm2565_vm10, %v2558_v37, %v3803_v51  ;;  %v3986_v14 = vpop.permute.xlu2 %3985  ;;  %v3923_v51 = vunpack.i.h.bf16 %v5460_v55  ;;  %v3947_v17 = vunpack.i.l.bf16 %v3946_v24 }
 0x23d   : > { %v5501_v53 = vpop.permute.xlu1 %3930 }
 0x23e   : > { %v3933_v41 = vunpack.i.h.bf16 %v5501_v53 }
 0x240   : > { %v2421_v47 = vsel %vm2400_vm5, %v4856_v34, %v3933_v41  ;;  %v2610_v34 = vpack.c.bf16 %v5518_v15, %v5288_v20  ;;  %v2350_v41 = vsel %vm1140_vm0, %v5138_v62, %v3868_v32 }
 0x241   : > { %v2454_v9 = vsel %vm2433_vm6, %v2421_v47, %v3542_v27  ;;  %v3912_v27 = vunpack.i.l.bf16 %v5462_v36  ;;  %v3867_v36 = vunpack.i.l.bf16 %v5428_v22  ;;  %v3893_v22 = vunpack.i.h.bf16 %v5394_v50 }
 0x242   : > { %v2487_v61 = vsel %vm2466_vm7, %v2454_v9, %v3572_v2  ;;  %v3922_v2 = vunpack.i.l.bf16 %v5460_v55  ;;  %v3988_v9 = vunpack.i.h.bf16 %v3986_v14 }
 0x243   : > { %v2520_v38 = vsel %vm2499_vm8, %v2487_v61, %v3617_v0  ;;  %v2545_v11 = vsel %vm2532_vm9, %v2512_v30, %v3912_v27  ;;  %v5539_v63 = vpop.permute.xlu0 %3950  ;;  %v2383_v47 = vsel %vm2367_vm2, %v2350_v41, %v3893_v22  ;;  %v3987_v0 = vunpack.i.l.bf16 %v3986_v14 }
 0x244   : > { %v2553_v39 = vsel %vm2532_vm9, %v2520_v38, %v3607_v28  ;;  %v5559_v44 = vpop.permute.xlu2 %3990  ;;  %v2416_v57 = vsel %vm2400_vm5, %v2383_v47, %v3923_v51  ;;  %v3938_v22 = vunpack.i.h.bf16 %v5483_v6 }
 0x245   : > { %v3941_v25 = vpop.permute.xlu1 %3940  ;;  %v2586_v12 = vsel %vm2565_vm10, %v2553_v39, %v3647_v35  ;;  %v2449_v46 = vsel %vm2433_vm6, %v2416_v57, %v3918_v48  ;;  %v3932_v57 = vunpack.i.l.bf16 %v5501_v53 }
 0x246   : > { %v3943_v60 = vunpack.i.h.bf16 %v3941_v25  ;;  %v3942_v16 = vunpack.i.l.bf16 %v3941_v25  ;;  %v2608_v45 = vpack.c.bf16 %v5166_v5, %v2586_v12  ;;  %v2349_v5 = vsel %vm1140_vm0, %v5136_v4, %v3867_v36 }
 0x247   : > { %v2382_v59 = vsel %vm2367_vm2, %v2349_v5, %v3892_v3  ;;  %v3948_v4 = vunpack.i.h.bf16 %v3946_v24 }
 0x248   : > { %v2578_v52 = vsel %vm2565_vm10, %v2545_v11, %v3942_v16  ;;  %v2579_v42 = vsel %vm2565_vm10, %v2546_v10, %v3943_v60  ;;  %3271 = vmatmul.msk.bf16.vlgmr.msra.gmra.mxu2 %vm2654_vm11, %v2608_v45  ;;  %v2415_v37 = vsel %vm2400_vm5, %v2382_v59, %v3922_v2  ;;  %v5965_v11 = vld [vmem:[#allocation7_spill] sm:$0xff] }
 0x249   : > { %v2604_v23 = vpack.c.bf16 %v2579_v42, %v2578_v52  ;;  %v2448_v50 = vsel %vm2433_vm6, %v2415_v37, %v3917_v8  ;;  %v2482_v61 = vsel %vm2466_vm7, %v2449_v46, %v3948_v4  ;;  %v3908_v8 = vunpack.i.h.bf16 %v5441_v18 }
 0x24a   : > { %v2481_v24 = vsel %vm2466_vm7, %v2448_v50, %v3947_v17  ;;  %v2515_v27 = vsel %vm2499_vm8, %v2482_v61, %v3988_v9  ;;  %v3907_v4 = vunpack.i.l.bf16 %v5441_v18  ;;  %v3983_v18 = vunpack.i.h.bf16 %v5485_v49 }
 0x24b   : > { %3267 = vmatmul.msk.bf16.gmra.mxu1 %vm2654_vm11, %v2604_v23  ;;  %v3966_v62 = vpop.permute.xlu0 %3965  ;;  %v2514_v19 = vsel %vm2499_vm8, %v2481_v24, %v3987_v0  ;;  %v5968_v0 = vld [vmem:[#allocation4_spill] sm:$0xff] }
 0x24c   : > { %v3968_v25 = vunpack.i.h.bf16 %v3966_v62  ;;  %v3967_v39 = vunpack.i.l.bf16 %v3966_v62  ;;  %v5579_v42 = vpop.permute.xlu2 %4015  ;;  %v3937_v62 = vunpack.i.l.bf16 %v5483_v6 }
 0x24d   : > { %v5547_v13 = vpop.permute.xlu1 %3955 }
 0x250   : > { %v2726_v58 = vpop.f32.mrf.mxu1 }
 0x251   : > { %v2727_v55 = vadd.f32 %v5353_v26, %v2726_v58 }
 0x253   : > { %v2800_v28 = vmax.f32 %v2727_v55, 0.0  ;;  %v3971_v14 = vpop.permute.xlu0 %3970  ;;  %v5967_v55 = vld [vmem:[#allocation5_spill] sm:$0xff] }
 0x254   : > { %v5591_v17 = vpop.permute.xlu2 %4035  ;;  %v3973_v46 = vunpack.i.h.bf16 %v3971_v14  ;;  %v3972_v9 = vunpack.i.l.bf16 %v3971_v14  ;;  %v3993_v14 = vunpack.i.h.bf16 %v5559_v44 }
 0x255   : > { %v2831_v35 = vadd.f32 %v5447_v21, %v2800_v28  ;;  %v3961_v30 = vpop.permute.xlu1 %3960  ;;  %v5966_v21 = vpack.c.bf16 %v5236_v56, %v5965_v11  ;;  %v2351_v28 = vsel %vm1140_vm0, %v5968_v0, %v3907_v4  ;;  %v3992_v11 = vunpack.i.l.bf16 %v5559_v44 }
 0x256   : > { %v3963_v31 = vunpack.i.h.bf16 %v3961_v30  ;;  %v3962_v38 = vunpack.i.l.bf16 %v3961_v30  ;;  %v2384_v6 = vsel %vm2367_vm2, %v2351_v28, %v3937_v62  ;;  %v3978_v30 = vunpack.i.h.bf16 %v5469_v33 }
 0x257   : > { %v2417_v49 = vsel %vm2400_vm5, %v2384_v6, %v3932_v57  ;;  %v4018_v0 = vunpack.i.h.bf16 %v5579_v42 }
 0x258   : > { %v2547_v60 = vsel %vm2532_vm9, %v2514_v19, %v3962_v38  ;;  %v2548_v16 = vsel %vm2532_vm9, %v2515_v27, %v3963_v31  ;;  %v2728_v12 = vpop.f32.mrf.mxu1  ;;  %3272 = vmatmul.msk.bf16.gmra.mxu2 %vm2654_vm11, %v5966_v21  ;;  %v2450_v53 = vsel %vm2433_vm6, %v2417_v49, %v3972_v9  ;;  %v3977_v31 = vunpack.i.l.bf16 %v5469_v33  ;;  %v5969_v19 = vld [vmem:[#allocation3_spill] sm:$0xff] }
 0x259   : > { %v2729_v45 = vadd.f32 %v5353_v26, %v2728_v12  ;;  %v2580_v10 = vsel %vm2565_vm10, %v2547_v60, %v3967_v39  ;;  %v2581_v52 = vsel %vm2565_vm10, %v2548_v16, %v3968_v25  ;;  %v3493_v27 = vunpack.i.h.bf16 %v5969_v19 }
 0x25a   : > { %v2605_v23 = vpack.c.bf16 %v2581_v52, %v2580_v10  ;;  %v3953_v25 = vunpack.i.h.bf16 %v5539_v63  ;;  %v2483_v16 = vsel %vm2466_vm7, %v2450_v53, %v3977_v31  ;;  %v3952_v12 = vunpack.i.l.bf16 %v5539_v63 }
 0x25b   : > { %v2801_v36 = vmax.f32 %v2729_v45, 0.0  ;;  %v3996_v2 = vpop.permute.xlu0 %3995  ;;  %v3957_v21 = vunpack.i.l.bf16 %v5547_v13 }
 0x25c   : > { %3268 = vmatmul.msk.bf16.gmra.mxu1 %vm2654_vm11, %v2605_v23  ;;  %v3998_v51 = vunpack.i.h.bf16 %v3996_v2  ;;  %v3997_v56 = vunpack.i.l.bf16 %v3996_v2  ;;  %v4051_v39 = vpop.permute.xlu2 %4050  ;;  %v3958_v23 = vunpack.i.h.bf16 %v5547_v13 }
 0x25d   : > { %v5581_v32 = vadd.f32 %v2831_v35, %v2801_v36  ;;  %v4001_v5 = vpop.permute.xlu1 %4000  ;;  %v4053_v2 = vunpack.i.h.bf16 %v4051_v39 }
 0x25e   : > { %v4003_v3 = vunpack.i.h.bf16 %v4001_v5  ;;  %v4002_v41 = vunpack.i.l.bf16 %v4001_v5  ;;  %v2559_v48 = vsel %vm2532_vm9, %v5367_v40, %v3997_v56  ;;  %v2560_v59 = vsel %vm2532_vm9, %v5370_v1, %v3998_v51  ;;  %v5970_v51 = vld [vmem:[#allocation6_spill] sm:$0xff] }
 0x25f   : > { %v2352_v1 = vsel %vm1140_vm0, %v5967_v55, %v3908_v8  ;;  %v4052_v5 = vunpack.i.l.bf16 %v4051_v39  ;;  %v2353_v56 = vsel %vm1140_vm0, %v5970_v51, %v3952_v12  ;;  %v5971_v8 = vld [vmem:[#allocation8_spill] sm:$0xff]  ;;  %v4017_v55 = vunpack.i.l.bf16 %v5579_v42 }
 0x260   : > { %v5596_v47 = vsel %vm2565_vm10, %v2559_v48, %v4002_v41  ;;  %v5599_v37 = vsel %vm2565_vm10, %v2560_v59, %v4003_v3  ;;  %v2385_v50 = vsel %vm2367_vm2, %v2352_v1, %v3938_v22  ;;  %v2354_v22 = vsel %vm1140_vm0, %v5971_v8, %v3953_v25 }
 0x261   : > { %v2611_v40 = vpack.c.bf16 %v5599_v37, %v5596_v47  ;;  %v2418_v61 = vsel %vm2400_vm5, %v2385_v50, %v3983_v18  ;;  %v2386_v48 = vsel %vm2367_vm2, %v2353_v56, %v3957_v21  ;;  %v2387_v13 = vsel %vm2367_vm2, %v2354_v22, %v3958_v23 }
 0x262   : > { %v2451_v35 = vsel %vm2433_vm6, %v2418_v61, %v3973_v46  ;;  %v2419_v37 = vsel %vm2400_vm5, %v2386_v48, %v4052_v5  ;;  %v2420_v1 = vsel %vm2400_vm5, %v2387_v13, %v4053_v2  ;;  %vm3079_vm0 = vcmask 1040384  }
 0x263   : > { %v4006_v24 = vpop.permute.xlu0 %4005  ;;  %v2484_v60 = vsel %vm2466_vm7, %v2451_v35, %v3978_v30 }
 0x264   : > { %v4007_v63 = vunpack.i.l.bf16 %v4006_v24  ;;  %v4008_v44 = vunpack.i.h.bf16 %v4006_v24  ;;  %v4056_v53 = vpop.permute.xlu2 %4055 }
 0x265   : > { %v5593_v58 = vpop.permute.xlu1 %4010  ;;  %v4057_v25 = vunpack.i.l.bf16 %v4056_v53 }
 0x266   : > { %v2452_v18 = vsel %vm2433_vm6, %v2419_v37, %v4007_v63  ;;  %v2453_v57 = vsel %vm2433_vm6, %v2420_v1, %v4008_v44  ;;  %v4013_v24 = vunpack.i.h.bf16 %v5593_v58  ;;  %v4012_v6 = vunpack.i.l.bf16 %v5593_v58 }
 0x267   : > { %v2485_v49 = vsel %vm2466_vm7, %v2452_v18, %v4017_v55 }
 0x268   : > { %3273 = vmatmul.msk.bf16.gmra.mxu2 %vm2654_vm11, %v2610_v34  ;;  %v3492_v34 = vunpack.i.l.bf16 %v5969_v19  ;;  %v2430_v58 = vsel %vm2400_vm5, %v5342_v7, %v4013_v24  ;;  %v4037_v7 = vunpack.i.l.bf16 %v5591_v17 }
 0x26b   : > { %v4021_v10 = vpop.permute.xlu0 %4020 }
 0x26c   : > { %v4022_v35 = vunpack.i.l.bf16 %v4021_v10  ;;  %v4023_v19 = vunpack.i.h.bf16 %v4021_v10 }
 0x26d   : > { %v4026_v38 = vpop.permute.xlu1 %4025 }
 0x26e   : > { %v4028_v20 = vunpack.i.h.bf16 %v4026_v38  ;;  %v4027_v15 = vunpack.i.l.bf16 %v4026_v38  ;;  %v2486_v38 = vsel %vm2466_vm7, %v2453_v57, %v4018_v0  ;;  %v2463_v12 = vsel %vm2433_vm6, %v2430_v58, %v4023_v19 }
 0x270   : > { %v2517_v33 = vsel %vm2499_vm8, %v2484_v60, %v4028_v20  ;;  %v2516_v45 = vsel %vm2499_vm8, %v2483_v16, %v4027_v15  ;;  %v4058_v15 = vunpack.i.h.bf16 %v4056_v53 }
 0x271   : > { %v2549_v52 = vsel %vm2532_vm9, %v2516_v45, %v3492_v34  ;;  %v2550_v36 = vsel %vm2532_vm9, %v2517_v33, %v3493_v27  ;;  %v2731_v59 = vpop.f32.mrf.mxu1 }
 0x272   : > { %v2582_v3 = vsel %vm2565_vm10, %v2549_v52, %v3992_v11  ;;  %v2583_v41 = vsel %vm2565_vm10, %v2550_v36, %v3993_v14  ;;  %v2732_v62 = vadd.f32 %v5353_v26, %v2731_v59  ;;  %v4038_v11 = vunpack.i.h.bf16 %v5591_v17 }
 0x273   : > { %v2606_v47 = vpack.c.bf16 %v2583_v41, %v2582_v3  ;;  %v4041_v28 = vpop.permute.xlu0 %4040  ;;  %v4071_v41 = vpop.permute.xlu2 %4070 }
 0x274   : > { %v2802_v50 = vmax.f32 %v2732_v62, 0.0  ;;  %v4043_v30 = vunpack.i.h.bf16 %v4041_v28  ;;  %v4042_v31 = vunpack.i.l.bf16 %v4041_v28  ;;  %v2496_v2 = vsel %vm2466_vm7, %v2463_v12, %v4038_v11  ;;  %v3426_v12 = vld [vmem:[%s5911_s5 + $0xb0] sm:$0xf0] }
 0x275   : > { %v4031_v4 = vpop.permute.xlu1 %4030  ;;  %3269 = vmatmul.msk.bf16.gmra.mxu1 %vm2654_vm11, %v2606_v47  ;;  %v4073_v13 = vunpack.i.h.bf16 %v4071_v41  ;;  %v4072_v37 = vunpack.i.l.bf16 %v4071_v41  ;;  %v3339_v41 = vld [vmem:[%s5911_s5 + $0x78] sm:$0xf] }
 0x276   : > { %v4033_v46 = vunpack.i.h.bf16 %v4031_v4  ;;  %v4032_v9 = vunpack.i.l.bf16 %v4031_v4  ;;  %v2833_v61 = vadd.f32 %v5581_v32, %v2802_v50  ;;  %v2429_v32 = vsel %vm2400_vm5, %v5339_v43, %v4012_v6 }
 0x277   : > { %v2462_v39 = vsel %vm2433_vm6, %v2429_v32, %v4022_v35  ;;  %v2431_v50 = vsel %vm2400_vm5, %v5426_v29, %v4072_v37  ;;  %v3416_v37 = vld [vmem:[%s5911_s5 + $0x64] sm:$0xf] }
 0x278   : > { %3274 = vmatmul.msk.bf16.gmra.mxu2 %vm2654_vm11, %v2611_v40  ;;  %v2518_v42 = vsel %vm2499_vm8, %v2485_v49, %v4032_v9  ;;  %v2519_v27 = vsel %vm2499_vm8, %v2486_v38, %v4033_v46  ;;  %v2495_v5 = vsel %vm2466_vm7, %v2462_v39, %v4037_v7  ;;  %v2432_v46 = vsel %vm2400_vm5, %v5423_v54, %v4073_v13 }
 0x279   : > { %v2733_v40 = vpop.f32.mrf.mxu1  ;;  %v2551_v60 = vsel %vm2532_vm9, %v2518_v42, %v4042_v31  ;;  %v2552_v16 = vsel %vm2532_vm9, %v2519_v27, %v4043_v30 }
 0x27a   : > { %v2734_v34 = vadd.f32 %v5353_v26, %v2733_v40  ;;  %v2584_v10 = vsel %vm2565_vm10, %v2551_v60, %v4057_v25  ;;  %v2585_v52 = vsel %vm2565_vm10, %v2552_v16, %v4058_v15  ;;  %v3363_v16 = vld [vmem:[%s5911_s5 + $0xa8] sm:$0xf] }
 0x27b   : > { %v4061_v21 = vpop.permute.xlu0 %4060  ;;  %v2607_v56 = vpack.c.bf16 %v2585_v52, %v2584_v10  ;;  %v4086_v9 = vpop.permute.xlu2 %4085 }
 0x27c   : > { %v2803_v14 = vmax.f32 %v2734_v34, 0.0  ;;  %v4063_v36 = vunpack.i.h.bf16 %v4061_v21  ;;  %v4062_v23 = vunpack.i.l.bf16 %v4061_v21  ;;  %v4088_v49 = vunpack.i.h.bf16 %v4086_v9  ;;  %v3351_v21 = vld [vmem:[%s5911_s5 + $0x90] sm:$0xf] }
 0x27d   : > { %v4046_v20 = vpop.permute.xlu1 %4045  ;;  %v4087_v53 = vunpack.i.l.bf16 %v4086_v9 }
 0x27e   : > { %v4048_v33 = vunpack.i.h.bf16 %v4046_v20  ;;  %v4047_v45 = vunpack.i.l.bf16 %v4046_v20  ;;  %v2834_v43 = vadd.f32 %v2833_v61, %v2803_v14  ;;  %v3425_v14 = vld [vmem:[%s5911_s5 + $0xac] sm:$0xf] }
 0x280   : > { %v2528_v63 = vsel %vm2499_vm8, %v2495_v5, %v4047_v45  ;;  %v2529_v3 = vsel %vm2499_vm8, %v2496_v2, %v4048_v33  ;;  %v3364_v33 = vor.u32 %v3426_v12, %v3363_v16  ;;  %v3365_v45 = vld [vmem:[%s5911_s5 + $0xb4] sm:$0xf0]  ;;  %v3353_v5 = vld [vmem:[%s5911_s5 + $0x9c] sm:$0xf0] }
 0x281   : > { %v2561_v8 = vsel %vm2532_vm9, %v2528_v63, %v4062_v23  ;;  %v2562_v22 = vsel %vm2532_vm9, %v2529_v3, %v4063_v36  ;;  %v3368_v11 = vor.u32 %v3425_v14, %v3365_v45  ;;  %v3422_v23 = vld [vmem:[%s5911_s5 + $0x94] sm:$0xf]  ;;  %v3411_v45 = vld [vmem:[%s5911_s5 + $0x38] sm:$0xf0] }
 0x282   : > { %3035 = vmatpush.bf16.msrb.mxu2 %v3364_v33  ;;  %v3356_v2 = vor.u32 %v3422_v23, %v3353_v5  ;;  %v3303_v33 = vld [vmem:[%s5911_s5 + $0x30] sm:$0xf]  ;;  %v3305_v23 = vld [vmem:[%s5911_s5 + $0x3c] sm:$0xf0] }
 0x283   : > { %v4076_v4 = vpop.permute.xlu0 %4075  ;;  %3048 = vmatpush.bf16.msrb.mxu3 %v3368_v11 }
 0x284   : > { %v4078_v62 = vunpack.i.h.bf16 %v4076_v4  ;;  %v4077_v55 = vunpack.i.l.bf16 %v4076_v4 }
 0x285   : > { %v4066_v51 = vpop.permute.xlu1 %4065  ;;  %3270 = vmatmul.msk.bf16.gmra.mxu1 %vm2654_vm11, %v2607_v56  ;;  %v3419_v56 = vld [vmem:[%s5911_s5 + $0x7c] sm:$0xf] }
 0x286   : > { %v4068_v17 = vunpack.i.h.bf16 %v4066_v51  ;;  %v4067_v44 = vunpack.i.l.bf16 %v4066_v51  ;;  %v2464_v0 = vsel %vm2433_vm6, %v2431_v50, %v4077_v55  ;;  %v2465_v28 = vsel %vm2433_vm6, %v2432_v46, %v4078_v62  ;;  %v3420_v51 = vld [vmem:[%s5911_s5 + $0x80] sm:$0xf0]  ;;  %v3329_v62 = vld [vmem:[%s5911_s5 + $0x6c] sm:$0xf0] }
 0x287   : > { %3049 = vmatpush.bf16.msrb.mxu3 %v3356_v2  ;;  %v3332_v55 = vor.u32 %v3416_v37, %v3329_v62  ;;  %v3291_v2 = vld [vmem:[%s5911_s5 + $0x18] sm:$0xf] }
 0x288   : > { %v2594_v48 = vsel %vm2565_vm10, %v2561_v8, %v4067_v44  ;;  %v2595_v59 = vsel %vm2565_vm10, %v2562_v22, %v4068_v17  ;;  %v3340_v17 = vor.u32 %v3420_v51, %v3339_v41  ;;  %v3341_v44 = vld [vmem:[%s5911_s5 + $0x84] sm:$0xf0] }
 0x289   : > { %v2612_v47 = vpack.c.bf16 %v2595_v59, %v2594_v48  ;;  %v3344_v8 = vor.u32 %v3419_v56, %v3341_v44  ;;  %v3327_v48 = vld [vmem:[%s5911_s5 + $0x60] sm:$0xf]  ;;  %v3417_v59 = vld [vmem:[%s5911_s5 + $0x68] sm:$0xf0] }
 0x28b   : > { %3275 = vmatmul.msk.bf16.gmra.mxu2 %vm2654_vm11, %v2612_v47  ;;  %v4091_v61 = vpop.permute.xlu0 %4090  ;;  %3050 = vmatpush.bf16.msrb.mxu3 %v3344_v8  ;;  %v3328_v47 = vor.u32 %v3417_v59, %v3327_v48  ;;  %v5806_v8 = vld [vmem:[%s5910_s4] ss:$0 sm:$0xff] }
 0x28c   : > { %v4093_v35 = vunpack.i.h.bf16 %v4091_v61  ;;  %v4092_v30 = vunpack.i.l.bf16 %v4091_v61 }
 0x28d   : > { %v4081_v1 = vpop.permute.xlu1 %4080 }
 0x28e   : > { %v4083_v18 = vunpack.i.h.bf16 %v4081_v1  ;;  %v4082_v57 = vunpack.i.l.bf16 %v4081_v1 }
 0x28f   : > { %v2736_v54 = vpop.f32.mrf.mxu1  ;;  %3051 = vmatpush.bf16.msrb.mxu3 %v3332_v55 }
 0x290   : > { %v2497_v24 = vsel %vm2466_vm7, %v2464_v0, %v4082_v57  ;;  %v2498_v6 = vsel %vm2466_vm7, %v2465_v28, %v4083_v18  ;;  %v2737_v20 = vadd.f32 %v5353_v26, %v2736_v54 }
 0x291   : > { %v2530_v31 = vsel %vm2499_vm8, %v2497_v24, %v4087_v53  ;;  %v2531_v29 = vsel %vm2499_vm8, %v2498_v6, %v4088_v49  ;;  %v3315_v24 = vld [vmem:[%s5911_s5 + $0x48] sm:$0xf]  ;;  %v3414_v6 = vld [vmem:[%s5911_s5 + $0x50] sm:$0xf0] }
 0x292   : > { %v2563_v27 = vsel %vm2532_vm9, %v2530_v31, %v4092_v30  ;;  %v2564_v40 = vsel %vm2532_vm9, %v2531_v29, %v4093_v35  ;;  %v2804_v32 = vmax.f32 %v2737_v20, 0.0  ;;  %v3316_v61 = vor.u32 %v3414_v6, %v3315_v24  ;;  %v3407_v6 = vld [vmem:[%s5911_s5 + $0x1c] sm:$0xf] }
 0x294   : > { %v2835_v25 = vadd.f32 %v2834_v43, %v2804_v32  ;;  %v3423_v43 = vld [vmem:[%s5911_s5 + $0x98] sm:$0xf0] }
 0x295   : > { %v4096_v38 = vpop.permute.xlu1 %4095  ;;  %v3352_v10 = vor.u32 %v3423_v43, %v3351_v21 }
 0x296   : > { %v4098_v19 = vunpack.i.h.bf16 %v4096_v38  ;;  %v4097_v42 = vunpack.i.l.bf16 %v4096_v38 }
 0x297   : > { %v2738_v39 = vpop.f32.mrf.mxu1  ;;  %3036 = vmatpush.bf16.msrb.mxu2 %v3352_v10 }
 0x298   : > { %v2596_v15 = vsel %vm2565_vm10, %v2563_v27, %v4097_v42  ;;  %v2597_v58 = vsel %vm2565_vm10, %v2564_v40, %v4098_v19  ;;  %v2739_v46 = vadd.f32 %v5353_v26, %v2738_v39 }
 0x299   : > { %v2613_v34 = vpack.c.bf16 %v2597_v58, %v2596_v15 }
 0x29a   : > { %v2805_v0 = vmax.f32 %v2739_v46, 0.0 }
 0x29b   : > { %3276 = vmatmul.msk.bf16.gmra.mxu2 %vm2654_vm11, %v2613_v34  ;;  %v3413_v34 = vld [vmem:[%s5911_s5 + $0x4c] sm:$0xf] }
 0x29c   : > { %3037 = vmatpush.bf16.msrb.mxu2 %v3340_v17  ;;  %v2836_v31 = vadd.f32 %v2835_v25, %v2805_v0  ;;  %v3317_v25 = vld [vmem:[%s5911_s5 + $0x54] sm:$0xf0] }
 0x2a0   : > { %3038 = vmatpush.bf16.msrb.mxu2 %v3328_v47 }
 0x2a4   : > { %3039 = vmatpush.bf16.msrb.mxu2 %v3316_v61  ;;  %v3293_v61 = vld [vmem:[%s5911_s5 + $0x24] sm:$0xf0] }
 0x2aa   : > { %v2741_v60 = vpop.f32.mrf.mxu1 }
 0x2ab   : > { %v2742_v9 = vadd.f32 %v5353_v26, %v2741_v60  ;;  %v3320_v60 = vor.u32 %v3413_v34, %v3317_v25 }
 0x2ad   : > { %v2806_v49 = vmax.f32 %v2742_v9, 0.0  ;;  %3052 = vmatpush.bf16.msrb.mxu3 %v3320_v60  ;;  %v3427_v9 = vld [vmem:[%s5911_s5 + $0xb8] sm:$0xf0]  ;;  %v3335_v60 = vld [vmem:[%s5911_s5 + $0x68] sm:$0xf] }
 0x2af   : > { %v2837_v54 = vadd.f32 %v2836_v31, %v2806_v49  ;;  %v3296_v49 = vor.u32 %v3407_v6, %v3293_v61 }
 0x2b2   : > { %v2743_v7 = vpop.f32.mrf.mxu1 }
 0x2b3   : > { %v2744_v28 = vadd.f32 %v5353_v26, %v2743_v7  ;;  %v3304_v7 = vor.u32 %v3411_v45, %v3303_v33 }
 0x2b5   : > { %v2807_v29 = vmax.f32 %v2744_v28, 0.0  ;;  %3040 = vmatpush.bf16.msrb.mxu2 %v3304_v7 }
 0x2b7   : > { %v2838_v27 = vadd.f32 %v2837_v54, %v2807_v29  ;;  %v3404_v54 = vld [vmem:[%s5911_s5 + $0x4] sm:$0xf] }
 0x2c8   : > { %v2746_v36 = vpop.f32.mrf.mxu1 }
 0x2c9   : > { %v2747_v53 = vadd.f32 %v5353_v26, %v2746_v36  ;;  %v3410_v36 = vld [vmem:[%s5911_s5 + $0x34] sm:$0xf] }
 0x2ca   : > { %v3308_v5 = vor.u32 %v3410_v36, %v3305_v23  ;;  %v3323_v36 = vld [vmem:[%s5911_s5 + $0x50] sm:$0xf] }
 0x2cb   : > { %v5717_v52 = vpop.f32.mrf.mxu2  ;;  %v2808_v19 = vmax.f32 %v2747_v53, 0.0  ;;  %v3359_v53 = vld [vmem:[%s5911_s5 + $0x98] sm:$0xf] }
 0x2cc   : > { %3053 = vmatpush.bf16.msrb.mxu3 %v3308_v5  ;;  %v2767_v48 = vadd.f32 %v5806_v8, %v5717_v52  ;;  %v3371_v52 = vld [vmem:[%s5911_s5 + $0xb0] sm:$0xf] }
 0x2cd   : > { %v2839_v15 = vadd.f32 %v2838_v27, %v2808_v19  ;;  %v3372_v24 = vor.u32 %v3427_v9, %v3371_v52  ;;  %v3281_v19 = vld [vmem:[%s5911_s5 + $0xc] sm:$0xf0]  ;;  %v3406_v52 = vld [vmem:[%s5911_s5 + $0x10] sm:$0xf0] }
 0x2ce   : > { %v3284_v27 = vor.u32 %v3404_v54, %v3281_v19 }
 0x2d0   : > { %v2748_v3 = vpop.f32.mrf.mxu1  ;;  %3054 = vmatpush.bf16.msrb.mxu3 %v3296_v49 }
 0x2d1   : > { %v2749_v38 = vadd.f32 %v5353_v26, %v2748_v3  ;;  %v3408_v3 = vld [vmem:[%s5911_s5 + $0x20] sm:$0xf0] }
 0x2d2   : > { %v3292_v51 = vor.u32 %v3408_v3, %v3291_v2 }
 0x2d3   : > { %v5725_v63 = vpop.f32.mrf.mxu2  ;;  %v2809_v40 = vmax.f32 %v2749_v38, 0.0 }
 0x2d4   : > { %3041 = vmatpush.bf16.msrb.mxu2 %v3292_v51  ;;  %v2769_v37 = vadd.f32 %v5806_v8, %v5725_v63  ;;  %v2816_v63 = vmax.f32 %v2767_v48, 0.0  ;;  %3055 = vmatpush.bf16.msrb.mxu3 %v3284_v27 }
 0x2d5   : > { %v2840_v16 = vadd.f32 %v2839_v15, %v2809_v40 }
 0x2d9   : > { %v2751_v4 = vpop.f32.mrf.mxu1 }
 0x2da   : > { %v2752_v42 = vadd.f32 %v5353_v26, %v2751_v4 }
 0x2db   : > { %v5739_v22 = vpop.f32.mrf.mxu2 }
 0x2dc   : > { %v2810_v58 = vmax.f32 %v2752_v42, 0.0  ;;  %v2772_v0 = vadd.f32 %v5806_v8, %v5739_v22  ;;  %v3424_v22 = vld [vmem:[%s5911_s5 + $0xa0] sm:$0xf0]  ;;  %v3347_v42 = vld [vmem:[%s5911_s5 + $0x80] sm:$0xf] }
 0x2dd   : > { %v3360_v38 = vor.u32 %v3424_v22, %v3359_v53 }
 0x2de   : > { %v2841_v21 = vadd.f32 %v2840_v16, %v2810_v58  ;;  %v2818_v40 = vmax.f32 %v2772_v0, 0.0  ;;  %v3418_v16 = vld [vmem:[%s5911_s5 + $0x70] sm:$0xf0] }
 0x2df   : > { %v3336_v7 = vor.u32 %v3418_v16, %v3335_v60 }
 0x2e1   : > { %v2753_v1 = vpop.f32.mrf.mxu1 }
 0x2e2   : > { %v2754_v20 = vadd.f32 %v5353_v26, %v2753_v1  ;;  %v3279_v1 = vld [vmem:[%s5911_s5] sm:$0xf] }
 0x2e3   : > { %v5747_v13 = vpop.f32.mrf.mxu2 }
 0x2e4   : > { %v2811_v12 = vmax.f32 %v2754_v20, 0.0  ;;  %v2774_v31 = vadd.f32 %v5806_v8, %v5747_v13  ;;  %v3421_v13 = vld [vmem:[%s5911_s5 + $0x88] sm:$0xf0] }
 0x2e6   : > { %v2842_v41 = vadd.f32 %v2841_v21, %v2811_v12 }
 0x2eb   : > { %v5755_v18 = vpop.f32.mrf.mxu2 }
 0x2ec   : > { %v2777_v20 = vadd.f32 %v5806_v8, %v5755_v18 }
 0x2ee   : > { %v2820_v12 = vmax.f32 %v2777_v20, 0.0 }
 0x2f2   : > { %v2756_v57 = vpop.f32.mrf.mxu1 }
 0x2f3   : > { %v5757_v50 = vpop.f32.mrf.mxu2  ;;  %v2757_v32 = vadd.f32 %v5353_v26, %v2756_v57  ;;  %v3405_v57 = vld [vmem:[%s5911_s5 + $0x8] sm:$0xf0] }
 0x2f4   : > { %v3280_v46 = vor.u32 %v3405_v57, %v3279_v1  ;;  %v2779_v34 = vadd.f32 %v5806_v8, %v5757_v50 }
 0x2f5   : > { %v2812_v43 = vmax.f32 %v2757_v32, 0.0  ;;  %v2819_v32 = vmax.f32 %v2774_v31, 0.0 }
 0x2f6   : > { %3042 = vmatpush.bf16.msrb.mxu2 %v3280_v46  ;;  %v2821_v33 = vmax.f32 %v2779_v34, 0.0  ;;  %v3287_v46 = vld [vmem:[%s5911_s5 + $0x8] sm:$0xf] }
 0x2f7   : > { %v2843_v56 = vadd.f32 %v2842_v41, %v2812_v43  ;;  %v3311_v41 = vld [vmem:[%s5911_s5 + $0x38] sm:$0xf] }
 0x2fa   : > { %v2758_v35 = vpop.f32.mrf.mxu1  ;;  %3061 = vmatpush.bf16.msra.mxu2 %v3372_v24 }
 0x2fb   : > { %v5769_v30 = vpop.f32.mrf.mxu2  ;;  %v2759_v14 = vadd.f32 %v5353_v26, %v2758_v35  ;;  %v2817_v35 = vmax.f32 %v2769_v37, 0.0 }
 0x2fc   : > { %v2782_v18 = vadd.f32 %v5806_v8, %v5769_v30  ;;  %v3415_v30 = vld [vmem:[%s5911_s5 + $0x58] sm:$0xf0] }
 0x2fd   : > { %v3324_v3 = vor.u32 %v3415_v30, %v3323_v36 }
 0x2fe   : > { %3062 = vmatpush.bf16.msra.mxu2 %v3360_v38  ;;  %v2822_v21 = vmax.f32 %v2782_v18, 0.0  ;;  %v2899_v38 = vld [vmem:[%s5912_s6] sm:$0x7] }
 0x2ff   : > { %v3030_v54 = vperm.slane %v2899_v38, 1  ;;  %v3031_v27 = vperm.slane %v2899_v38, 2 }
 0x302   : > { %v2761_v39 = vpop.f32.mrf.mxu1 }
 0x303   : > { %v5788_v11 = vpop.f32.mrf.mxu2  ;;  %v2762_v10 = vadd.f32 %v5353_v26, %v2761_v39  ;;  %v2813_v26 = vmax.f32 %v2759_v14, 0.0  ;;  %v3348_v39 = vor.u32 %v3421_v13, %v3347_v42 }
 0x304   : > { %v2784_v50 = vadd.f32 %v5806_v8, %v5788_v11 }
 0x305   : > { %v2814_v17 = vmax.f32 %v2762_v10, 0.0  ;;  %v2844_v59 = vadd.f32 %v2843_v56, %v2813_v26  ;;  %3063 = vmatpush.bf16.msra.mxu2 %v3348_v39  ;;  %v3412_v26 = vld [vmem:[%s5911_s5 + $0x40] sm:$0xf0] }
 0x306   : > { %v2823_v5 = vmax.f32 %v2784_v50, 0.0 }
 0x307   : > { %v2845_v62 = vadd.f32 %v2844_v59, %v2814_v17  ;;  %v3312_v59 = vor.u32 %v3412_v26, %v3311_v41 }
 0x309   : > { %3064 = vmatpush.bf16.msra.mxu2 %v3336_v7 }
 0x30a   : > { %v2763_v44 = vpop.f32.mrf.mxu1 }
 0x30b   : > { %v2764_v4 = vadd.f32 %v5806_v8, %v2763_v44 }
 0x30d   : > { %v2815_v55 = vmax.f32 %v2764_v4, 0.0  ;;  %3065 = vmatpush.bf16.msra.mxu2 %v3324_v3  ;;  %v3299_v4 = vld [vmem:[%s5911_s5 + $0x20] sm:$0xf] }
 0x30e   : > { %v2786_v47 = vpop.f32.mrf.mxu2 }
 0x30f   : > { %v2846_v28 = vadd.f32 %v2845_v62, %v2815_v55  ;;  %v2787_v43 = vadd.f32 %v5806_v8, %v2786_v47  ;;  %v3409_v47 = vld [vmem:[%s5911_s5 + $0x28] sm:$0xf0] }
 0x310   : > { %v3300_v57 = vor.u32 %v3409_v47, %v3299_v4 }
 0x311   : > { %v2847_v29 = vadd.f32 %v2846_v28, %v2816_v63  ;;  %v2824_v51 = vmax.f32 %v2787_v43, 0.0  ;;  %3066 = vmatpush.bf16.msra.mxu2 %v3312_v59  ;;  %v3288_v28 = vor.u32 %v3406_v52, %v3287_v46 }
 0x313   : > { %v2848_v15 = vadd.f32 %v2847_v29, %v2817_v35 }
 0x315   : > { %v2849_v25 = vadd.f32 %v2848_v15, %v2818_v40  ;;  %3067 = vmatpush.bf16.msra.mxu2 %v3300_v57  ;;  %v3029_v40 = vperm.slane %v2899_v38, 0 }
 0x316   : > { %v2788_v58 = vpop.f32.mrf.mxu2 }
 0x317   : > { %v2850_v14 = vadd.f32 %v2849_v25, %v2819_v32  ;;  %v2789_v11 = vadd.f32 %v5806_v8, %v2788_v58  ;;  %v5972_v25 = vlaneseq }
 0x319   : > { %v2851_v45 = vadd.f32 %v2850_v14, %v2820_v12  ;;  %v2825_v44 = vmax.f32 %v2789_v11, 0.0  ;;  %3068 = vmatpush.bf16.msra.mxu2 %v3288_v28  ;;  %vm3086_vm13 = vcmp.lt.s32.totalorder %v5972_v25, 384 }
 0x31b   : > { %v2852_v10 = vadd.f32 %v2851_v45, %v2821_v33 }
 0x31d   : > { %v2853_v2 = vadd.f32 %v2852_v10, %v2822_v21 }
 0x31e   : > { %v2791_v23 = vpop.f32.mrf.mxu2 }
 0x31f   : > { %v2854_v56 = vadd.f32 %v2853_v2, %v2823_v5  ;;  %v2792_v48 = vadd.f32 %v5806_v8, %v2791_v23 }
 0x321   : > { %v2855_v17 = vadd.f32 %v2854_v56, %v2824_v51  ;;  %v2826_v55 = vmax.f32 %v2792_v48, 0.0 }
 0x323   : > { %v2856_v37 = vadd.f32 %v2855_v17, %v2825_v44 }
 0x325   : > { %v2857_v9 = vadd.f32 %v2856_v37, %v2826_v55 }
 0x326   : > { %v2793_v62 = vpop.f32.mrf.mxu2 }
 0x327   : > { %v2794_v1 = vadd.f32 %v5806_v8, %v2793_v62 }
 0x329   : > { %v2827_v63 = vmax.f32 %v2794_v1, 0.0 }
 0x32b   : > { %v2858_v0 = vadd.f32 %v2857_v9, %v2827_v63 }
 0x32d   : > { %v2859_v24 = vrot.slane %v2858_v0, 4 }
 0x32f   : > { %v2860_v6 = vadd.f32 %v2859_v24, %v2858_v0 }
 0x331   : > { %v2861_v61 = vrot.slane %v2860_v6, 2 }
 0x333   : > { %v2862_v8 = vadd.f32 %v2861_v61, %v2860_v6 }
 0x335   : > { %v2863_v49 = vrot.slane %v2862_v8, 1 }
 0x337   : > { %v2864_v53 = vadd.f32 %v2863_v49, %v2862_v8 }
 0x339   : > { %v2865_v22 = vmul.f32 0.00390625, %v2864_v53 }
 0x33b   : > { %v2866_v35 = vpack.c.bf16 %v2865_v22, %v2865_v22 }
 0x33d   : > { %3043 = vmatmul.bf16.vlgmr.msrb.gmra.mxu2 %v2866_v35  ;;  %3056 = vmatmul.bf16.vlgmr.msrb.gmra.mxu3 %v2866_v35 }
 0x34d   : > { %3069 = vmatmul.bf16.vlgmr.msra.gmra.mxu2 %v2866_v35 }
 0x3c0   : > { %v3044_v31 = vpop.f32.mrf.mxu2  ;;  %v3057_v29 = vpop.f32.mrf.mxu3 }
 0x3c1   : > { %v3058_v13 = vadd.f32 %v3057_v29, %v3030_v54  ;;  %v3045_v32 = vadd.f32 %v3044_v31, %v3029_v40 }
 0x3c3   : > { %v3077_v20 = vrot.slane %v3058_v13, 7 }
 0x3c5   : > { %v3080_v39 = vsel %vm3079_vm0, %v3045_v32, %v3077_v20 }
 0x3c8   : > { %v3046_v19 = vpop.f32.mrf.mxu2  ;;  %v3059_v42 = vpop.f32.mrf.mxu3 }
 0x3d0   : > { %v3070_v15 = vpop.f32.mrf.mxu2 }
 0x3d1   : > { %v3071_v58 = vadd.f32 %v3070_v15, %v3031_v27 }
 0x3d3   : > { %v3078_v34 = vrot.slane %v3071_v58, 6 }
 0x3d5   : > { %v3082_v60 = vsel %vm3081_vm12, %v3080_v39, %v3078_v34 }
 0x3d6   : > { %3088 = vst.msk [vmem:[%s276_s26] sm:$0x7] %vm3086_vm13, %v3082_v60 }
 0x3d8   : > { %v3072_v16 = vpop.f32.mrf.mxu2 }
 0x3d9 PF: > { %s17_s24 = sadd.s32 1, %s4117_s24  }
 0x3da   : > { %p14_p4 = scmp.ge.s32.totalorder %s17_s24, 4  }
 0x3dc   :  { %16 = sbr.rel (!%p14_p4) target bundleno = 1 (0x1), region = 80 }

</bundles_post_ra>
